<compile_context>
chip_gen: v7x
topology: tpu7x:2x2x1
jax: 0.10.0
libtpu: 0.0.40
codegen_flags: <defaults>
</compile_context>

<pallas_src>
import numpy as np
import jax
import jax.numpy as jnp
from jax.experimental import pallas as pl
from jax.experimental.pallas import tpu as pltpu

# ---- synthetic "cfg" (module config) ----
VOCAB = 14          # len(cfg.num_sequence)
PAD = 0             # cfg.num_sequence.PAD (also padding_value for outputs)
EMB = 32            # cfg.embedding_dim
HID = 32            # cfg.hidden_size
NUM_LAYERS = 1      # cfg.num_layer (single-layer GRU implemented)


def gru_kernel(gi_ref, len_ref, wh_ref, bh_ref, out_ref, hid_ref):
    """Full masked GRU recurrence over T timesteps in one invocation.

    gi_ref:  (B, T, 3H)  pre-projected inputs: embedding[ids] @ W_ih^T + b_ih
    len_ref: (B, 1)      int32 valid lengths
    wh_ref:  (H, 3H)     W_hh^T
    bh_ref:  (1, 3H)     b_hh
    out_ref: (B, T*H)    lane-dense output slab (reshaped to (B,T,H) outside)
    hid_ref: (B, H)      final hidden state (state at last valid timestep)
    """
    B, T, _ = gi_ref.shape
    H = wh_ref.shape[0]

    wh = wh_ref[...]                                   # (H, 3H)
    bh = bh_ref[...]                                   # (1, 3H)

    # ---- prologue: one iota compare -> float validity mask for all steps ----
    t_ids = jax.lax.broadcasted_iota(jnp.int32, (B, T, H), dimension=1)
    lens3 = len_ref[...].reshape(B, 1, 1)              # (B,1,1) int32
    mask = (t_ids < lens3).astype(jnp.float32)         # (B, T, H)

    # ---- serial recurrence: only h @ W_hh^T + gates on the critical path ----
    h = jnp.zeros((B, H), jnp.float32)
    outs = []
    for t in range(T):                                 # static unroll (T small)
        gi_t = gi_ref[:, t, :]                         # (B, 3H) sublane ref load
        gh = jnp.dot(h, wh, preferred_element_type=jnp.float32) + bh
        s_rz = jax.nn.sigmoid(gi_t[:, :2 * H] + gh[:, :2 * H])  # merged r|z push
        r = s_rz[:, :H]
        z = s_rz[:, H:]
        n = jnp.tanh(gi_t[:, 2 * H:] + r * gh[:, 2 * H:])
        h_new = n + z * (h - n)                        # == (1-z)*n + z*h
        m = mask[:, t, :]                              # (B, H) float
        h = h + m * (h_new - h)                        # finished rows keep state
        outs.append(m * h_new)                         # PAD == 0 -> pad fill

    # one lane-dense store: (B, T*H), last dim a multiple of 128
    out_ref[...] = jnp.concatenate(outs, axis=-1)
    hid_ref[...] = h


def prepare_params(params):
    """One-time conversion of torch-layout params to kernel-ready layout."""
    emb = params["embedding"].astype(jnp.float32)
    gi_table = emb @ params["w_ih"].T + params["b_ih"][None, :]   # (VOCAB, 3H)
    return {
        "gi_table": gi_table,                 # embedding ∘ W_ih^T ∘ (+ b_ih), fused
        "w_hh_t": params["w_hh"].T,           # (H, 3H)
        "b_hh": params["b_hh"][None, :],      # (1, 3H)
    }


def encoder_forward(inputs, lengths_2d, kparams):
    """inputs: int32 [B, T]; lengths_2d: int32 [B, 1] (sorted descending).

    Returns (out [B, T, H], hidden [1, B, H]).
    """
    B, T = inputs.shape
    # Embedding lookup + input projection + b_ih in a single XLA gather.
    gi = jnp.take(kparams["gi_table"], inputs, axis=0)            # (B, T, 3H)

    vmem = pl.BlockSpec(memory_space=pltpu.MemorySpace.VMEM)      # whole-array VMEM
    out_flat, hidden = pl.pallas_call(
        gru_kernel,
        out_shape=(
            jax.ShapeDtypeStruct((B, T * HID), jnp.float32),
            jax.ShapeDtypeStruct((B, HID), jnp.float32),
        ),
        in_specs=[vmem] * 4,
        out_specs=(vmem, vmem),
    )(gi, lengths_2d, kparams["w_hh_t"], kparams["b_hh"])

    out = out_flat.reshape(B, T, HID)      # free row-major reshape (no transpose)
    return out, hidden[None]               # (1, B, H) for num_layers == 1


def init_params(key):
    k_emb, k1, k2, k3, k4 = jax.random.split(key, 5)
    emb = jax.random.normal(k_emb, (VOCAB, EMB), jnp.float32)
    emb = emb.at[PAD].set(0.0)  # padding_idx row = 0
    bound = 1.0 / np.sqrt(HID)
    w_ih = jax.random.uniform(k1, (3 * HID, EMB), jnp.float32, -bound, bound)
    w_hh = jax.random.uniform(k2, (3 * HID, HID), jnp.float32, -bound, bound)
    b_ih = jax.random.uniform(k3, (3 * HID,), jnp.float32, -bound, bound)
    b_hh = jax.random.uniform(k4, (3 * HID,), jnp.float32, -bound, bound)
    return {"embedding": emb, "w_ih": w_ih, "w_hh": w_hh, "b_ih": b_ih, "b_hh": b_hh}


def reference_forward(inputs, lengths_2d, params):
    """Pure-JAX reference matching torch GRU + pack/pad semantics."""
    B, T = inputs.shape
    embedded = jnp.take(params["embedding"], inputs, axis=0).astype(jnp.float32)
    wi, wh = params["w_ih"], params["w_hh"]
    bi, bh = params["b_ih"], params["b_hh"]
    h = jnp.zeros((B, HID), jnp.float32)
    outs = []
    for t in range(T):
        x = embedded[:, t, :]
        gi = x @ wi.T + bi
        gh = h @ wh.T + bh
        r = jax.nn.sigmoid(gi[:, :HID] + gh[:, :HID])
        z = jax.nn.sigmoid(gi[:, HID:2 * HID] + gh[:, HID:2 * HID])
        n = jnp.tanh(gi[:, 2 * HID:] + r * gh[:, 2 * HID:])
        h_new = (1.0 - z) * n + z * h
        m = (t < lengths_2d).astype(jnp.float32)       # (B, 1)
        h = m * h_new + (1.0 - m) * h
        outs.append(m * h_new + (1.0 - m) * float(PAD))
    return jnp.stack(outs, axis=1), h[None]


if __name__ == "__main__":
    key = jax.random.PRNGKey(0)
    params = init_params(key)
    kparams = prepare_params(params)      # one-time kernel-ready layout

    B, T = 8, 8                           # batch = 8 fills all sublanes / MXU rows
    tok_key, _ = jax.random.split(key)
    inputs = jax.random.randint(tok_key, (B, T), 1, VOCAB, dtype=jnp.int32)
    # lengths sorted descending (enforce_sorted=True); max length == T so the
    # pad_packed_sequence output width matches T.
    lengths = jnp.array([[8], [8], [7], [6], [5], [4], [3], [2]], dtype=jnp.int32)
    # zero out padded positions of the input as PyTorch padded batches would
    pad_mask = jnp.arange(T)[None, :] < lengths        # (B, T)
    inputs = jnp.where(pad_mask, inputs, PAD)

    fwd = jax.jit(encoder_forward)
    out, hidden = fwd(inputs, lengths, kparams)
    jax.block_until_ready((out, hidden))

    out_ref, hidden_ref = reference_forward(inputs, lengths, params)
    assert np.allclose(np.asarray(out), np.asarray(out_ref), atol=1e-4), "out mismatch"
    assert np.allclose(np.asarray(hidden), np.asarray(hidden_ref), atol=1e-4), "hidden mismatch"

    print("KERNEL_OK")
</pallas_src>

<mosaic_0001>
module attributes {stable_mosaic.version = 11 : i64} {
  func.func @gru_kernel(%arg0: memref<8x8x96xf32, #tpu.memory_space<vmem>>, %arg1: memref<8x1xi32, #tpu.memory_space<vmem>>, %arg2: memref<32x96xf32, #tpu.memory_space<vmem>>, %arg3: memref<1x96xf32, #tpu.memory_space<vmem>>, %arg4: memref<8x256xf32, #tpu.memory_space<vmem>>, %arg5: memref<8x32xf32, #tpu.memory_space<vmem>>) attributes {dimension_semantics = [], scalar_prefetch = 0 : i64, scratch_operands = 0 : i64, tpu.core_type = #tpu.core_type<tc>} {
    %c0 = arith.constant 0 : index
    %c0_0 = arith.constant 0 : index
    %0 = vector.load %arg2[%c0, %c0_0] : memref<32x96xf32, #tpu.memory_space<vmem>>, vector<32x96xf32>
    %c0_1 = arith.constant 0 : index
    %c0_2 = arith.constant 0 : index
    %1 = vector.load %arg3[%c0_1, %c0_2] : memref<1x96xf32, #tpu.memory_space<vmem>>, vector<1x96xf32>
    %2 = tpu.iota {dimensions = array<i32: 1>} : vector<8x8x32xi32>
    %c0_3 = arith.constant 0 : index
    %c0_4 = arith.constant 0 : index
    %3 = vector.load %arg1[%c0_3, %c0_4] : memref<8x1xi32, #tpu.memory_space<vmem>>, vector<8x1xi32>
    %4 = vector.shape_cast %3 : vector<8x1xi32> to vector<8x1x1xi32>
    %5 = vector.broadcast %4 : vector<8x1x1xi32> to vector<8x8x32xi32>
    %6 = arith.cmpi slt, %2, %5 : vector<8x8x32xi32>
    %7 = arith.extui %6 : vector<8x8x32xi1> to vector<8x8x32xi32>
    %8 = arith.sitofp %7 : vector<8x8x32xi32> to vector<8x8x32xf32>
    %cst = arith.constant 0.000000e+00 : f32
    %9 = vector.broadcast %cst : f32 to vector<8x32xf32>
    %c0_5 = arith.constant 0 : index
    %c0_6 = arith.constant 0 : index
    %c0_7 = arith.constant 0 : index
    %10 = vector.load %arg0[%c0_5, %c0_6, %c0_7] : memref<8x8x96xf32, #tpu.memory_space<vmem>>, vector<8x1x96xf32>
    %11 = vector.shape_cast %10 : vector<8x1x96xf32> to vector<8x96xf32>
    %cst_8 = arith.constant dense<0.000000e+00> : vector<8x96xf32>
    %12 = tpu.matmul %9, %0, %cst_8 {dimension_numbers = #tpu.dot_dimension_numbers<[1], [0], [0], [1], [0, 0, 1, 1], [], []>} : vector<8x32xf32>, vector<32x96xf32>, vector<8x96xf32> -> vector<8x96xf32>
    %13 = vector.broadcast %1 : vector<1x96xf32> to vector<8x96xf32>
    %14 = arith.addf %12, %13 : vector<8x96xf32>
    %15 = vector.extract_strided_slice %11 {offsets = [0, 0], sizes = [8, 64], strides = [1, 1]} : vector<8x96xf32> to vector<8x64xf32>
    %16 = vector.extract_strided_slice %14 {offsets = [0, 0], sizes = [8, 64], strides = [1, 1]} : vector<8x96xf32> to vector<8x64xf32>
    %17 = arith.addf %15, %16 : vector<8x64xf32>
    %18 = arith.negf %17 : vector<8x64xf32>
    %19 = math.exp %18 : vector<8x64xf32>
    %cst_9 = arith.constant 1.000000e+00 : f32
    %20 = vector.broadcast %cst_9 : f32 to vector<8x64xf32>
    %21 = arith.addf %20, %19 : vector<8x64xf32>
    %22 = arith.divf %20, %21 : vector<8x64xf32>
    %23 = vector.extract_strided_slice %22 {offsets = [0, 0], sizes = [8, 32], strides = [1, 1]} : vector<8x64xf32> to vector<8x32xf32>
    %24 = vector.extract_strided_slice %22 {offsets = [0, 32], sizes = [8, 32], strides = [1, 1]} : vector<8x64xf32> to vector<8x32xf32>
    %25 = vector.extract_strided_slice %11 {offsets = [0, 64], sizes = [8, 32], strides = [1, 1]} : vector<8x96xf32> to vector<8x32xf32>
    %26 = vector.extract_strided_slice %14 {offsets = [0, 64], sizes = [8, 32], strides = [1, 1]} : vector<8x96xf32> to vector<8x32xf32>
    %27 = arith.mulf %23, %26 : vector<8x32xf32>
    %28 = arith.addf %25, %27 : vector<8x32xf32>
    %29 = math.tanh %28 : vector<8x32xf32>
    %30 = arith.subf %9, %29 : vector<8x32xf32>
    %31 = arith.mulf %24, %30 : vector<8x32xf32>
    %32 = arith.addf %29, %31 : vector<8x32xf32>
    %33 = vector.extract_strided_slice %8 {offsets = [0, 0, 0], sizes = [8, 1, 32], strides = [1, 1, 1]} : vector<8x8x32xf32> to vector<8x1x32xf32>
    %34 = vector.shape_cast %33 : vector<8x1x32xf32> to vector<8x32xf32>
    %35 = arith.subf %32, %9 : vector<8x32xf32>
    %36 = arith.mulf %34, %35 : vector<8x32xf32>
    %37 = arith.addf %9, %36 : vector<8x32xf32>
    %38 = arith.mulf %34, %32 : vector<8x32xf32>
    %c0_10 = arith.constant 0 : index
    %c1 = arith.constant 1 : index
    %c0_11 = arith.constant 0 : index
    %39 = vector.load %arg0[%c0_10, %c1, %c0_11] : memref<8x8x96xf32, #tpu.memory_space<vmem>>, vector<8x1x96xf32>
    %40 = vector.shape_cast %39 : vector<8x1x96xf32> to vector<8x96xf32>
    %cst_12 = arith.constant dense<0.000000e+00> : vector<8x96xf32>
    %41 = tpu.matmul %37, %0, %cst_12 {dimension_numbers = #tpu.dot_dimension_numbers<[1], [0], [0], [1], [0, 0, 1, 1], [], []>} : vector<8x32xf32>, vector<32x96xf32>, vector<8x96xf32> -> vector<8x96xf32>
    %42 = vector.broadcast %1 : vector<1x96xf32> to vector<8x96xf32>
    %43 = arith.addf %41, %42 : vector<8x96xf32>
    %44 = vector.extract_strided_slice %40 {offsets = [0, 0], sizes = [8, 64], strides = [1, 1]} : vector<8x96xf32> to vector<8x64xf32>
    %45 = vector.extract_strided_slice %43 {offsets = [0, 0], sizes = [8, 64], strides = [1, 1]} : vector<8x96xf32> to vector<8x64xf32>
    %46 = arith.addf %44, %45 : vector<8x64xf32>
    %47 = arith.negf %46 : vector<8x64xf32>
    %48 = math.exp %47 : vector<8x64xf32>
    %cst_13 = arith.constant 1.000000e+00 : f32
    %49 = vector.broadcast %cst_13 : f32 to vector<8x64xf32>
    %50 = arith.addf %49, %48 : vector<8x64xf32>
    %51 = arith.divf %49, %50 : vector<8x64xf32>
    %52 = vector.extract_strided_slice %51 {offsets = [0, 0], sizes = [8, 32], strides = [1, 1]} : vector<8x64xf32> to vector<8x32xf32>
    %53 = vector.extract_strided_slice %51 {offsets = [0, 32], sizes = [8, 32], strides = [1, 1]} : vector<8x64xf32> to vector<8x32xf32>
    %54 = vector.extract_strided_slice %40 {offsets = [0, 64], sizes = [8, 32], strides = [1, 1]} : vector<8x96xf32> to vector<8x32xf32>
    %55 = vector.extract_strided_slice %43 {offsets = [0, 64], sizes = [8, 32], strides = [1, 1]} : vector<8x96xf32> to vector<8x32xf32>
    %56 = arith.mulf %52, %55 : vector<8x32xf32>
    %57 = arith.addf %54, %56 : vector<8x32xf32>
    %58 = math.tanh %57 : vector<8x32xf32>
    %59 = arith.subf %37, %58 : vector<8x32xf32>
    %60 = arith.mulf %53, %59 : vector<8x32xf32>
    %61 = arith.addf %58, %60 : vector<8x32xf32>
    %62 = vector.extract_strided_slice %8 {offsets = [0, 1, 0], sizes = [8, 1, 32], strides = [1, 1, 1]} : vector<8x8x32xf32> to vector<8x1x32xf32>
    %63 = vector.shape_cast %62 : vector<8x1x32xf32> to vector<8x32xf32>
    %64 = arith.subf %61, %37 : vector<8x32xf32>
    %65 = arith.mulf %63, %64 : vector<8x32xf32>
    %66 = arith.addf %37, %65 : vector<8x32xf32>
    %67 = arith.mulf %63, %61 : vector<8x32xf32>
    %c0_14 = arith.constant 0 : index
    %c2 = arith.constant 2 : index
    %c0_15 = arith.constant 0 : index
    %68 = vector.load %arg0[%c0_14, %c2, %c0_15] : memref<8x8x96xf32, #tpu.memory_space<vmem>>, vector<8x1x96xf32>
    %69 = vector.shape_cast %68 : vector<8x1x96xf32> to vector<8x96xf32>
    %cst_16 = arith.constant dense<0.000000e+00> : vector<8x96xf32>
    %70 = tpu.matmul %66, %0, %cst_16 {dimension_numbers = #tpu.dot_dimension_numbers<[1], [0], [0], [1], [0, 0, 1, 1], [], []>} : vector<8x32xf32>, vector<32x96xf32>, vector<8x96xf32> -> vector<8x96xf32>
    %71 = vector.broadcast %1 : vector<1x96xf32> to vector<8x96xf32>
    %72 = arith.addf %70, %71 : vector<8x96xf32>
    %73 = vector.extract_strided_slice %69 {offsets = [0, 0], sizes = [8, 64], strides = [1, 1]} : vector<8x96xf32> to vector<8x64xf32>
    %74 = vector.extract_strided_slice %72 {offsets = [0, 0], sizes = [8, 64], strides = [1, 1]} : vector<8x96xf32> to vector<8x64xf32>
    %75 = arith.addf %73, %74 : vector<8x64xf32>
    %76 = arith.negf %75 : vector<8x64xf32>
    %77 = math.exp %76 : vector<8x64xf32>
    %cst_17 = arith.constant 1.000000e+00 : f32
    %78 = vector.broadcast %cst_17 : f32 to vector<8x64xf32>
    %79 = arith.addf %78, %77 : vector<8x64xf32>
    %80 = arith.divf %78, %79 : vector<8x64xf32>
    %81 = vector.extract_strided_slice %80 {offsets = [0, 0], sizes = [8, 32], strides = [1, 1]} : vector<8x64xf32> to vector<8x32xf32>
    %82 = vector.extract_strided_slice %80 {offsets = [0, 32], sizes = [8, 32], strides = [1, 1]} : vector<8x64xf32> to vector<8x32xf32>
    %83 = vector.extract_strided_slice %69 {offsets = [0, 64], sizes = [8, 32], strides = [1, 1]} : vector<8x96xf32> to vector<8x32xf32>
    %84 = vector.extract_strided_slice %72 {offsets = [0, 64], sizes = [8, 32], strides = [1, 1]} : vector<8x96xf32> to vector<8x32xf32>
    %85 = arith.mulf %81, %84 : vector<8x32xf32>
    %86 = arith.addf %83, %85 : vector<8x32xf32>
    %87 = math.tanh %86 : vector<8x32xf32>
    %88 = arith.subf %66, %87 : vector<8x32xf32>
    %89 = arith.mulf %82, %88 : vector<8x32xf32>
    %90 = arith.addf %87, %89 : vector<8x32xf32>
    %91 = vector.extract_strided_slice %8 {offsets = [0, 2, 0], sizes = [8, 1, 32], strides = [1, 1, 1]} : vector<8x8x32xf32> to vector<8x1x32xf32>
    %92 = vector.shape_cast %91 : vector<8x1x32xf32> to vector<8x32xf32>
    %93 = arith.subf %90, %66 : vector<8x32xf32>
    %94 = arith.mulf %92, %93 : vector<8x32xf32>
    %95 = arith.addf %66, %94 : vector<8x32xf32>
    %96 = arith.mulf %92, %90 : vector<8x32xf32>
    %c0_18 = arith.constant 0 : index
    %c3 = arith.constant 3 : index
    %c0_19 = arith.constant 0 : index
    %97 = vector.load %arg0[%c0_18, %c3, %c0_19] : memref<8x8x96xf32, #tpu.memory_space<vmem>>, vector<8x1x96xf32>
    %98 = vector.shape_cast %97 : vector<8x1x96xf32> to vector<8x96xf32>
    %cst_20 = arith.constant dense<0.000000e+00> : vector<8x96xf32>
    %99 = tpu.matmul %95, %0, %cst_20 {dimension_numbers = #tpu.dot_dimension_numbers<[1], [0], [0], [1], [0, 0, 1, 1], [], []>} : vector<8x32xf32>, vector<32x96xf32>, vector<8x96xf32> -> vector<8x96xf32>
    %100 = vector.broadcast %1 : vector<1x96xf32> to vector<8x96xf32>
    %101 = arith.addf %99, %100 : vector<8x96xf32>
    %102 = vector.extract_strided_slice %98 {offsets = [0, 0], sizes = [8, 64], strides = [1, 1]} : vector<8x96xf32> to vector<8x64xf32>
    %103 = vector.extract_strided_slice %101 {offsets = [0, 0], sizes = [8, 64], strides = [1, 1]} : vector<8x96xf32> to vector<8x64xf32>
    %104 = arith.addf %102, %103 : vector<8x64xf32>
    %105 = arith.negf %104 : vector<8x64xf32>
    %106 = math.exp %105 : vector<8x64xf32>
    %cst_21 = arith.constant 1.000000e+00 : f32
    %107 = vector.broadcast %cst_21 : f32 to vector<8x64xf32>
    %108 = arith.addf %107, %106 : vector<8x64xf32>
    %109 = arith.divf %107, %108 : vector<8x64xf32>
    %110 = vector.extract_strided_slice %109 {offsets = [0, 0], sizes = [8, 32], strides = [1, 1]} : vector<8x64xf32> to vector<8x32xf32>
    %111 = vector.extract_strided_slice %109 {offsets = [0, 32], sizes = [8, 32], strides = [1, 1]} : vector<8x64xf32> to vector<8x32xf32>
    %112 = vector.extract_strided_slice %98 {offsets = [0, 64], sizes = [8, 32], strides = [1, 1]} : vector<8x96xf32> to vector<8x32xf32>
    %113 = vector.extract_strided_slice %101 {offsets = [0, 64], sizes = [8, 32], strides = [1, 1]} : vector<8x96xf32> to vector<8x32xf32>
    %114 = arith.mulf %110, %113 : vector<8x32xf32>
    %115 = arith.addf %112, %114 : vector<8x32xf32>
    %116 = math.tanh %115 : vector<8x32xf32>
    %117 = arith.subf %95, %116 : vector<8x32xf32>
    %118 = arith.mulf %111, %117 : vector<8x32xf32>
    %119 = arith.addf %116, %118 : vector<8x32xf32>
    %120 = vector.extract_strided_slice %8 {offsets = [0, 3, 0], sizes = [8, 1, 32], strides = [1, 1, 1]} : vector<8x8x32xf32> to vector<8x1x32xf32>
    %121 = vector.shape_cast %120 : vector<8x1x32xf32> to vector<8x32xf32>
    %122 = arith.subf %119, %95 : vector<8x32xf32>
    %123 = arith.mulf %121, %122 : vector<8x32xf32>
    %124 = arith.addf %95, %123 : vector<8x32xf32>
    %125 = arith.mulf %121, %119 : vector<8x32xf32>
    %c0_22 = arith.constant 0 : index
    %c4 = arith.constant 4 : index
    %c0_23 = arith.constant 0 : index
    %126 = vector.load %arg0[%c0_22, %c4, %c0_23] : memref<8x8x96xf32, #tpu.memory_space<vmem>>, vector<8x1x96xf32>
    %127 = vector.shape_cast %126 : vector<8x1x96xf32> to vector<8x96xf32>
    %cst_24 = arith.constant dense<0.000000e+00> : vector<8x96xf32>
    %128 = tpu.matmul %124, %0, %cst_24 {dimension_numbers = #tpu.dot_dimension_numbers<[1], [0], [0], [1], [0, 0, 1, 1], [], []>} : vector<8x32xf32>, vector<32x96xf32>, vector<8x96xf32> -> vector<8x96xf32>
    %129 = vector.broadcast %1 : vector<1x96xf32> to vector<8x96xf32>
    %130 = arith.addf %128, %129 : vector<8x96xf32>
    %131 = vector.extract_strided_slice %127 {offsets = [0, 0], sizes = [8, 64], strides = [1, 1]} : vector<8x96xf32> to vector<8x64xf32>
    %132 = vector.extract_strided_slice %130 {offsets = [0, 0], sizes = [8, 64], strides = [1, 1]} : vector<8x96xf32> to vector<8x64xf32>
    %133 = arith.addf %131, %132 : vector<8x64xf32>
    %134 = arith.negf %133 : vector<8x64xf32>
    %135 = math.exp %134 : vector<8x64xf32>
    %cst_25 = arith.constant 1.000000e+00 : f32
    %136 = vector.broadcast %cst_25 : f32 to vector<8x64xf32>
    %137 = arith.addf %136, %135 : vector<8x64xf32>
    %138 = arith.divf %136, %137 : vector<8x64xf32>
    %139 = vector.extract_strided_slice %138 {offsets = [0, 0], sizes = [8, 32], strides = [1, 1]} : vector<8x64xf32> to vector<8x32xf32>
    %140 = vector.extract_strided_slice %138 {offsets = [0, 32], sizes = [8, 32], strides = [1, 1]} : vector<8x64xf32> to vector<8x32xf32>
    %141 = vector.extract_strided_slice %127 {offsets = [0, 64], sizes = [8, 32], strides = [1, 1]} : vector<8x96xf32> to vector<8x32xf32>
    %142 = vector.extract_strided_slice %130 {offsets = [0, 64], sizes = [8, 32], strides = [1, 1]} : vector<8x96xf32> to vector<8x32xf32>
    %143 = arith.mulf %139, %142 : vector<8x32xf32>
    %144 = arith.addf %141, %143 : vector<8x32xf32>
    %145 = math.tanh %144 : vector<8x32xf32>
    %146 = arith.subf %124, %145 : vector<8x32xf32>
    %147 = arith.mulf %140, %146 : vector<8x32xf32>
    %148 = arith.addf %145, %147 : vector<8x32xf32>
    %149 = vector.extract_strided_slice %8 {offsets = [0, 4, 0], sizes = [8, 1, 32], strides = [1, 1, 1]} : vector<8x8x32xf32> to vector<8x1x32xf32>
    %150 = vector.shape_cast %149 : vector<8x1x32xf32> to vector<8x32xf32>
    %151 = arith.subf %148, %124 : vector<8x32xf32>
    %152 = arith.mulf %150, %151 : vector<8x32xf32>
    %153 = arith.addf %124, %152 : vector<8x32xf32>
    %154 = arith.mulf %150, %148 : vector<8x32xf32>
    %c0_26 = arith.constant 0 : index
    %c5 = arith.constant 5 : index
    %c0_27 = arith.constant 0 : index
    %155 = vector.load %arg0[%c0_26, %c5, %c0_27] : memref<8x8x96xf32, #tpu.memory_space<vmem>>, vector<8x1x96xf32>
    %156 = vector.shape_cast %155 : vector<8x1x96xf32> to vector<8x96xf32>
    %cst_28 = arith.constant dense<0.000000e+00> : vector<8x96xf32>
    %157 = tpu.matmul %153, %0, %cst_28 {dimension_numbers = #tpu.dot_dimension_numbers<[1], [0], [0], [1], [0, 0, 1, 1], [], []>} : vector<8x32xf32>, vector<32x96xf32>, vector<8x96xf32> -> vector<8x96xf32>
    %158 = vector.broadcast %1 : vector<1x96xf32> to vector<8x96xf32>
    %159 = arith.addf %157, %158 : vector<8x96xf32>
    %160 = vector.extract_strided_slice %156 {offsets = [0, 0], sizes = [8, 64], strides = [1, 1]} : vector<8x96xf32> to vector<8x64xf32>
    %161 = vector.extract_strided_slice %159 {offsets = [0, 0], sizes = [8, 64], strides = [1, 1]} : vector<8x96xf32> to vector<8x64xf32>
    %162 = arith.addf %160, %161 : vector<8x64xf32>
    %163 = arith.negf %162 : vector<8x64xf32>
    %164 = math.exp %163 : vector<8x64xf32>
    %cst_29 = arith.constant 1.000000e+00 : f32
    %165 = vector.broadcast %cst_29 : f32 to vector<8x64xf32>
    %166 = arith.addf %165, %164 : vector<8x64xf32>
    %167 = arith.divf %165, %166 : vector<8x64xf32>
    %168 = vector.extract_strided_slice %167 {offsets = [0, 0], sizes = [8, 32], strides = [1, 1]} : vector<8x64xf32> to vector<8x32xf32>
    %169 = vector.extract_strided_slice %167 {offsets = [0, 32], sizes = [8, 32], strides = [1, 1]} : vector<8x64xf32> to vector<8x32xf32>
    %170 = vector.extract_strided_slice %156 {offsets = [0, 64], sizes = [8, 32], strides = [1, 1]} : vector<8x96xf32> to vector<8x32xf32>
    %171 = vector.extract_strided_slice %159 {offsets = [0, 64], sizes = [8, 32], strides = [1, 1]} : vector<8x96xf32> to vector<8x32xf32>
    %172 = arith.mulf %168, %171 : vector<8x32xf32>
    %173 = arith.addf %170, %172 : vector<8x32xf32>
    %174 = math.tanh %173 : vector<8x32xf32>
    %175 = arith.subf %153, %174 : vector<8x32xf32>
    %176 = arith.mulf %169, %175 : vector<8x32xf32>
    %177 = arith.addf %174, %176 : vector<8x32xf32>
    %178 = vector.extract_strided_slice %8 {offsets = [0, 5, 0], sizes = [8, 1, 32], strides = [1, 1, 1]} : vector<8x8x32xf32> to vector<8x1x32xf32>
    %179 = vector.shape_cast %178 : vector<8x1x32xf32> to vector<8x32xf32>
    %180 = arith.subf %177, %153 : vector<8x32xf32>
    %181 = arith.mulf %179, %180 : vector<8x32xf32>
    %182 = arith.addf %153, %181 : vector<8x32xf32>
    %183 = arith.mulf %179, %177 : vector<8x32xf32>
    %c0_30 = arith.constant 0 : index
    %c6 = arith.constant 6 : index
    %c0_31 = arith.constant 0 : index
    %184 = vector.load %arg0[%c0_30, %c6, %c0_31] : memref<8x8x96xf32, #tpu.memory_space<vmem>>, vector<8x1x96xf32>
    %185 = vector.shape_cast %184 : vector<8x1x96xf32> to vector<8x96xf32>
    %cst_32 = arith.constant dense<0.000000e+00> : vector<8x96xf32>
    %186 = tpu.matmul %182, %0, %cst_32 {dimension_numbers = #tpu.dot_dimension_numbers<[1], [0], [0], [1], [0, 0, 1, 1], [], []>} : vector<8x32xf32>, vector<32x96xf32>, vector<8x96xf32> -> vector<8x96xf32>
    %187 = vector.broadcast %1 : vector<1x96xf32> to vector<8x96xf32>
    %188 = arith.addf %186, %187 : vector<8x96xf32>
    %189 = vector.extract_strided_slice %185 {offsets = [0, 0], sizes = [8, 64], strides = [1, 1]} : vector<8x96xf32> to vector<8x64xf32>
    %190 = vector.extract_strided_slice %188 {offsets = [0, 0], sizes = [8, 64], strides = [1, 1]} : vector<8x96xf32> to vector<8x64xf32>
    %191 = arith.addf %189, %190 : vector<8x64xf32>
    %192 = arith.negf %191 : vector<8x64xf32>
    %193 = math.exp %192 : vector<8x64xf32>
    %cst_33 = arith.constant 1.000000e+00 : f32
    %194 = vector.broadcast %cst_33 : f32 to vector<8x64xf32>
    %195 = arith.addf %194, %193 : vector<8x64xf32>
    %196 = arith.divf %194, %195 : vector<8x64xf32>
    %197 = vector.extract_strided_slice %196 {offsets = [0, 0], sizes = [8, 32], strides = [1, 1]} : vector<8x64xf32> to vector<8x32xf32>
    %198 = vector.extract_strided_slice %196 {offsets = [0, 32], sizes = [8, 32], strides = [1, 1]} : vector<8x64xf32> to vector<8x32xf32>
    %199 = vector.extract_strided_slice %185 {offsets = [0, 64], sizes = [8, 32], strides = [1, 1]} : vector<8x96xf32> to vector<8x32xf32>
    %200 = vector.extract_strided_slice %188 {offsets = [0, 64], sizes = [8, 32], strides = [1, 1]} : vector<8x96xf32> to vector<8x32xf32>
    %201 = arith.mulf %197, %200 : vector<8x32xf32>
    %202 = arith.addf %199, %201 : vector<8x32xf32>
    %203 = math.tanh %202 : vector<8x32xf32>
    %204 = arith.subf %182, %203 : vector<8x32xf32>
    %205 = arith.mulf %198, %204 : vector<8x32xf32>
    %206 = arith.addf %203, %205 : vector<8x32xf32>
    %207 = vector.extract_strided_slice %8 {offsets = [0, 6, 0], sizes = [8, 1, 32], strides = [1, 1, 1]} : vector<8x8x32xf32> to vector<8x1x32xf32>
    %208 = vector.shape_cast %207 : vector<8x1x32xf32> to vector<8x32xf32>
    %209 = arith.subf %206, %182 : vector<8x32xf32>
    %210 = arith.mulf %208, %209 : vector<8x32xf32>
    %211 = arith.addf %182, %210 : vector<8x32xf32>
    %212 = arith.mulf %208, %206 : vector<8x32xf32>
    %c0_34 = arith.constant 0 : index
    %c7 = arith.constant 7 : index
    %c0_35 = arith.constant 0 : index
    %213 = vector.load %arg0[%c0_34, %c7, %c0_35] : memref<8x8x96xf32, #tpu.memory_space<vmem>>, vector<8x1x96xf32>
    %214 = vector.shape_cast %213 : vector<8x1x96xf32> to vector<8x96xf32>
    %cst_36 = arith.constant dense<0.000000e+00> : vector<8x96xf32>
    %215 = tpu.matmul %211, %0, %cst_36 {dimension_numbers = #tpu.dot_dimension_numbers<[1], [0], [0], [1], [0, 0, 1, 1], [], []>} : vector<8x32xf32>, vector<32x96xf32>, vector<8x96xf32> -> vector<8x96xf32>
    %216 = vector.broadcast %1 : vector<1x96xf32> to vector<8x96xf32>
    %217 = arith.addf %215, %216 : vector<8x96xf32>
    %218 = vector.extract_strided_slice %214 {offsets = [0, 0], sizes = [8, 64], strides = [1, 1]} : vector<8x96xf32> to vector<8x64xf32>
    %219 = vector.extract_strided_slice %217 {offsets = [0, 0], sizes = [8, 64], strides = [1, 1]} : vector<8x96xf32> to vector<8x64xf32>
    %220 = arith.addf %218, %219 : vector<8x64xf32>
    %221 = arith.negf %220 : vector<8x64xf32>
    %222 = math.exp %221 : vector<8x64xf32>
    %cst_37 = arith.constant 1.000000e+00 : f32
    %223 = vector.broadcast %cst_37 : f32 to vector<8x64xf32>
    %224 = arith.addf %223, %222 : vector<8x64xf32>
    %225 = arith.divf %223, %224 : vector<8x64xf32>
    %226 = vector.extract_strided_slice %225 {offsets = [0, 0], sizes = [8, 32], strides = [1, 1]} : vector<8x64xf32> to vector<8x32xf32>
    %227 = vector.extract_strided_slice %225 {offsets = [0, 32], sizes = [8, 32], strides = [1, 1]} : vector<8x64xf32> to vector<8x32xf32>
    %228 = vector.extract_strided_slice %214 {offsets = [0, 64], sizes = [8, 32], strides = [1, 1]} : vector<8x96xf32> to vector<8x32xf32>
    %229 = vector.extract_strided_slice %217 {offsets = [0, 64], sizes = [8, 32], strides = [1, 1]} : vector<8x96xf32> to vector<8x32xf32>
    %230 = arith.mulf %226, %229 : vector<8x32xf32>
    %231 = arith.addf %228, %230 : vector<8x32xf32>
    %232 = math.tanh %231 : vector<8x32xf32>
    %233 = arith.subf %211, %232 : vector<8x32xf32>
    %234 = arith.mulf %227, %233 : vector<8x32xf32>
    %235 = arith.addf %232, %234 : vector<8x32xf32>
    %236 = vector.extract_strided_slice %8 {offsets = [0, 7, 0], sizes = [8, 1, 32], strides = [1, 1, 1]} : vector<8x8x32xf32> to vector<8x1x32xf32>
    %237 = vector.shape_cast %236 : vector<8x1x32xf32> to vector<8x32xf32>
    %238 = arith.subf %235, %211 : vector<8x32xf32>
    %239 = arith.mulf %237, %238 : vector<8x32xf32>
    %240 = arith.addf %211, %239 : vector<8x32xf32>
    %241 = arith.mulf %237, %235 : vector<8x32xf32>
    %242 = tpu.concatenate %38, %67, %96, %125, %154, %183, %212, %241 in 1 : vector<8x32xf32>, vector<8x32xf32>, vector<8x32xf32>, vector<8x32xf32>, vector<8x32xf32>, vector<8x32xf32>, vector<8x32xf32>, vector<8x32xf32> -> vector<8x256xf32>
    %c0_38 = arith.constant 0 : index
    %c0_39 = arith.constant 0 : index
    %243 = vector.load %arg4[%c0_38, %c0_39] : memref<8x256xf32, #tpu.memory_space<vmem>>, vector<8x256xf32>
    tpu.vector_store %arg4[%c0_38, %c0_39], %242 {strides = array<i32>} : memref<8x256xf32, #tpu.memory_space<vmem>>, vector<8x256xf32>,
    %c0_40 = arith.constant 0 : index
    %c0_41 = arith.constant 0 : index
    %244 = vector.load %arg5[%c0_40, %c0_41] : memref<8x32xf32, #tpu.memory_space<vmem>>, vector<8x32xf32>
    tpu.vector_store %arg5[%c0_40, %c0_41], %240 {strides = array<i32>} : memref<8x32xf32, #tpu.memory_space<vmem>>, vector<8x32xf32>,
    return
  }
}

</mosaic_0001>

<bundles_post_ra>
// kernel: encoder_forward.1
= control target key start
LH: loop header
LB: loop body
LE: loop exit
PB: predicated region body
PF: predicated region fallthrough
CT: control target
= control target key end

     0   :  { %v7139_v3 = vmov 0.0|0.0   ;;  %vm4912_vm0 = vmmov 0   ;;  %v7140_v6 = vmov 0.0   ;;  %s7133_s0 = inlined_call_operand.vmem [shape: f32[8,8,96], index: 0, kind: input, shape index: {}]   ;;  %s7134_s1 = inlined_call_operand.vmem [shape: s32[8,1], index: 1, kind: input, shape index: {}]   ;;  %s7135_s2 = inlined_call_operand.vmem [shape: f32[32,96], index: 2, kind: input, shape index: {}]   ;;  %s7136_s3 = inlined_call_operand.vmem [shape: f32[1,96], index: 3, kind: input, shape index: {}]   ;;  %s7137_s4 = inlined_call_operand.vmem [shape: f32[8,256], index: 4, kind: output, shape index: {0}]   ;;  %s7138_s5 = inlined_call_operand.hbm [shape: f32[8,32], index: 5, kind: output, shape index: {1}]  }
   0x1   :  { %v20_v0 = vld [vmem:[%s7135_s2] sm:$0xff]  ;;  %v21_v1 = vld [vmem:[%s7135_s2 + $0x8] sm:$0xff]  ;;  %v22_v2 = vld [vmem:[%s7135_s2 + $0x10] sm:$0xff]  ;;  %4440 = vmatprep.subr.bf16.mxu0 %v7139_v3  ;;  %4360 = vmatprep.mubr.msk.f32.mxu0 %vm4912_vm0, %v7140_v6 }
   0x2   :  { %v4960_v4 = vpack.c.bf16 %v21_v1, %v20_v0  ;;  %v23_v5 = vld [vmem:[%s7135_s2 + $0x18] sm:$0xff] }
   0x3   :  { %11 = vsyncpa [#allocation3], 0  ;;  %4446 = vmatprep.subr.bf16.mxu1 %v7139_v3  ;;  %4371 = vmatprep.mubr.msk.f32.mxu1 %vm4912_vm0, %v7140_v6  ;;  %v4971_v7 = vpack.c.bf16 %v23_v5, %v22_v2  ;;  %v4990_v8 = vld [vmem:[%s7136_s3] ss:$0 sm:$0xff]  ;;  %s4914_s27 = smov 64   ;;  %s4917_s19 = smov 96  }
   0x4   :  { %4442 = vmatpush3.bf16.msra.mxu0 %v4960_v4  ;;  %4448 = vmatpush3.bf16.msra.mxu1 %v4960_v4  ;;  %v5004_v19 = vld [vmem:[%s7133_s0] sm:$0x1]  ;;  %v5010_v21 = vld [vmem:[%s7133_s0 + $0x8] sm:$0x1]  ;;  %v5015_v22 = vld [vmem:[%s7133_s0 + $0x10] sm:$0x1] }
   0x5   :  { %4443 = vmatprep.subr.bf16.mxu0 %v7139_v3  ;;  %4449 = vmatprep.subr.bf16.mxu1 %v7139_v3  ;;  %v5021_v25 = vld [vmem:[%s7133_s0 + $0x18] sm:$0x1]  ;;  %v5027_v27 = vld [vmem:[%s7133_s0 + $0x20] sm:$0x1]  ;;  %v5033_v31 = vld [vmem:[%s7133_s0 + $0x28] sm:$0x1] }
   0x6   :  { %v5039_v33 = vld [vmem:[%s7133_s0 + $0x30] sm:$0x1]  ;;  %v5046_v38 = vld [vmem:[%s7133_s0 + $0x38] sm:$0x1]  ;;  %vm518_vm6 = vcmask 1041409   ;;  %vm521_vm7 = vcmask 1042434  }
   0x7   :  { %vm524_vm10 = vcmask 1043459   ;;  %vm527_vm11 = vcmask 1044484   ;;  %vm530_vm13 = vcmask 1045509   ;;  %vm533_vm14 = vcmask 1046534  }
   0x8   :  { %4445 = vmatpush3.bf16.msra.mxu0 %v4971_v7  ;;  %4451 = vmatpush3.bf16.msra.mxu1 %v4971_v7  ;;  %vm536_vm15 = vcmask 1047559  }
   0x9   :  { %4452 = vmatprep.subr.bf16.mxu0 %v7139_v3  ;;  %4458 = vmatprep.subr.bf16.mxu1 %v7139_v3 }
   0xb   :  { %4361 = vmatmul.mubr.f32.vlgmr.msra.gmra.mrb[0].mxu0 %v7140_v6 }
   0xc   :  { %4454 = vmatpush3.bf16.msra.mxu0 %v4960_v4  ;;  %4382 = vmatprep.mubr.msk.f32.mxu0 %vm4912_vm0, %v7140_v6 }
   0xd   :  { %4455 = vmatprep.subr.bf16.mxu0 %v7139_v3 }
  0x10   :  { %4457 = vmatpush3.bf16.msra.mxu0 %v4971_v7 }
  0x11   :  { %4464 = vmatprep.subr.bf16.mxu0 %v7139_v3 }
  0xde   :  { %v241_v9 = vpop.f32.mrb[0].mxu0 }
  0xdf   :  { %v242_v10 = vadd.f32 %v4990_v8, %v241_v9  ;;  %v4362_v11 = vpop.f32.mrb[1].mxu0 }
  0xe1   :  { %317 = vrot.lane.b32.xlu1 %v242_v10, %s4914_s27  ;;  %v246_v12 = vrot.slane %v242_v10, 1  ;;  %v248_v13 = vrot.slane %v242_v10, 3  ;;  %v247_v14 = vrot.slane %v242_v10, 2  ;;  %v250_v15 = vrot.slane %v242_v10, 5 }
  0xe2   :  { %v249_v16 = vrot.slane %v242_v10, 4  ;;  %v252_v17 = vrot.slane %v242_v10, 7  ;;  %v251_v18 = vrot.slane %v242_v10, 6  ;;  %v261_v20 = vadd.f32 %v242_v10, %v5004_v19 }
  0xe3   :  { %319 = vrot.lane.b32.xlu0 %v246_v12, %s4914_s27  ;;  %v262_v23 = vadd.f32 %v246_v12, %v5010_v21  ;;  %v263_v26 = vadd.f32 %v247_v14, %v5015_v22  ;;  %v264_v29 = vadd.f32 %v248_v13, %v5021_v25  ;;  %v266_v35 = vadd.f32 %v250_v15, %v5033_v31 }
  0xe4   :  { %v4241_v24 = vmul.f32 -1.442695, %v261_v20  ;;  %v265_v32 = vadd.f32 %v249_v16, %v5027_v27  ;;  %v267_v37 = vadd.f32 %v251_v18, %v5039_v33  ;;  %v268_v41 = vadd.f32 %v252_v17, %v5046_v38 }
  0xe5   :  { %323 = vrot.lane.b32.xlu1 %v248_v13, %s4914_s27  ;;  %v4242_v28 = vmul.f32 -1.442695, %v262_v23  ;;  %v4243_v30 = vmul.f32 -1.442695, %v263_v26  ;;  %v4244_v34 = vmul.f32 -1.442695, %v264_v29 }
  0xe6   :  { %4500 = vpow2.f32 %v4241_v24  ;;  %v4245_v36 = vmul.f32 -1.442695, %v265_v32  ;;  %v4246_v39 = vmul.f32 -1.442695, %v266_v35  ;;  %v4247_v42 = vmul.f32 -1.442695, %v267_v37 }
  0xe7   :  { %321 = vrot.lane.b32.xlu0 %v247_v14, %s4914_s27  ;;  %4502 = vpow2.f32 %v4242_v28  ;;  %v4248_v45 = vmul.f32 -1.442695, %v268_v41  ;;  %v4915_v29 = vmov 0  }
  0xe8   :  { %4504 = vpow2.f32 %v4243_v30  ;;  %4498 = vset.pattern.permute.xlu1 %v4915_v29  ;;  %4497 = vset.pattern.permute.xlu0 %v4915_v29 }
  0xe9   :  { %327 = vrot.lane.b32.xlu1 %v250_v15, %s4914_s27  ;;  %4506 = vpow2.f32 %v4244_v34 }
  0xea   :  { %4508 = vpow2.f32 %v4245_v36 }
  0xeb   :  { %325 = vrot.lane.b32.xlu0 %v249_v16, %s4914_s27  ;;  %4510 = vpow2.f32 %v4246_v39  ;;  %v25_v39 = vlaneseq }
  0xec   :  { %4512 = vpow2.f32 %v4247_v42 }
  0xed   :  { %331 = vrot.lane.b32.xlu1 %v252_v17, %s4914_s27 }
  0xef   :  { %329 = vrot.lane.b32.xlu0 %v251_v18, %s4914_s27 }
  0xf0   :  { %v4501_v40 = vpop.eup %4500 }
  0xf1   :  { %v293_v43 = vadd.f32 1.0, %v4501_v40  ;;  %v4503_v44 = vpop.eup %4502  ;;  %v4916_v40 = vmov 1966171168  }
  0xf2   :  { %v4505_v46 = vpop.eup %4504  ;;  %v294_v47 = vadd.f32 1.0, %v4503_v44  ;;  %v30_v41 = vunpack.c.l.s4 %v4916_v40 }
  0xf3   :  { %4514 = vrcp.f32 %v293_v43  ;;  %v4507_v48 = vpop.eup %4506  ;;  %v295_v49 = vadd.f32 1.0, %v4505_v46  ;;  %v5086_v46 = vshrl.u32 %v25_v39, 7 }
  0xf4   :  { %4516 = vpow2.f32 %v4248_v45  ;;  %v4509_v50 = vpop.eup %4508  ;;  %v296_v51 = vadd.f32 1.0, %v4507_v48 }
  0xf5   :  { %4518 = vrcp.f32 %v294_v47  ;;  %v4511_v52 = vpop.eup %4510  ;;  %v297_v53 = vadd.f32 1.0, %v4509_v50 }
  0xf6   :  { %4520 = vrcp.f32 %v295_v49  ;;  %v4513_v54 = vpop.eup %4512  ;;  %v298_v55 = vadd.f32 1.0, %v4511_v52 }
  0xf7   :  { %4522 = vrcp.f32 %v296_v51  ;;  %v299_v57 = vadd.f32 1.0, %v4513_v54 }
  0xf8   :  { %4524 = vrcp.f32 %v297_v53 }
  0xf9   :  { %4526 = vrcp.f32 %v298_v55 }
  0xfa   :  { %4528 = vrcp.f32 %v299_v57 }
  0xfd   :  { %v5049_v56 = vpop.eup %4514 }
  0xfe   :  { %v4517_v59 = vpop.eup %4516 }
  0xff   :  { %v5053_v62 = vpop.eup %4518  ;;  %v300_v63 = vadd.f32 1.0, %v4517_v59 }
 0x100   :  { %v5056_v2 = vpop.eup %4520 }
 0x101   :  { %4530 = vrcp.f32 %v300_v63  ;;  %v5060_v10 = vpop.eup %4522 }
 0x102   :  { %v5063_v11 = vpop.eup %4524 }
 0x103   :  { %v5067_v16 = vpop.eup %4526 }
 0x104   :  { %v5071_v17 = vpop.eup %4528 }
 0x10b   :  { %v5077_v26 = vpop.eup %4530 }
 0x153   :  { %v318_v58 = vpop.permute.xlu1 %317 }
 0x154   :  { %v341_v60 = vmul.f32 %v5049_v56, %v318_v58 }
 0x155   :  { %v320_v61 = vpop.permute.xlu0 %319 }
 0x156   :  { %357 = vrot.lane.b32.xlu0 %v341_v60, %s4914_s27  ;;  %v342_v1 = vmul.f32 %v5053_v62, %v320_v61 }
 0x157   :  { %v324_v0 = vpop.permute.xlu1 %323 }
 0x158   :  { %v344_v14 = vmul.f32 %v5060_v10, %v324_v0 }
 0x159   :  { %v322_v5 = vpop.permute.xlu0 %321 }
 0x15a   :  { %v343_v9 = vmul.f32 %v5056_v2, %v322_v5  ;;  %359 = vrot.lane.b32.xlu0 %v342_v1, %s4914_s27  ;;  %v79_v1 = vsub.s32 0, %v5086_v46 }
 0x15b   :  { %v328_v12 = vpop.permute.xlu1 %327 }
 0x15c   :  { %361 = vrot.lane.b32.xlu1 %v343_v9, %s4914_s27  ;;  %v346_v20 = vmul.f32 %v5067_v16, %v328_v12 }
 0x15d   :  { %v326_v13 = vpop.permute.xlu0 %325 }
 0x15e   :  { %v345_v15 = vmul.f32 %v5063_v11, %v326_v13 }
 0x15f   :  { %v332_v24 = vpop.permute.xlu1 %331 }
 0x160   :  { %363 = vrot.lane.b32.xlu1 %v344_v14, %s4914_s27  ;;  %365 = vrot.lane.b32.xlu0 %v345_v15, %s4914_s27  ;;  %v348_v28 = vmul.f32 %v5077_v26, %v332_v24 }
 0x161   :  { %v330_v18 = vpop.permute.xlu0 %329 }
 0x162   :  { %v347_v23 = vmul.f32 %v5071_v17, %v330_v18 }
 0x164   :  { %367 = vrot.lane.b32.xlu1 %v346_v20, %s4914_s27  ;;  %369 = vrot.lane.b32.xlu0 %v347_v23, %s4914_s27 }
 0x168   :  { %371 = vrot.lane.b32.xlu1 %v348_v28, %s4914_s27 }
 0x1c8   :  { %v358_v30 = vpop.permute.xlu0 %357 }
 0x1c9   :  { %v381_v32 = vadd.f32 %v358_v30, %v5004_v19  ;;  %v31_v19 = vunpack.c.0.s8 %v30_v41 }
 0x1cb   :  { %4532 = vtanh.f32 %v381_v32  ;;  %v34_v51 = vsub.s32 %v31_v19, %v5086_v46 }
 0x1cc   :  { %v360_v34 = vpop.permute.xlu0 %359 }
 0x1cd   :  { %v382_v35 = vadd.f32 %v360_v34, %v5010_v21 }
 0x1ce   :  { %v362_v36 = vpop.permute.xlu1 %361 }
 0x1cf   :  { %4534 = vtanh.f32 %v382_v35  ;;  %v383_v37 = vadd.f32 %v362_v36, %v5015_v22 }
 0x1d1   :  { %4536 = vtanh.f32 %v383_v37 }
 0x1d2   :  { %v364_v42 = vpop.permute.xlu1 %363  ;;  %v366_v43 = vpop.permute.xlu0 %365 }
 0x1d3   :  { %v384_v44 = vadd.f32 %v364_v42, %v5021_v25  ;;  %v385_v45 = vadd.f32 %v366_v43, %v5027_v27  ;;  %v27_v25 = vld [vmem:[%s7134_s1] sm:$0xff]  ;;  %s4918_s1 = smov 32  }
 0x1d4   :  { %v28_v59 = vcombine.high %v27_v25, %v27_v25 }
 0x1d5   :  { %v5088_v47 = vpop.eup %4532  ;;  %4538 = vtanh.f32 %v384_v44 }
 0x1d6   :  { %4540 = vtanh.f32 %v385_v45  ;;  %v368_v21 = vpop.permute.xlu1 %367  ;;  %v370_v48 = vpop.permute.xlu0 %369  ;;  %v397_v22 = vsub.f32 0.0, %v5088_v47  ;;  %v42_v9 = vrot.slane %v28_v59, %v34_v51 }
 0x1d7   :  { %v386_v49 = vadd.f32 %v368_v21, %v5033_v31  ;;  %v387_v50 = vadd.f32 %v370_v48, %v5039_v33  ;;  %v35_v33 = vrot.slane %v27_v25, %v34_v51 }
 0x1d8   :  { %413 = vrot.lane.b32.xlu0 %v397_v22, %s4917_s19  ;;  %v44_v24 = vcombine.high %v42_v9, %v42_v9  ;;  %v58_v35 = vrot.slane %v42_v9, %v34_v51 }
 0x1d9   :  { %v5098_v27 = vpop.eup %4534  ;;  %4542 = vtanh.f32 %v386_v49  ;;  %v43_v58 = vcombine.high %v35_v33, %v35_v33 }
 0x1da   :  { %4544 = vtanh.f32 %v387_v50  ;;  %v372_v52 = vpop.permute.xlu1 %371  ;;  %v398_v53 = vsub.f32 0.0, %v5098_v27  ;;  %v72_v32 = vrot.slane %v44_v24, %v34_v51  ;;  %v96_v39 = vrot.slane %v58_v35, %v79_v1 }
 0x1db   :  { %v5101_v54 = vpop.eup %4536  ;;  %v388_v31 = vadd.f32 %v372_v52, %v5046_v38  ;;  %v51_v38 = vrot.slane %v35_v33, %v34_v51  ;;  %v65_v5 = vrot.slane %v43_v58, %v34_v51  ;;  %v74_v40 = vcombine.high %v58_v35, %v58_v35 }
 0x1dc   :  { %415 = vrot.lane.b32.xlu0 %v398_v53, %s4917_s19  ;;  %v399_v55 = vsub.f32 0.0, %v5101_v54  ;;  %v100_v36 = vrot.slane %v72_v32, %v79_v1  ;;  %v76_v37 = vcombine.high %v72_v32, %v72_v32 }
 0x1dd   :  { %4546 = vtanh.f32 %v388_v31  ;;  %v73_v15 = vcombine.high %v51_v38, %v51_v38  ;;  %v84_v20 = vrot.slane %v65_v5, %v79_v1  ;;  %v75_v23 = vcombine.high %v65_v5, %v65_v5 }
 0x1de   :  { %417 = vrot.lane.b32.xlu1 %v399_v55, %s4917_s19  ;;  %v80_v34 = vrot.slane %v51_v38, %v79_v1  ;;  %v108_v41 = vrot.slane %v76_v37, %v79_v1  ;;  %v104_v42 = vrot.slane %v74_v40, %v79_v1 }
 0x1df   :  { %v5107_v57 = vpop.eup %4538  ;;  %v88_v29 = vrot.slane %v73_v15, %v79_v1  ;;  %v92_v30 = vrot.slane %v75_v23, %v79_v1 }
 0x1e0   :  { %v5109_v60 = vpop.eup %4540  ;;  %v400_v61 = vsub.f32 0.0, %v5107_v57 }
 0x1e1   :  { %v401_v63 = vsub.f32 0.0, %v5109_v60 }
 0x1e2   :  { %419 = vrot.lane.b32.xlu1 %v400_v61, %s4917_s19 }
 0x1e3   :  { %v5114_v0 = vpop.eup %4542  ;;  %421 = vrot.lane.b32.xlu0 %v401_v63, %s4917_s19 }
 0x1e4   :  { %v5118_v12 = vpop.eup %4544  ;;  %v402_v13 = vsub.f32 0.0, %v5114_v0 }
 0x1e5   :  { %v403_v14 = vsub.f32 0.0, %v5118_v12 }
 0x1e6   :  { %423 = vrot.lane.b32.xlu1 %v402_v13, %s4917_s19 }
 0x1e7   :  { %v5123_v18 = vpop.eup %4546  ;;  %425 = vrot.lane.b32.xlu0 %v403_v14, %s4917_s19 }
 0x1e8   :  { %v404_v28 = vsub.f32 0.0, %v5123_v18 }
 0x1ea   :  { %427 = vrot.lane.b32.xlu1 %v404_v28, %s4917_s19 }
 0x1eb   :  { %113 = vperm.xlu0 %4497, %v84_v20  }
 0x1ee   :  { %116 = vperm.xlu1 %4498, %v88_v29  }
 0x1ef   :  { %119 = vperm.xlu0 %4497, %v92_v30  }
 0x1f2   :  { %110 = vperm.xlu1 %4498, %v80_v34  }
 0x1f3   :  { %125 = vperm.xlu0 %4497, %v100_v36  }
 0x1f6   :  { %122 = vperm.xlu1 %4498, %v96_v39  }
 0x1f7   :  { %131 = vperm.xlu0 %4497, %v108_v41  }
 0x1fa   :  { %128 = vperm.xlu1 %4498, %v104_v42  }
 0x24a   :  { %v414_v43 = vpop.permute.xlu0 %413 }
 0x24b   :  { %v437_v44 = vmul.f32 %v5049_v56, %v414_v43 }
 0x24d   :  { %453 = vrot.lane.b32.xlu1 %v437_v44, %s4918_s1 }
 0x24e   :  { %v416_v45 = vpop.permute.xlu0 %415 }
 0x24f   :  { %v438_v19 = vmul.f32 %v5053_v62, %v416_v45 }
 0x250   :  { %v418_v21 = vpop.permute.xlu1 %417 }
 0x251   :  { %v439_v48 = vmul.f32 %v5056_v2, %v418_v21  ;;  %455 = vrot.lane.b32.xlu1 %v438_v19, %s4918_s1 }
 0x253   :  { %457 = vrot.lane.b32.xlu0 %v439_v48, %s4918_s1 }
 0x254   :  { %v420_v22 = vpop.permute.xlu1 %419 }
 0x255   :  { %v440_v49 = vmul.f32 %v5060_v10, %v420_v22  ;;  %v422_v50 = vpop.permute.xlu0 %421 }
 0x256   :  { %v441_v51 = vmul.f32 %v5063_v11, %v422_v50 }
 0x257   :  { %459 = vrot.lane.b32.xlu0 %v440_v49, %s4918_s1 }
 0x258   :  { %461 = vrot.lane.b32.xlu1 %v441_v51, %s4918_s1  ;;  %v424_v56 = vpop.permute.xlu1 %423 }
 0x259   :  { %v442_v62 = vmul.f32 %v5067_v16, %v424_v56  ;;  %v426_v25 = vpop.permute.xlu0 %425 }
 0x25a   :  { %v443_v2 = vmul.f32 %v5071_v17, %v426_v25 }
 0x25b   :  { %463 = vrot.lane.b32.xlu0 %v442_v62, %s4918_s1 }
 0x25c   :  { %465 = vrot.lane.b32.xlu1 %v443_v2, %s4918_s1  ;;  %v428_v52 = vpop.permute.xlu1 %427 }
 0x25d   :  { %v444_v10 = vmul.f32 %v5077_v26, %v428_v52 }
 0x25f   :  { %467 = vrot.lane.b32.xlu0 %v444_v10, %s4918_s1 }
 0x26a   :  { %v114_v53 = vpop.permute.xlu0 %113 }
 0x26b   :  { %vm134_vm1 = vcmp.lt.s32.totalorder %v5086_v46, %v114_v53 }
 0x26c   :  { %v5148_v26 = vsel %vm134_vm1, 1.0, %v7140_v6  ;;  %vm171_vm1 = vcmask 261120  }
 0x26d   :  { %v117_v11 = vpop.permute.xlu1 %116 }
 0x26e   :  { %v120_v33 = vpop.permute.xlu0 %119  ;;  %vm135_vm2 = vcmp.lt.s32.totalorder %v5086_v46, %v117_v11 }
 0x26f   :  { %v5157_v13 = vsel %vm135_vm2, 1.0, %v7140_v6  ;;  %vm136_vm4 = vcmp.lt.s32.totalorder %v5086_v46, %v120_v33  ;;  %vm4181_vm2 = vcmask 785408  }
 0x270   :  { %v5173_v24 = vsel %vm136_vm4, 1.0, %v7140_v6 }
 0x271   :  { %v111_v31 = vpop.permute.xlu1 %110 }
 0x272   :  { %v126_v58 = vpop.permute.xlu0 %125  ;;  %vm133_vm3 = vcmp.lt.s32.totalorder %v5086_v46, %v111_v31 }
 0x273   :  { %v5165_v15 = vsel %vm133_vm3, 1.0, %v7140_v6  ;;  %vm138_vm8 = vcmp.lt.s32.totalorder %v5086_v46, %v126_v58  ;;  %v5246_v58 = vld [vmem:[%s7133_s0 + $0x1] sm:$0x1] }
 0x274   :  { %v5193_v39 = vsel %vm138_vm8, 1.0, %v7140_v6 }
 0x275   :  { %v123_v55 = vpop.permute.xlu1 %122 }
 0x276   :  { %v132_v61 = vpop.permute.xlu0 %131  ;;  %vm137_vm5 = vcmp.lt.s32.totalorder %v5086_v46, %v123_v55 }
 0x277   :  { %v5178_v30 = vsel %vm137_vm5, 1.0, %v7140_v6  ;;  %vm140_vm12 = vcmp.lt.s32.totalorder %v5086_v46, %v132_v61  ;;  %v5257_v61 = vld [vmem:[%s7133_s0 + $0x9] sm:$0x1] }
 0x278   :  { %v5212_v48 = vsel %vm140_vm12, 1.0, %v7140_v6 }
 0x279   :  { %v129_v59 = vpop.permute.xlu1 %128  ;;  %7172 = vst [vmem:[#allocation6_spill] sm:$0xff] %v5212_v48 }
 0x27a   :  { %vm139_vm9 = vcmp.lt.s32.totalorder %v5086_v46, %v129_v59  ;;  %v5251_v59 = vld [vmem:[%s7133_s0 + $0x11] sm:$0x1] }
 0x27b   :  { %v5199_v43 = vsel %vm139_vm9, 1.0, %v7140_v6 }
 0x27c   :  { %7171 = vst [vmem:[#allocation5_spill] sm:$0xff] %v5199_v43 }
 0x2bf   :  { %v454_v16 = vpop.permute.xlu1 %453 }
 0x2c0   :  { %v477_v1 = vadd.f32 %v5088_v47, %v454_v16 }
 0x2c2   :  { %v5169_v20 = vmul.f32 %v5165_v15, %v477_v1 }
 0x2c3   :  { %v456_v17 = vpop.permute.xlu1 %455 }
 0x2c4   :  { %v478_v63 = vadd.f32 %v5098_v27, %v456_v17 }
 0x2c5   :  { %v458_v38 = vpop.permute.xlu0 %457 }
 0x2c6   :  { %v5153_v5 = vmul.f32 %v5148_v26, %v478_v63  ;;  %v479_v9 = vadd.f32 %v5101_v54, %v458_v38  ;;  %v5263_v63 = vld [vmem:[%s7133_s0 + $0x19] sm:$0x1] }
 0x2c8   :  { %v517_v27 = vrot.slane %v5153_v5, 7  ;;  %v5162_v14 = vmul.f32 %v5157_v13, %v479_v9  ;;  %v5269_v9 = vld [vmem:[%s7133_s0 + $0x21] sm:$0x1] }
 0x2c9   :  { %v460_v47 = vpop.permute.xlu0 %459 }
 0x2ca   :  { %v462_v54 = vpop.permute.xlu1 %461  ;;  %v480_v23 = vadd.f32 %v5107_v57, %v460_v47  ;;  %v520_v28 = vrot.slane %v5162_v14, 6  ;;  %v519_v34 = vsel %vm518_vm6, %v517_v27, %v5169_v20 }
 0x2cb   :  { %v481_v29 = vadd.f32 %v5109_v60, %v462_v54  ;;  %v5275_v54 = vld [vmem:[%s7133_s0 + $0x29] sm:$0x1] }
 0x2cc   :  { %v5182_v32 = vmul.f32 %v5173_v24, %v480_v23  ;;  %v522_v42 = vsel %vm521_vm7, %v520_v28, %v519_v34 }
 0x2cd   :  { %v5188_v57 = vmul.f32 %v5178_v30, %v481_v29  ;;  %v464_v35 = vpop.permute.xlu0 %463  ;;  %v5281_v29 = vld [vmem:[%s7133_s0 + $0x31] sm:$0x1] }
 0x2ce   :  { %v523_v60 = vrot.slane %v5182_v32, 5  ;;  %v466_v36 = vpop.permute.xlu1 %465  ;;  %v482_v37 = vadd.f32 %v5114_v0, %v464_v35 }
 0x2cf   :  { %v526_v40 = vrot.slane %v5188_v57, 4  ;;  %v483_v41 = vadd.f32 %v5118_v12, %v466_v36 }
 0x2d0   :  { %v5203_v44 = vmul.f32 %v5193_v39, %v482_v37  ;;  %v525_v0 = vsel %vm524_vm10, %v523_v60, %v522_v42  ;;  %v5287_v60 = vld [vmem:[%s7133_s0 + $0x39] sm:$0x1] }
 0x2d1   :  { %v5207_v45 = vmul.f32 %v5199_v43, %v483_v41  ;;  %v468_v19 = vpop.permute.xlu0 %467  ;;  %v528_v22 = vsel %vm527_vm11, %v526_v40, %v525_v0 }
 0x2d2   :  { %v484_v21 = vadd.f32 %v5123_v18, %v468_v19  ;;  %v529_v12 = vrot.slane %v5203_v44, 3 }
 0x2d3   :  { %v532_v46 = vrot.slane %v5207_v45, 2 }
 0x2d4   :  { %v5217_v49 = vmul.f32 %v5212_v48, %v484_v21  ;;  %v531_v50 = vsel %vm530_vm13, %v529_v12, %v528_v22 }
 0x2d5   :  { %v534_v18 = vsel %vm533_vm14, %v532_v46, %v531_v50 }
 0x2d6   :  { %v535_v51 = vrot.slane %v5217_v49, 1 }
 0x2d8   :  { %v5223_v56 = vsel %vm536_vm15, %v535_v51, %v534_v18 }
 0x2d9   :  { %7173 = vst [vmem:[#allocation7_spill] sm:$0xff] %v5223_v56  ;;  %538 = vrot.lane.b32.xlu1 %v5223_v56, %s4914_s27 }
 0x34b   :  { %v539_v62 = vpop.permute.xlu1 %538 }
 0x34c   :  { %4372 = vmatmul.mubr.msk.f32.vlgmr.msra.gmra.mrb[0].mxu1 %vm171_vm1, %v539_v62 }
 0x34d   :  { %4460 = vmatpush3.bf16.msra.mxu1 %v4960_v4  ;;  %4393 = vmatprep.mubr.msk.f32.mxu1 %vm4912_vm0, %v7140_v6 }
 0x34e   :  { %4461 = vmatprep.subr.bf16.mxu1 %v7139_v3 }
 0x351   :  { %4463 = vmatpush3.bf16.msra.mxu1 %v4971_v7 }
 0x352   :  { %4470 = vmatprep.subr.bf16.mxu1 %v7139_v3 }
 0x41f   :  { %v608_v25 = vpop.f32.mrb[0].mxu1 }
 0x420   :  { %v609_v2 = vadd.f32 %v4990_v8, %v608_v25  ;;  %v4373_v52 = vpop.f32.mrb[1].mxu1 }
 0x422   :  { %684 = vrot.lane.b32.xlu0 %v609_v2, %s4914_s27  ;;  %v614_v10 = vrot.slane %v609_v2, 2  ;;  %v613_v11 = vrot.slane %v609_v2, 1  ;;  %v615_v53 = vrot.slane %v609_v2, 3  ;;  %v616_v31 = vrot.slane %v609_v2, 4 }
 0x423   :  { %v617_v33 = vrot.slane %v609_v2, 5  ;;  %v618_v55 = vrot.slane %v609_v2, 6  ;;  %v619_v8 = vrot.slane %v609_v2, 7  ;;  %v628_v16 = vadd.f32 %v609_v2, %v5246_v58 }
 0x424   :  { %688 = vrot.lane.b32.xlu1 %v614_v10, %s4914_s27  ;;  %v630_v17 = vadd.f32 %v614_v10, %v5251_v59  ;;  %v629_v38 = vadd.f32 %v613_v11, %v5257_v61  ;;  %v631_v47 = vadd.f32 %v615_v53, %v5263_v63  ;;  %v632_v28 = vadd.f32 %v616_v31, %v5269_v9 }
 0x425   :  { %v4250_v1 = vmul.f32 -1.442695, %v628_v16  ;;  %v633_v35 = vadd.f32 %v617_v33, %v5275_v54  ;;  %v634_v37 = vadd.f32 %v618_v55, %v5281_v29  ;;  %v635_v41 = vadd.f32 %v619_v8, %v5287_v60 }
 0x426   :  { %686 = vrot.lane.b32.xlu0 %v613_v11, %s4914_s27  ;;  %v4252_v27 = vmul.f32 -1.442695, %v630_v17  ;;  %v4251_v23 = vmul.f32 -1.442695, %v629_v38  ;;  %v4253_v34 = vmul.f32 -1.442695, %v631_v47 }
 0x427   :  { %4548 = vpow2.f32 %v4250_v1  ;;  %v4254_v36 = vmul.f32 -1.442695, %v632_v28  ;;  %v4255_v40 = vmul.f32 -1.442695, %v633_v35  ;;  %v4256_v42 = vmul.f32 -1.442695, %v634_v37 }
 0x428   :  { %690 = vrot.lane.b32.xlu1 %v615_v53, %s4914_s27  ;;  %4550 = vpow2.f32 %v4252_v27  ;;  %v4257_v19 = vmul.f32 -1.442695, %v635_v41 }
 0x429   :  { %4552 = vpow2.f32 %v4251_v23 }
 0x42a   :  { %692 = vrot.lane.b32.xlu0 %v616_v31, %s4914_s27  ;;  %4554 = vpow2.f32 %v4253_v34 }
 0x42b   :  { %4556 = vpow2.f32 %v4254_v36 }
 0x42c   :  { %694 = vrot.lane.b32.xlu1 %v617_v33, %s4914_s27  ;;  %4558 = vpow2.f32 %v4255_v40 }
 0x42d   :  { %4560 = vpow2.f32 %v4256_v42 }
 0x42e   :  { %696 = vrot.lane.b32.xlu0 %v618_v55, %s4914_s27  ;;  %4562 = vpow2.f32 %v4257_v19 }
 0x430   :  { %698 = vrot.lane.b32.xlu1 %v619_v8, %s4914_s27 }
 0x431   :  { %v4549_v0 = vpop.eup %4548 }
 0x432   :  { %v4551_v21 = vpop.eup %4550  ;;  %v660_v12 = vadd.f32 1.0, %v4549_v0 }
 0x433   :  { %v4553_v22 = vpop.eup %4552  ;;  %v662_v46 = vadd.f32 1.0, %v4551_v21 }
 0x434   :  { %v4555_v50 = vpop.eup %4554  ;;  %v661_v51 = vadd.f32 1.0, %v4553_v22  ;;  %4564 = vrcp.f32 %v660_v12 }
 0x435   :  { %v4557_v18 = vpop.eup %4556  ;;  %4566 = vrcp.f32 %v662_v46  ;;  %v663_v62 = vadd.f32 1.0, %v4555_v50 }
 0x436   :  { %v4559_v25 = vpop.eup %4558  ;;  %4568 = vrcp.f32 %v661_v51  ;;  %v664_v2 = vadd.f32 1.0, %v4557_v18 }
 0x437   :  { %v4561_v52 = vpop.eup %4560  ;;  %4570 = vrcp.f32 %v663_v62  ;;  %v665_v10 = vadd.f32 1.0, %v4559_v25 }
 0x438   :  { %v4563_v11 = vpop.eup %4562  ;;  %4572 = vrcp.f32 %v664_v2  ;;  %v666_v53 = vadd.f32 1.0, %v4561_v52 }
 0x439   :  { %4574 = vrcp.f32 %v665_v10  ;;  %v667_v33 = vadd.f32 1.0, %v4563_v11 }
 0x43a   :  { %4576 = vrcp.f32 %v666_v53 }
 0x43b   :  { %4578 = vrcp.f32 %v667_v33 }
 0x43e   :  { %v5291_v31 = vpop.eup %4564 }
 0x43f   :  { %v5294_v16 = vpop.eup %4566 }
 0x440   :  { %v5298_v1 = vpop.eup %4568 }
 0x441   :  { %v5302_v23 = vpop.eup %4570 }
 0x442   :  { %v5306_v35 = vpop.eup %4572 }
 0x443   :  { %v5310_v40 = vpop.eup %4574 }
 0x444   :  { %v5314_v0 = vpop.eup %4576 }
 0x445   :  { %v5318_v12 = vpop.eup %4578 }
 0x494   :  { %v685_v55 = vpop.permute.xlu0 %684 }
 0x495   :  { %v708_v8 = vmul.f32 %v5291_v31, %v685_v55 }
 0x496   :  { %v689_v17 = vpop.permute.xlu1 %688 }
 0x497   :  { %v710_v38 = vmul.f32 %v5294_v16, %v689_v17  ;;  %724 = vrot.lane.b32.xlu0 %v708_v8, %s4914_s27 }
 0x498   :  { %v687_v27 = vpop.permute.xlu0 %686 }
 0x499   :  { %v709_v47 = vmul.f32 %v5298_v1, %v687_v27  ;;  %728 = vrot.lane.b32.xlu1 %v710_v38, %s4914_s27 }
 0x49a   :  { %v691_v28 = vpop.permute.xlu1 %690 }
 0x49b   :  { %v711_v34 = vmul.f32 %v5302_v23, %v691_v28  ;;  %726 = vrot.lane.b32.xlu0 %v709_v47, %s4914_s27 }
 0x49c   :  { %v693_v36 = vpop.permute.xlu0 %692 }
 0x49d   :  { %v712_v37 = vmul.f32 %v5306_v35, %v693_v36  ;;  %730 = vrot.lane.b32.xlu1 %v711_v34, %s4914_s27 }
 0x49e   :  { %v695_v41 = vpop.permute.xlu1 %694 }
 0x49f   :  { %v713_v42 = vmul.f32 %v5310_v40, %v695_v41  ;;  %732 = vrot.lane.b32.xlu0 %v712_v37, %s4914_s27 }
 0x4a0   :  { %v697_v19 = vpop.permute.xlu0 %696 }
 0x4a1   :  { %v714_v21 = vmul.f32 %v5314_v0, %v697_v19  ;;  %734 = vrot.lane.b32.xlu1 %v713_v42, %s4914_s27 }
 0x4a2   :  { %v699_v22 = vpop.permute.xlu1 %698 }
 0x4a3   :  { %v715_v46 = vmul.f32 %v5318_v12, %v699_v22  ;;  %736 = vrot.lane.b32.xlu0 %v714_v21, %s4914_s27 }
 0x4a5   :  { %738 = vrot.lane.b32.xlu1 %v715_v46, %s4914_s27 }
 0x509   :  { %v725_v50 = vpop.permute.xlu0 %724 }
 0x50a   :  { %v748_v51 = vadd.f32 %v725_v50, %v5246_v58 }
 0x50b   :  { %v729_v18 = vpop.permute.xlu1 %728 }
 0x50c   :  { %4580 = vtanh.f32 %v748_v51  ;;  %v750_v62 = vadd.f32 %v729_v18, %v5251_v59 }
 0x50d   :  { %v727_v25 = vpop.permute.xlu0 %726 }
 0x50e   :  { %4582 = vtanh.f32 %v750_v62  ;;  %v749_v2 = vadd.f32 %v727_v25, %v5257_v61 }
 0x50f   :  { %v731_v52 = vpop.permute.xlu1 %730 }
 0x510   :  { %4584 = vtanh.f32 %v749_v2  ;;  %v751_v10 = vadd.f32 %v731_v52, %v5263_v63 }
 0x511   :  { %v733_v11 = vpop.permute.xlu0 %732 }
 0x512   :  { %4586 = vtanh.f32 %v751_v10  ;;  %v752_v53 = vadd.f32 %v733_v11, %v5269_v9 }
 0x513   :  { %v735_v33 = vpop.permute.xlu1 %734 }
 0x514   :  { %4588 = vtanh.f32 %v752_v53  ;;  %v753_v58 = vadd.f32 %v735_v33, %v5275_v54 }
 0x515   :  { %v737_v55 = vpop.permute.xlu0 %736 }
 0x516   :  { %v4581_v8 = vpop.eup %4580  ;;  %4590 = vtanh.f32 %v753_v58  ;;  %v754_v59 = vadd.f32 %v737_v55, %v5281_v29 }
 0x517   :  { %v739_v17 = vpop.permute.xlu1 %738  ;;  %v764_v61 = vsub.f32 %v5169_v20, %v4581_v8 }
 0x518   :  { %v4583_v38 = vpop.eup %4582  ;;  %4592 = vtanh.f32 %v754_v59  ;;  %v755_v63 = vadd.f32 %v739_v17, %v5287_v60 }
 0x519   :  { %780 = vrot.lane.b32.xlu0 %v764_v61, %s4917_s19  ;;  %v766_v9 = vsub.f32 %v5162_v14, %v4583_v38 }
 0x51a   :  { %v4585_v27 = vpop.eup %4584  ;;  %4594 = vtanh.f32 %v755_v63 }
 0x51b   :  { %784 = vrot.lane.b32.xlu1 %v766_v9, %s4917_s19  ;;  %v765_v54 = vsub.f32 %v5153_v5, %v4585_v27 }
 0x51c   :  { %v4587_v47 = vpop.eup %4586 }
 0x51d   :  { %782 = vrot.lane.b32.xlu0 %v765_v54, %s4917_s19  ;;  %v767_v29 = vsub.f32 %v5182_v32, %v4587_v47 }
 0x51e   :  { %v4589_v28 = vpop.eup %4588 }
 0x51f   :  { %786 = vrot.lane.b32.xlu1 %v767_v29, %s4917_s19  ;;  %v768_v60 = vsub.f32 %v5188_v57, %v4589_v28 }
 0x520   :  { %v4591_v34 = vpop.eup %4590 }
 0x521   :  { %788 = vrot.lane.b32.xlu0 %v768_v60, %s4917_s19  ;;  %v769_v36 = vsub.f32 %v5203_v44, %v4591_v34 }
 0x522   :  { %v4593_v37 = vpop.eup %4592 }
 0x523   :  { %790 = vrot.lane.b32.xlu1 %v769_v36, %s4917_s19  ;;  %v770_v41 = vsub.f32 %v5207_v45, %v4593_v37 }
 0x524   :  { %v4595_v42 = vpop.eup %4594 }
 0x525   :  { %792 = vrot.lane.b32.xlu0 %v770_v41, %s4917_s19  ;;  %v771_v19 = vsub.f32 %v5217_v49, %v4595_v42 }
 0x527   :  { %794 = vrot.lane.b32.xlu1 %v771_v19, %s4917_s19 }
 0x58b   :  { %v781_v21 = vpop.permute.xlu0 %780 }
 0x58c   :  { %v804_v22 = vmul.f32 %v5291_v31, %v781_v21 }
 0x58d   :  { %v785_v46 = vpop.permute.xlu1 %784 }
 0x58e   :  { %v806_v50 = vmul.f32 %v5294_v16, %v785_v46  ;;  %820 = vrot.lane.b32.xlu0 %v804_v22, %s4918_s1 }
 0x58f   :  { %v783_v51 = vpop.permute.xlu0 %782 }
 0x590   :  { %v805_v18 = vmul.f32 %v5298_v1, %v783_v51  ;;  %824 = vrot.lane.b32.xlu1 %v806_v50, %s4918_s1 }
 0x591   :  { %v787_v62 = vpop.permute.xlu1 %786 }
 0x592   :  { %v807_v25 = vmul.f32 %v5302_v23, %v787_v62  ;;  %822 = vrot.lane.b32.xlu0 %v805_v18, %s4918_s1 }
 0x593   :  { %v789_v2 = vpop.permute.xlu0 %788 }
 0x594   :  { %v808_v52 = vmul.f32 %v5306_v35, %v789_v2  ;;  %826 = vrot.lane.b32.xlu1 %v807_v25, %s4918_s1 }
 0x595   :  { %v791_v31 = vpop.permute.xlu1 %790 }
 0x596   :  { %v809_v16 = vmul.f32 %v5310_v40, %v791_v31  ;;  %828 = vrot.lane.b32.xlu0 %v808_v52, %s4918_s1 }
 0x597   :  { %v793_v10 = vpop.permute.xlu0 %792 }
 0x598   :  { %v810_v1 = vmul.f32 %v5314_v0, %v793_v10  ;;  %830 = vrot.lane.b32.xlu1 %v809_v16, %s4918_s1 }
 0x599   :  { %v795_v11 = vpop.permute.xlu1 %794 }
 0x59a   :  { %v811_v23 = vmul.f32 %v5318_v12, %v795_v11  ;;  %832 = vrot.lane.b32.xlu0 %v810_v1, %s4918_s1 }
 0x59c   :  { %834 = vrot.lane.b32.xlu1 %v811_v23, %s4918_s1 }
 0x600   :  { %v821_v35 = vpop.permute.xlu0 %820 }
 0x601   :  { %v5363_v53 = vadd.f32 %v4581_v8, %v821_v35 }
 0x602   :  { %v825_v33 = vpop.permute.xlu1 %824 }
 0x603   :  { %v852_v40 = vsub.f32 %v5363_v53, %v5169_v20  ;;  %v5367_v58 = vadd.f32 %v4583_v38, %v825_v33 }
 0x604   :  { %v823_v55 = vpop.permute.xlu0 %822 }
 0x605   :  { %v854_v0 = vsub.f32 %v5367_v58, %v5162_v14  ;;  %v5371_v59 = vadd.f32 %v4585_v27, %v823_v55  ;;  %v868_v12 = vrot.slane %v852_v40, 7 }
 0x606   :  { %v827_v17 = vpop.permute.xlu1 %826 }
 0x607   :  { %v853_v61 = vsub.f32 %v5371_v59, %v5153_v5  ;;  %v5375_v63 = vadd.f32 %v4587_v47, %v827_v17  ;;  %876 = vrot.lane.b32.xlu0 %v868_v12, %s4914_s27  ;;  %v870_v8 = vrot.slane %v854_v0, 7 }
 0x608   :  { %v829_v9 = vpop.permute.xlu0 %828 }
 0x609   :  { %v855_v38 = vsub.f32 %v5375_v63, %v5182_v32  ;;  %v5380_v54 = vadd.f32 %v4589_v28, %v829_v9  ;;  %880 = vrot.lane.b32.xlu1 %v870_v8, %s4914_s27  ;;  %v869_v27 = vrot.slane %v853_v61, 7 }
 0x60a   :  { %v831_v29 = vpop.permute.xlu1 %830 }
 0x60b   :  { %v856_v60 = vsub.f32 %v5380_v54, %v5188_v57  ;;  %v5385_v36 = vadd.f32 %v4591_v34, %v831_v29  ;;  %878 = vrot.lane.b32.xlu0 %v869_v27, %s4914_s27  ;;  %v871_v47 = vrot.slane %v855_v38, 7 }
 0x60c   :  { %v833_v41 = vpop.permute.xlu0 %832 }
 0x60d   :  { %v857_v19 = vsub.f32 %v5385_v36, %v5203_v44  ;;  %v5390_v21 = vadd.f32 %v4593_v37, %v833_v41  ;;  %882 = vrot.lane.b32.xlu1 %v871_v47, %s4914_s27  ;;  %v872_v28 = vrot.slane %v856_v60, 7 }
 0x60e   :  { %v835_v22 = vpop.permute.xlu1 %834 }
 0x60f   :  { %7174 = vst [vmem:[#allocation8_spill] sm:$0xff] %v5390_v21  ;;  %v858_v46 = vsub.f32 %v5390_v21, %v5207_v45  ;;  %v5395_v50 = vadd.f32 %v4595_v42, %v835_v22  ;;  %884 = vrot.lane.b32.xlu0 %v872_v28, %s4914_s27  ;;  %v873_v34 = vrot.slane %v857_v19, 7 }
 0x611   :  { %7175 = vst [vmem:[#allocation9_spill] sm:$0xff] %v5395_v50  ;;  %v859_v51 = vsub.f32 %v5395_v50, %v5217_v49  ;;  %886 = vrot.lane.b32.xlu1 %v873_v34, %s4914_s27  ;;  %v874_v18 = vrot.slane %v858_v46, 7 }
 0x613   :  { %888 = vrot.lane.b32.xlu0 %v874_v18, %s4914_s27  ;;  %v875_v37 = vrot.slane %v859_v51, 7 }
 0x615   :  { %890 = vrot.lane.b32.xlu1 %v875_v37, %s4914_s27 }
 0x679   :  { %v877_v62 = vpop.permute.xlu0 %876 }
 0x67a   :  { %v900_v25 = vmul.f32 %v5165_v15, %v877_v62 }
 0x67b   :  { %v881_v2 = vpop.permute.xlu1 %880 }
 0x67c   :  { %v916_v42 = vrot.slane %v900_v25, 1  ;;  %v902_v52 = vmul.f32 %v5157_v13, %v881_v2 }
 0x67d   :  { %v879_v31 = vpop.permute.xlu0 %878 }
 0x67e   :  { %v918_v16 = vrot.slane %v902_v52, 1  ;;  %v901_v10 = vmul.f32 %v5148_v26, %v879_v31  ;;  %924 = vrot.lane.b32.xlu0 %v916_v42, %s4914_s27 }
 0x67f   :  { %v883_v1 = vpop.permute.xlu1 %882 }
 0x680   :  { %v917_v11 = vrot.slane %v901_v10, 1  ;;  %v903_v23 = vmul.f32 %v5173_v24, %v883_v1  ;;  %928 = vrot.lane.b32.xlu1 %v918_v16, %s4914_s27 }
 0x681   :  { %v885_v35 = vpop.permute.xlu0 %884 }
 0x682   :  { %v919_v33 = vrot.slane %v903_v23, 1  ;;  %v904_v40 = vmul.f32 %v5178_v30, %v885_v35  ;;  %926 = vrot.lane.b32.xlu0 %v917_v11, %s4914_s27 }
 0x683   :  { %v887_v55 = vpop.permute.xlu1 %886 }
 0x684   :  { %v920_v0 = vrot.slane %v904_v40, 1  ;;  %v905_v12 = vmul.f32 %v5193_v39, %v887_v55  ;;  %930 = vrot.lane.b32.xlu1 %v919_v33, %s4914_s27  ;;  %v5469_v40 = vld [vmem:[%s7136_s3] ss:$0 sm:$0xff] }
 0x685   :  { %v889_v17 = vpop.permute.xlu0 %888 }
 0x686   :  { %v921_v61 = vrot.slane %v905_v12, 1  ;;  %v906_v8 = vmul.f32 %v5199_v43, %v889_v17  ;;  %932 = vrot.lane.b32.xlu0 %v920_v0, %s4914_s27 }
 0x687   :  { %v891_v9 = vpop.permute.xlu1 %890 }
 0x688   :  { %v922_v38 = vrot.slane %v906_v8, 1  ;;  %v907_v27 = vmul.f32 %v5212_v48, %v891_v9  ;;  %934 = vrot.lane.b32.xlu1 %v921_v61, %s4914_s27 }
 0x68a   :  { %v923_v29 = vrot.slane %v907_v27, 1  ;;  %936 = vrot.lane.b32.xlu0 %v922_v38, %s4914_s27 }
 0x68c   :  { %938 = vrot.lane.b32.xlu1 %v923_v29, %s4914_s27  ;;  %v5483_v29 = vld [vmem:[%s7133_s0 + $0x2] sm:$0x1] }
 0x6f0   :  { %v925_v60 = vpop.permute.xlu0 %924 }
 0x6f1   :  { %v5426_v46 = vadd.f32 %v925_v60, %v5169_v20  ;;  %v5488_v60 = vld [vmem:[%s7133_s0 + $0x12] sm:$0x1] }
 0x6f2   :  { %v929_v47 = vpop.permute.xlu1 %928 }
 0x6f3   :  { %v5420_v41 = vadd.f32 %v929_v47, %v5162_v14 }
 0x6f4   :  { %v927_v19 = vpop.permute.xlu0 %926 }
 0x6f5   :  { %v5423_v28 = vadd.f32 %v927_v19, %v5153_v5  ;;  %v1022_v18 = vrot.slane %v5420_v41, 6  ;;  %v5494_v19 = vld [vmem:[%s7133_s0 + $0xa] sm:$0x1] }
 0x6f6   :  { %v931_v22 = vpop.permute.xlu1 %930 }
 0x6f7   :  { %v1020_v34 = vrot.slane %v5423_v28, 7  ;;  %v5430_v51 = vadd.f32 %v931_v22, %v5182_v32 }
 0x6f8   :  { %v933_v37 = vpop.permute.xlu0 %932 }
 0x6f9   :  { %v1021_v14 = vsel %vm518_vm6, %v1020_v34, %v5426_v46  ;;  %v1024_v62 = vrot.slane %v5430_v51, 5  ;;  %v5437_v5 = vadd.f32 %v933_v37, %v5188_v57  ;;  %v5500_v34 = vld [vmem:[%s7133_s0 + $0x1a] sm:$0x1] }
 0x6fa   :  { %v935_v25 = vpop.permute.xlu1 %934  ;;  %v1023_v20 = vsel %vm521_vm7, %v1022_v18, %v1021_v14  ;;  %v5506_v14 = vld [vmem:[%s7133_s0 + $0x22] sm:$0x1] }
 0x6fb   :  { %v1026_v2 = vrot.slane %v5437_v5, 4  ;;  %v5442_v42 = vadd.f32 %v935_v25, %v5203_v44  ;;  %v1025_v32 = vsel %vm524_vm10, %v1024_v62, %v1023_v20  ;;  %v5512_v20 = vld [vmem:[%s7133_s0 + $0x2a] sm:$0x1] }
 0x6fc   :  { %v937_v52 = vpop.permute.xlu0 %936 }
 0x6fd   :  { %v1028_v31 = vrot.slane %v5442_v42, 3  ;;  %v5447_v16 = vadd.f32 %v937_v52, %v5207_v45  ;;  %v1027_v10 = vsel %vm527_vm11, %v1026_v2, %v1025_v32  ;;  %v5518_v52 = vld [vmem:[%s7133_s0 + $0x32] sm:$0x1] }
 0x6fe   :  { %v939_v57 = vpop.permute.xlu1 %938 }
 0x6ff   :  { %v5451_v1 = vadd.f32 %v939_v57, %v5217_v49  ;;  %v1029_v11 = vsel %vm530_vm13, %v1028_v31, %v1027_v10  ;;  %v1030_v23 = vrot.slane %v5447_v16, 2  ;;  %v5524_v57 = vld [vmem:[%s7133_s0 + $0x3a] sm:$0x1] }
 0x701   :  { %v1031_v44 = vsel %vm533_vm14, %v1030_v23, %v1029_v11  ;;  %v1032_v35 = vrot.slane %v5451_v1, 1 }
 0x703   :  { %v1033_v33 = vsel %vm536_vm15, %v1032_v35, %v1031_v44 }
 0x704   :  { %1034 = vrot.lane.b32.xlu0 %v1033_v33, %s4914_s27 }
 0x776   :  { %v1035_v45 = vpop.permute.xlu0 %1034 }
 0x777   :  { %4383 = vmatmul.mubr.msk.f32.vlgmr.msra.gmra.mrb[2].mxu0 %vm171_vm1, %v1035_v45 }
 0x778   :  { %4466 = vmatpush3.bf16.msra.mxu0 %v4960_v4  ;;  %4404 = vmatprep.mubr.msk.f32.mxu0 %vm4912_vm0, %v7140_v6 }
 0x779   :  { %4467 = vmatprep.subr.bf16.mxu0 %v7139_v3 }
 0x77c   :  { %4469 = vmatpush3.bf16.msra.mxu0 %v4971_v7 }
 0x77d   :  { %4476 = vmatprep.subr.bf16.mxu0 %v7139_v3 }
 0x84a   :  { %v1104_v49 = vpop.f32.mrb[2].mxu0 }
 0x84b   :  { %v1105_v55 = vadd.f32 %v5469_v40, %v1104_v49  ;;  %v4384_v0 = vpop.f32.mrb[3].mxu0 }
 0x84d   :  { %1180 = vrot.lane.b32.xlu1 %v1105_v55, %s4914_s27  ;;  %v1110_v12 = vrot.slane %v1105_v55, 2  ;;  %v1109_v17 = vrot.slane %v1105_v55, 1  ;;  %v1111_v61 = vrot.slane %v1105_v55, 3  ;;  %v1112_v8 = vrot.slane %v1105_v55, 4 }
 0x84e   :  { %v1113_v9 = vrot.slane %v1105_v55, 5  ;;  %v1114_v38 = vrot.slane %v1105_v55, 6  ;;  %v1115_v27 = vrot.slane %v1105_v55, 7  ;;  %v1124_v47 = vadd.f32 %v1105_v55, %v5483_v29 }
 0x84f   :  { %1184 = vrot.lane.b32.xlu0 %v1110_v12, %s4914_s27  ;;  %v1126_v22 = vadd.f32 %v1110_v12, %v5488_v60  ;;  %v1125_v18 = vadd.f32 %v1109_v17, %v5494_v19  ;;  %v1127_v25 = vadd.f32 %v1111_v61, %v5500_v34  ;;  %v1128_v32 = vadd.f32 %v1112_v8, %v5506_v14 }
 0x850   :  { %v4259_v37 = vmul.f32 -1.442695, %v1124_v47  ;;  %v1129_v10 = vadd.f32 %v1113_v9, %v5512_v20  ;;  %v1130_v23 = vadd.f32 %v1114_v38, %v5518_v52  ;;  %v1131_v35 = vadd.f32 %v1115_v27, %v5524_v57 }
 0x851   :  { %1182 = vrot.lane.b32.xlu1 %v1109_v17, %s4914_s27  ;;  %v4261_v62 = vmul.f32 -1.442695, %v1126_v22  ;;  %v4260_v2 = vmul.f32 -1.442695, %v1125_v18  ;;  %v4262_v31 = vmul.f32 -1.442695, %v1127_v25 }
 0x852   :  { %4596 = vpow2.f32 %v4259_v37  ;;  %v4263_v11 = vmul.f32 -1.442695, %v1128_v32  ;;  %v4264_v44 = vmul.f32 -1.442695, %v1129_v10  ;;  %v4265_v33 = vmul.f32 -1.442695, %v1130_v23 }
 0x853   :  { %1186 = vrot.lane.b32.xlu0 %v1111_v61, %s4914_s27  ;;  %4598 = vpow2.f32 %v4261_v62  ;;  %v4266_v49 = vmul.f32 -1.442695, %v1131_v35 }
 0x854   :  { %4600 = vpow2.f32 %v4260_v2 }
 0x855   :  { %1188 = vrot.lane.b32.xlu1 %v1112_v8, %s4914_s27  ;;  %4602 = vpow2.f32 %v4262_v31 }
 0x856   :  { %4604 = vpow2.f32 %v4263_v11 }
 0x857   :  { %1190 = vrot.lane.b32.xlu0 %v1113_v9, %s4914_s27  ;;  %4606 = vpow2.f32 %v4264_v44 }
 0x858   :  { %4608 = vpow2.f32 %v4265_v33 }
 0x859   :  { %1192 = vrot.lane.b32.xlu1 %v1114_v38, %s4914_s27  ;;  %4610 = vpow2.f32 %v4266_v49 }
 0x85b   :  { %1194 = vrot.lane.b32.xlu0 %v1115_v27, %s4914_s27 }
 0x85c   :  { %v4597_v45 = vpop.eup %4596 }
 0x85d   :  { %v4599_v55 = vpop.eup %4598  ;;  %v1156_v0 = vadd.f32 1.0, %v4597_v45 }
 0x85e   :  { %v4601_v12 = vpop.eup %4600  ;;  %v1158_v17 = vadd.f32 1.0, %v4599_v55 }
 0x85f   :  { %v4603_v61 = vpop.eup %4602  ;;  %v1157_v8 = vadd.f32 1.0, %v4601_v12  ;;  %4612 = vrcp.f32 %v1156_v0 }
 0x860   :  { %v4605_v9 = vpop.eup %4604  ;;  %4614 = vrcp.f32 %v1158_v17  ;;  %v1159_v38 = vadd.f32 1.0, %v4603_v61 }
 0x861   :  { %v4607_v47 = vpop.eup %4606  ;;  %4616 = vrcp.f32 %v1157_v8  ;;  %v1160_v27 = vadd.f32 1.0, %v4605_v9 }
 0x862   :  { %v4609_v22 = vpop.eup %4608  ;;  %4618 = vrcp.f32 %v1159_v38  ;;  %v1161_v18 = vadd.f32 1.0, %v4607_v47 }
 0x863   :  { %v4611_v37 = vpop.eup %4610  ;;  %4620 = vrcp.f32 %v1160_v27  ;;  %v1162_v62 = vadd.f32 1.0, %v4609_v22 }
 0x864   :  { %4622 = vrcp.f32 %v1161_v18  ;;  %v1163_v2 = vadd.f32 1.0, %v4611_v37 }
 0x865   :  { %4624 = vrcp.f32 %v1162_v62 }
 0x866   :  { %4626 = vrcp.f32 %v1163_v2 }
 0x869   :  { %v5528_v25 = vpop.eup %4612 }
 0x86a   :  { %v5531_v10 = vpop.eup %4614 }
 0x86b   :  { %v5535_v44 = vpop.eup %4616 }
 0x86c   :  { %v5539_v45 = vpop.eup %4618 }
 0x86d   :  { %v5543_v0 = vpop.eup %4620 }
 0x86e   :  { %v5547_v61 = vpop.eup %4622 }
 0x86f   :  { %v5551_v38 = vpop.eup %4624 }
 0x870   :  { %v5555_v22 = vpop.eup %4626 }
 0x8bf   :  { %v1181_v32 = vpop.permute.xlu1 %1180 }
 0x8c0   :  { %v1204_v31 = vmul.f32 %v5528_v25, %v1181_v32 }
 0x8c1   :  { %v1185_v11 = vpop.permute.xlu0 %1184 }
 0x8c2   :  { %v1206_v23 = vmul.f32 %v5531_v10, %v1185_v11  ;;  %1220 = vrot.lane.b32.xlu1 %v1204_v31, %s4914_s27 }
 0x8c3   :  { %v1183_v35 = vpop.permute.xlu1 %1182 }
 0x8c4   :  { %v1205_v33 = vmul.f32 %v5535_v44, %v1183_v35  ;;  %1224 = vrot.lane.b32.xlu0 %v1206_v23, %s4914_s27 }
 0x8c5   :  { %v1187_v49 = vpop.permute.xlu0 %1186 }
 0x8c6   :  { %v1207_v55 = vmul.f32 %v5539_v45, %v1187_v49  ;;  %1222 = vrot.lane.b32.xlu1 %v1205_v33, %s4914_s27 }
 0x8c7   :  { %v1189_v12 = vpop.permute.xlu1 %1188 }
 0x8c8   :  { %v1208_v17 = vmul.f32 %v5543_v0, %v1189_v12  ;;  %1226 = vrot.lane.b32.xlu0 %v1207_v55, %s4914_s27 }
 0x8c9   :  { %v1191_v8 = vpop.permute.xlu0 %1190 }
 0x8ca   :  { %v1209_v9 = vmul.f32 %v5547_v61, %v1191_v8  ;;  %1228 = vrot.lane.b32.xlu1 %v1208_v17, %s4914_s27 }
 0x8cb   :  { %v1193_v47 = vpop.permute.xlu1 %1192 }
 0x8cc   :  { %v1210_v27 = vmul.f32 %v5551_v38, %v1193_v47  ;;  %1230 = vrot.lane.b32.xlu0 %v1209_v9, %s4914_s27 }
 0x8cd   :  { %v1195_v18 = vpop.permute.xlu0 %1194 }
 0x8ce   :  { %v1211_v37 = vmul.f32 %v5555_v22, %v1195_v18  ;;  %1232 = vrot.lane.b32.xlu1 %v1210_v27, %s4914_s27 }
 0x8d0   :  { %1234 = vrot.lane.b32.xlu0 %v1211_v37, %s4914_s27 }
 0x934   :  { %v1221_v62 = vpop.permute.xlu1 %1220 }
 0x935   :  { %v1244_v2 = vadd.f32 %v1221_v62, %v5483_v29 }
 0x936   :  { %v1225_v32 = vpop.permute.xlu0 %1224 }
 0x937   :  { %4628 = vtanh.f32 %v1244_v2  ;;  %v1246_v31 = vadd.f32 %v1225_v32, %v5488_v60 }
 0x938   :  { %v1223_v11 = vpop.permute.xlu1 %1222 }
 0x939   :  { %4630 = vtanh.f32 %v1246_v31  ;;  %v1245_v23 = vadd.f32 %v1223_v11, %v5494_v19 }
 0x93a   :  { %v1227_v35 = vpop.permute.xlu0 %1226 }
 0x93b   :  { %4632 = vtanh.f32 %v1245_v23  ;;  %v1247_v33 = vadd.f32 %v1227_v35, %v5500_v34 }
 0x93c   :  { %v1229_v49 = vpop.permute.xlu1 %1228 }
 0x93d   :  { %4634 = vtanh.f32 %v1247_v33  ;;  %v1248_v55 = vadd.f32 %v1229_v49, %v5506_v14 }
 0x93e   :  { %v1231_v12 = vpop.permute.xlu0 %1230 }
 0x93f   :  { %4636 = vtanh.f32 %v1248_v55  ;;  %v1249_v29 = vadd.f32 %v1231_v12, %v5512_v20 }
 0x940   :  { %v1233_v17 = vpop.permute.xlu1 %1232 }
 0x941   :  { %v4629_v8 = vpop.eup %4628  ;;  %4638 = vtanh.f32 %v1249_v29  ;;  %v1250_v60 = vadd.f32 %v1233_v17, %v5518_v52 }
 0x942   :  { %v1235_v9 = vpop.permute.xlu0 %1234  ;;  %v1260_v19 = vsub.f32 %v5426_v46, %v4629_v8 }
 0x943   :  { %v4631_v47 = vpop.eup %4630  ;;  %4640 = vtanh.f32 %v1250_v60  ;;  %v1251_v34 = vadd.f32 %v1235_v9, %v5524_v57 }
 0x944   :  { %1276 = vrot.lane.b32.xlu1 %v1260_v19, %s4917_s19  ;;  %v1262_v14 = vsub.f32 %v5420_v41, %v4631_v47 }
 0x945   :  { %v4633_v27 = vpop.eup %4632  ;;  %4642 = vtanh.f32 %v1251_v34 }
 0x946   :  { %1280 = vrot.lane.b32.xlu0 %v1262_v14, %s4917_s19  ;;  %v1261_v20 = vsub.f32 %v5423_v28, %v4633_v27 }
 0x947   :  { %v4635_v18 = vpop.eup %4634 }
 0x948   :  { %1278 = vrot.lane.b32.xlu1 %v1261_v20, %s4917_s19  ;;  %v1263_v52 = vsub.f32 %v5430_v51, %v4635_v18 }
 0x949   :  { %v4637_v37 = vpop.eup %4636 }
 0x94a   :  { %1282 = vrot.lane.b32.xlu0 %v1263_v52, %s4917_s19  ;;  %v1264_v57 = vsub.f32 %v5437_v5, %v4637_v37 }
 0x94b   :  { %v4639_v62 = vpop.eup %4638 }
 0x94c   :  { %1284 = vrot.lane.b32.xlu1 %v1264_v57, %s4917_s19  ;;  %v1265_v2 = vsub.f32 %v5442_v42, %v4639_v62 }
 0x94d   :  { %v4641_v32 = vpop.eup %4640 }
 0x94e   :  { %1286 = vrot.lane.b32.xlu0 %v1265_v2, %s4917_s19  ;;  %v1266_v31 = vsub.f32 %v5447_v16, %v4641_v32 }
 0x94f   :  { %v4643_v11 = vpop.eup %4642 }
 0x950   :  { %1288 = vrot.lane.b32.xlu1 %v1266_v31, %s4917_s19  ;;  %v1267_v23 = vsub.f32 %v5451_v1, %v4643_v11 }
 0x952   :  { %1290 = vrot.lane.b32.xlu0 %v1267_v23, %s4917_s19 }
 0x9b6   :  { %v1277_v35 = vpop.permute.xlu1 %1276 }
 0x9b7   :  { %v1300_v33 = vmul.f32 %v5528_v25, %v1277_v35 }
 0x9b8   :  { %v1281_v49 = vpop.permute.xlu0 %1280 }
 0x9b9   :  { %v1302_v55 = vmul.f32 %v5531_v10, %v1281_v49  ;;  %1316 = vrot.lane.b32.xlu1 %v1300_v33, %s4918_s1 }
 0x9ba   :  { %v1279_v12 = vpop.permute.xlu1 %1278 }
 0x9bb   :  { %v1301_v29 = vmul.f32 %v5535_v44, %v1279_v12  ;;  %1320 = vrot.lane.b32.xlu0 %v1302_v55, %s4918_s1 }
 0x9bc   :  { %v1283_v17 = vpop.permute.xlu0 %1282 }
 0x9bd   :  { %v1303_v60 = vmul.f32 %v5539_v45, %v1283_v17  ;;  %1318 = vrot.lane.b32.xlu1 %v1301_v29, %s4918_s1 }
 0x9be   :  { %v1285_v9 = vpop.permute.xlu1 %1284 }
 0x9bf   :  { %v1304_v19 = vmul.f32 %v5543_v0, %v1285_v9  ;;  %1322 = vrot.lane.b32.xlu0 %v1303_v60, %s4918_s1 }
 0x9c0   :  { %v1287_v25 = vpop.permute.xlu0 %1286 }
 0x9c1   :  { %v1305_v10 = vmul.f32 %v5547_v61, %v1287_v25  ;;  %1324 = vrot.lane.b32.xlu1 %v1304_v19, %s4918_s1 }
 0x9c2   :  { %v1289_v34 = vpop.permute.xlu1 %1288 }
 0x9c3   :  { %v1306_v44 = vmul.f32 %v5551_v38, %v1289_v34  ;;  %1326 = vrot.lane.b32.xlu0 %v1305_v10, %s4918_s1 }
 0x9c4   :  { %v1291_v14 = vpop.permute.xlu0 %1290 }
 0x9c5   :  { %v1307_v45 = vmul.f32 %v5555_v22, %v1291_v14  ;;  %1328 = vrot.lane.b32.xlu1 %v1306_v44, %s4918_s1 }
 0x9c7   :  { %1330 = vrot.lane.b32.xlu0 %v1307_v45, %s4918_s1 }
 0xa2b   :  { %v1317_v0 = vpop.permute.xlu1 %1316 }
 0xa2c   :  { %v5600_v20 = vadd.f32 %v4629_v8, %v1317_v0 }
 0xa2d   :  { %v1321_v52 = vpop.permute.xlu0 %1320 }
 0xa2e   :  { %v1348_v61 = vsub.f32 %v5600_v20, %v5426_v46  ;;  %v5604_v57 = vadd.f32 %v4631_v47, %v1321_v52 }
 0xa2f   :  { %v1319_v2 = vpop.permute.xlu1 %1318 }
 0xa30   :  { %v1364_v38 = vrot.slane %v1348_v61, 6  ;;  %v1350_v31 = vsub.f32 %v5604_v57, %v5420_v41  ;;  %v5608_v23 = vadd.f32 %v4633_v27, %v1319_v2 }
 0xa31   :  { %v1323_v22 = vpop.permute.xlu0 %1322 }
 0xa32   :  { %v1366_v35 = vrot.slane %v1350_v31, 6  ;;  %v1349_v33 = vsub.f32 %v5608_v23, %v5423_v28  ;;  %v5612_v8 = vadd.f32 %v4635_v18, %v1323_v22  ;;  %1372 = vrot.lane.b32.xlu1 %v1364_v38, %s4914_s27 }
 0xa33   :  { %v1325_v49 = vpop.permute.xlu1 %1324 }
 0xa34   :  { %v1365_v55 = vrot.slane %v1349_v33, 6  ;;  %v1351_v47 = vsub.f32 %v5612_v8, %v5430_v51  ;;  %v5617_v12 = vadd.f32 %v4637_v37, %v1325_v49  ;;  %1376 = vrot.lane.b32.xlu0 %v1366_v35, %s4914_s27 }
 0xa35   :  { %v1327_v27 = vpop.permute.xlu0 %1326 }
 0xa36   :  { %7176 = vst [vmem:[#allocation10_spill] sm:$0xff] %v5617_v12  ;;  %v1367_v29 = vrot.slane %v1351_v47, 6  ;;  %v1352_v17 = vsub.f32 %v5617_v12, %v5437_v5  ;;  %v5622_v60 = vadd.f32 %v4639_v62, %v1327_v27  ;;  %1374 = vrot.lane.b32.xlu1 %v1365_v55, %s4914_s27 }
 0xa37   :  { %v1329_v18 = vpop.permute.xlu1 %1328 }
 0xa38   :  { %7177 = vst [vmem:[#allocation11_spill] sm:$0xff] %v5622_v60  ;;  %v1368_v9 = vrot.slane %v1352_v17, 6  ;;  %v1353_v19 = vsub.f32 %v5622_v60, %v5442_v42  ;;  %v5627_v25 = vadd.f32 %v4641_v32, %v1329_v18  ;;  %1378 = vrot.lane.b32.xlu0 %v1367_v29, %s4914_s27 }
 0xa39   :  { %v1331_v37 = vpop.permute.xlu0 %1330 }
 0xa3a   :  { %7178 = vst [vmem:[#allocation12_spill] sm:$0xff] %v5627_v25  ;;  %v1369_v10 = vrot.slane %v1353_v19, 6  ;;  %v1354_v34 = vsub.f32 %v5627_v25, %v5447_v16  ;;  %v5632_v44 = vadd.f32 %v4643_v11, %v1331_v37  ;;  %1380 = vrot.lane.b32.xlu1 %v1368_v9, %s4914_s27 }
 0xa3c   :  { %7179 = vst [vmem:[#allocation13_spill] sm:$0xff] %v5632_v44  ;;  %v1370_v62 = vrot.slane %v1354_v34, 6  ;;  %v1355_v14 = vsub.f32 %v5632_v44, %v5451_v1  ;;  %1382 = vrot.lane.b32.xlu0 %v1369_v10, %s4914_s27 }
 0xa3e   :  { %v1371_v45 = vrot.slane %v1355_v14, 6  ;;  %1384 = vrot.lane.b32.xlu1 %v1370_v62, %s4914_s27 }
 0xa40   :  { %1386 = vrot.lane.b32.xlu0 %v1371_v45, %s4914_s27 }
 0xaa4   :  { %v1373_v32 = vpop.permute.xlu1 %1372 }
 0xaa5   :  { %v1396_v0 = vmul.f32 %v5165_v15, %v1373_v32 }
 0xaa6   :  { %v1377_v52 = vpop.permute.xlu0 %1376 }
 0xaa7   :  { %v1412_v61 = vrot.slane %v1396_v0, 2  ;;  %v1398_v11 = vmul.f32 %v5157_v13, %v1377_v52 }
 0xaa8   :  { %v1375_v2 = vpop.permute.xlu1 %1374 }
 0xaa9   :  { %v1414_v38 = vrot.slane %v1398_v11, 2  ;;  %v1397_v31 = vmul.f32 %v5148_v26, %v1375_v2  ;;  %1420 = vrot.lane.b32.xlu1 %v1412_v61, %s4914_s27 }
 0xaaa   :  { %v1379_v22 = vpop.permute.xlu0 %1378 }
 0xaab   :  { %v1413_v35 = vrot.slane %v1397_v31, 2  ;;  %v1399_v33 = vmul.f32 %v5173_v24, %v1379_v22  ;;  %1424 = vrot.lane.b32.xlu0 %v1414_v38, %s4914_s27 }
 0xaac   :  { %v1381_v49 = vpop.permute.xlu1 %1380 }
 0xaad   :  { %v1415_v55 = vrot.slane %v1399_v33, 2  ;;  %v1400_v47 = vmul.f32 %v5178_v30, %v1381_v49  ;;  %1422 = vrot.lane.b32.xlu1 %v1413_v35, %s4914_s27 }
 0xaae   :  { %v1383_v27 = vpop.permute.xlu0 %1382 }
 0xaaf   :  { %v1416_v29 = vrot.slane %v1400_v47, 2  ;;  %v1401_v17 = vmul.f32 %v5193_v39, %v1383_v27  ;;  %1426 = vrot.lane.b32.xlu0 %v1415_v55, %s4914_s27 }
 0xab0   :  { %v1385_v18 = vpop.permute.xlu1 %1384 }
 0xab1   :  { %v1417_v9 = vrot.slane %v1401_v17, 2  ;;  %v1402_v19 = vmul.f32 %v5199_v43, %v1385_v18  ;;  %1428 = vrot.lane.b32.xlu1 %v1416_v29, %s4914_s27 }
 0xab2   :  { %v1387_v37 = vpop.permute.xlu0 %1386 }
 0xab3   :  { %v1418_v10 = vrot.slane %v1402_v19, 2  ;;  %v1403_v34 = vmul.f32 %v5212_v48, %v1387_v37  ;;  %1430 = vrot.lane.b32.xlu0 %v1417_v9, %s4914_s27 }
 0xab5   :  { %v1419_v62 = vrot.slane %v1403_v34, 2  ;;  %1432 = vrot.lane.b32.xlu1 %v1418_v10, %s4914_s27 }
 0xab7   :  { %1434 = vrot.lane.b32.xlu0 %v1419_v62, %s4914_s27 }
 0xb1b   :  { %v1421_v14 = vpop.permute.xlu1 %1420 }
 0xb1c   :  { %v5663_v11 = vadd.f32 %v1421_v14, %v5426_v46 }
 0xb1d   :  { %v1425_v45 = vpop.permute.xlu0 %1424 }
 0xb1e   :  { %v5657_v32 = vadd.f32 %v1425_v45, %v5420_v41 }
 0xb1f   :  { %v1423_v0 = vpop.permute.xlu1 %1422 }
 0xb20   :  { %v5660_v52 = vadd.f32 %v1423_v0, %v5423_v28  ;;  %v1518_v31 = vrot.slane %v5657_v32, 6 }
 0xb21   :  { %v1427_v61 = vpop.permute.xlu0 %1426 }
 0xb22   :  { %v1516_v2 = vrot.slane %v5660_v52, 7  ;;  %v5667_v38 = vadd.f32 %v1427_v61, %v5430_v51 }
 0xb23   :  { %v1429_v22 = vpop.permute.xlu1 %1428 }
 0xb24   :  { %v1517_v41 = vsel %vm518_vm6, %v1516_v2, %v5663_v11  ;;  %v1520_v35 = vrot.slane %v5667_v38, 5  ;;  %v5674_v28 = vadd.f32 %v1429_v22, %v5437_v5  ;;  %v5715_v22 = vld [vmem:[%s7133_s0 + $0x3] sm:$0x1] }
 0xb25   :  { %v1431_v33 = vpop.permute.xlu0 %1430  ;;  %v1519_v46 = vsel %vm521_vm7, %v1518_v31, %v1517_v41  ;;  %v5720_v41 = vld [vmem:[%s7133_s0 + $0x13] sm:$0x1] }
 0xb26   :  { %v1522_v49 = vrot.slane %v5674_v28, 4  ;;  %v5679_v55 = vadd.f32 %v1431_v33, %v5442_v42  ;;  %v1521_v51 = vsel %vm524_vm10, %v1520_v35, %v1519_v46  ;;  %v5726_v33 = vld [vmem:[%s7133_s0 + $0xb] sm:$0x1] }
 0xb27   :  { %v1433_v47 = vpop.permute.xlu1 %1432 }
 0xb28   :  { %v1524_v27 = vrot.slane %v5679_v55, 3  ;;  %v5684_v29 = vadd.f32 %v1433_v47, %v5447_v16  ;;  %v1523_v17 = vsel %vm527_vm11, %v1522_v49, %v1521_v51  ;;  %v5732_v49 = vld [vmem:[%s7133_s0 + $0x1b] sm:$0x1] }
 0xb29   :  { %v1435_v5 = vpop.permute.xlu0 %1434 }
 0xb2a   :  { %v1526_v18 = vrot.slane %v5684_v29, 2  ;;  %v5689_v9 = vadd.f32 %v1435_v5, %v5451_v1  ;;  %v1525_v19 = vsel %vm530_vm13, %v1524_v27, %v1523_v17  ;;  %v5738_v27 = vld [vmem:[%s7133_s0 + $0x23] sm:$0x1] }
 0xb2c   :  { %v1527_v42 = vsel %vm533_vm14, %v1526_v18, %v1525_v19  ;;  %v1528_v37 = vrot.slane %v5689_v9, 1  ;;  %v5744_v18 = vld [vmem:[%s7133_s0 + $0x2b] sm:$0x1] }
 0xb2e   :  { %v1529_v10 = vsel %vm536_vm15, %v1528_v37, %v1527_v42  ;;  %v5750_v37 = vld [vmem:[%s7133_s0 + $0x33] sm:$0x1] }
 0xb2f   :  { %1530 = vrot.lane.b32.xlu1 %v1529_v10, %s4914_s27 }
 0xba1   :  { %v1531_v16 = vpop.permute.xlu1 %1530 }
 0xba2   :  { %4394 = vmatmul.mubr.msk.f32.vlgmr.msra.gmra.mrb[2].mxu1 %vm171_vm1, %v1531_v16 }
 0xba3   :  { %4472 = vmatpush3.bf16.msra.mxu1 %v4960_v4  ;;  %4415 = vmatprep.mubr.msk.f32.mxu1 %vm4912_vm0, %v7140_v6 }
 0xba4   :  { %4473 = vmatprep.subr.bf16.mxu1 %v7139_v3 }
 0xba7   :  { %4475 = vmatpush3.bf16.msra.mxu1 %v4971_v7 }
 0xba8   :  { %4482 = vmatprep.subr.bf16.mxu1 %v7139_v3 }
 0xc75   :  { %v1600_v1 = vpop.f32.mrb[2].mxu1 }
 0xc76   :  { %v1601_v34 = vadd.f32 %v5469_v40, %v1600_v1  ;;  %v4395_v62 = vpop.f32.mrb[3].mxu1  ;;  %v5756_v1 = vld [vmem:[%s7133_s0 + $0x3b] sm:$0x1] }
 0xc78   :  { %1676 = vrot.lane.b32.xlu0 %v1601_v34, %s4914_s27  ;;  %v1606_v14 = vrot.slane %v1601_v34, 2  ;;  %v1605_v45 = vrot.slane %v1601_v34, 1  ;;  %v1607_v0 = vrot.slane %v1601_v34, 3  ;;  %v1608_v61 = vrot.slane %v1601_v34, 4 }
 0xc79   :  { %v1609_v2 = vrot.slane %v1601_v34, 5  ;;  %v1610_v31 = vrot.slane %v1601_v34, 6  ;;  %v1611_v40 = vrot.slane %v1601_v34, 7  ;;  %v1620_v35 = vadd.f32 %v1601_v34, %v5715_v22 }
 0xc7a   :  { %1680 = vrot.lane.b32.xlu1 %v1606_v14, %s4914_s27  ;;  %v1622_v46 = vadd.f32 %v1606_v14, %v5720_v41  ;;  %v1621_v51 = vadd.f32 %v1605_v45, %v5726_v33  ;;  %v1623_v5 = vadd.f32 %v1607_v0, %v5732_v49  ;;  %v1624_v42 = vadd.f32 %v1608_v61, %v5738_v27 }
 0xc7b   :  { %v4268_v47 = vmul.f32 -1.442695, %v1620_v35  ;;  %v1625_v16 = vadd.f32 %v1609_v2, %v5744_v18  ;;  %v1626_v62 = vadd.f32 %v1610_v31, %v5750_v37 }
 0xc7c   :  { %1678 = vrot.lane.b32.xlu0 %v1605_v45, %s4914_s27  ;;  %v4270_v17 = vmul.f32 -1.442695, %v1622_v46  ;;  %v4269_v19 = vmul.f32 -1.442695, %v1621_v51  ;;  %v4271_v10 = vmul.f32 -1.442695, %v1623_v5  ;;  %v1627_v45 = vadd.f32 %v1611_v40, %v5756_v1 }
 0xc7d   :  { %4644 = vpow2.f32 %v4268_v47  ;;  %v4272_v34 = vmul.f32 -1.442695, %v1624_v42  ;;  %v4273_v14 = vmul.f32 -1.442695, %v1625_v16 }
 0xc7e   :  { %1682 = vrot.lane.b32.xlu1 %v1607_v0, %s4914_s27  ;;  %4646 = vpow2.f32 %v4270_v17  ;;  %v4274_v0 = vmul.f32 -1.442695, %v1626_v62  ;;  %v4275_v35 = vmul.f32 -1.442695, %v1627_v45 }
 0xc7f   :  { %4648 = vpow2.f32 %v4269_v19 }
 0xc80   :  { %1684 = vrot.lane.b32.xlu0 %v1608_v61, %s4914_s27  ;;  %4650 = vpow2.f32 %v4271_v10 }
 0xc81   :  { %4652 = vpow2.f32 %v4272_v34 }
 0xc82   :  { %1686 = vrot.lane.b32.xlu1 %v1609_v2, %s4914_s27  ;;  %4654 = vpow2.f32 %v4273_v14 }
 0xc83   :  { %4656 = vpow2.f32 %v4274_v0 }
 0xc84   :  { %1688 = vrot.lane.b32.xlu0 %v1610_v31, %s4914_s27  ;;  %4658 = vpow2.f32 %v4275_v35 }
 0xc86   :  { %1690 = vrot.lane.b32.xlu1 %v1611_v40, %s4914_s27 }
 0xc87   :  { %v4645_v61 = vpop.eup %4644 }
 0xc88   :  { %v4647_v46 = vpop.eup %4646  ;;  %v1652_v2 = vadd.f32 1.0, %v4645_v61 }
 0xc89   :  { %v4649_v51 = vpop.eup %4648  ;;  %v1654_v47 = vadd.f32 1.0, %v4647_v46 }
 0xc8a   :  { %v4651_v17 = vpop.eup %4650  ;;  %4660 = vrcp.f32 %v1652_v2  ;;  %v1653_v5 = vadd.f32 1.0, %v4649_v51 }
 0xc8b   :  { %v4653_v19 = vpop.eup %4652  ;;  %4662 = vrcp.f32 %v1654_v47  ;;  %v1655_v31 = vadd.f32 1.0, %v4651_v17 }
 0xc8c   :  { %v4655_v42 = vpop.eup %4654  ;;  %4664 = vrcp.f32 %v1653_v5  ;;  %v1656_v40 = vadd.f32 1.0, %v4653_v19 }
 0xc8d   :  { %v4657_v10 = vpop.eup %4656  ;;  %4666 = vrcp.f32 %v1655_v31  ;;  %v1657_v16 = vadd.f32 1.0, %v4655_v42 }
 0xc8e   :  { %v4659_v34 = vpop.eup %4658  ;;  %4668 = vrcp.f32 %v1656_v40  ;;  %v1658_v62 = vadd.f32 1.0, %v4657_v10 }
 0xc8f   :  { %4670 = vrcp.f32 %v1657_v16  ;;  %v1659_v0 = vadd.f32 1.0, %v4659_v34 }
 0xc90   :  { %4672 = vrcp.f32 %v1658_v62 }
 0xc91   :  { %4674 = vrcp.f32 %v1659_v0 }
 0xc94   :  { %v5760_v14 = vpop.eup %4660 }
 0xc95   :  { %v5763_v35 = vpop.eup %4662 }
 0xc96   :  { %v5767_v51 = vpop.eup %4664 }
 0xc97   :  { %v5771_v5 = vpop.eup %4666 }
 0xc98   :  { %v5775_v42 = vpop.eup %4668 }
 0xc99   :  { %v5779_v16 = vpop.eup %4670 }
 0xcea   :  { %v1677_v45 = vpop.permute.xlu0 %1676 }
 0xceb   :  { %v1700_v61 = vmul.f32 %v5760_v14, %v1677_v45  ;;  %v5783_v45 = vpop.eup %4672 }
 0xcec   :  { %v1681_v46 = vpop.permute.xlu1 %1680 }
 0xced   :  { %v1702_v2 = vmul.f32 %v5763_v35, %v1681_v46  ;;  %1716 = vrot.lane.b32.xlu0 %v1700_v61, %s4914_s27  ;;  %v5787_v46 = vpop.eup %4674 }
 0xcee   :  { %v1679_v47 = vpop.permute.xlu0 %1678 }
 0xcef   :  { %v1701_v17 = vmul.f32 %v5767_v51, %v1679_v47  ;;  %1720 = vrot.lane.b32.xlu1 %v1702_v2, %s4914_s27 }
 0xcf0   :  { %v1683_v19 = vpop.permute.xlu1 %1682 }
 0xcf1   :  { %v1703_v31 = vmul.f32 %v5771_v5, %v1683_v19  ;;  %1718 = vrot.lane.b32.xlu0 %v1701_v17, %s4914_s27 }
 0xcf2   :  { %v1685_v40 = vpop.permute.xlu0 %1684 }
 0xcf3   :  { %v1704_v10 = vmul.f32 %v5775_v42, %v1685_v40  ;;  %1722 = vrot.lane.b32.xlu1 %v1703_v31, %s4914_s27 }
 0xcf4   :  { %v1687_v34 = vpop.permute.xlu1 %1686 }
 0xcf5   :  { %v1705_v62 = vmul.f32 %v5779_v16, %v1687_v34  ;;  %1724 = vrot.lane.b32.xlu0 %v1704_v10, %s4914_s27 }
 0xcf6   :  { %v1689_v0 = vpop.permute.xlu0 %1688 }
 0xcf7   :  { %v1706_v61 = vmul.f32 %v5783_v45, %v1689_v0  ;;  %1726 = vrot.lane.b32.xlu1 %v1705_v62, %s4914_s27 }
 0xcf8   :  { %v1691_v2 = vpop.permute.xlu1 %1690 }
 0xcf9   :  { %v1707_v47 = vmul.f32 %v5787_v46, %v1691_v2  ;;  %1728 = vrot.lane.b32.xlu0 %v1706_v61, %s4914_s27 }
 0xcfb   :  { %1730 = vrot.lane.b32.xlu1 %v1707_v47, %s4914_s27 }
 0xd5f   :  { %v1717_v17 = vpop.permute.xlu0 %1716 }
 0xd60   :  { %v1740_v19 = vadd.f32 %v1717_v17, %v5715_v22 }
 0xd61   :  { %v1721_v31 = vpop.permute.xlu1 %1720 }
 0xd62   :  { %4676 = vtanh.f32 %v1740_v19  ;;  %v1742_v40 = vadd.f32 %v1721_v31, %v5720_v41 }
 0xd63   :  { %v1719_v10 = vpop.permute.xlu0 %1718 }
 0xd64   :  { %4678 = vtanh.f32 %v1742_v40  ;;  %v1741_v34 = vadd.f32 %v1719_v10, %v5726_v33 }
 0xd65   :  { %v1723_v62 = vpop.permute.xlu1 %1722 }
 0xd66   :  { %4680 = vtanh.f32 %v1741_v34  ;;  %v1743_v0 = vadd.f32 %v1723_v62, %v5732_v49 }
 0xd67   :  { %v1725_v2 = vpop.permute.xlu0 %1724 }
 0xd68   :  { %4682 = vtanh.f32 %v1743_v0  ;;  %v1744_v61 = vadd.f32 %v1725_v2, %v5738_v27 }
 0xd69   :  { %v1727_v47 = vpop.permute.xlu1 %1726 }
 0xd6a   :  { %4684 = vtanh.f32 %v1744_v61  ;;  %v1745_v22 = vadd.f32 %v1727_v47, %v5744_v18 }
 0xd6b   :  { %v1729_v17 = vpop.permute.xlu0 %1728 }
 0xd6c   :  { %v4677_v19 = vpop.eup %4676  ;;  %4686 = vtanh.f32 %v1745_v22  ;;  %v1746_v41 = vadd.f32 %v1729_v17, %v5750_v37 }
 0xd6d   :  { %v1731_v31 = vpop.permute.xlu1 %1730  ;;  %v1756_v33 = vsub.f32 %v5663_v11, %v4677_v19 }
 0xd6e   :  { %v4679_v40 = vpop.eup %4678  ;;  %4688 = vtanh.f32 %v1746_v41  ;;  %v1747_v49 = vadd.f32 %v1731_v31, %v5756_v1 }
 0xd6f   :  { %1772 = vrot.lane.b32.xlu0 %v1756_v33, %s4917_s19  ;;  %v1758_v27 = vsub.f32 %v5657_v32, %v4679_v40 }
 0xd70   :  { %v4681_v10 = vpop.eup %4680  ;;  %4690 = vtanh.f32 %v1747_v49 }
 0xd71   :  { %1776 = vrot.lane.b32.xlu1 %v1758_v27, %s4917_s19  ;;  %v1757_v18 = vsub.f32 %v5660_v52, %v4681_v10 }
 0xd72   :  { %v4683_v34 = vpop.eup %4682 }
 0xd73   :  { %1774 = vrot.lane.b32.xlu0 %v1757_v18, %s4917_s19  ;;  %v1759_v37 = vsub.f32 %v5667_v38, %v4683_v34 }
 0xd74   :  { %v4685_v62 = vpop.eup %4684 }
 0xd75   :  { %1778 = vrot.lane.b32.xlu1 %v1759_v37, %s4917_s19  ;;  %v1760_v1 = vsub.f32 %v5674_v28, %v4685_v62 }
 0xd76   :  { %v4687_v0 = vpop.eup %4686 }
 0xd77   :  { %1780 = vrot.lane.b32.xlu0 %v1760_v1, %s4917_s19  ;;  %v1761_v2 = vsub.f32 %v5679_v55, %v4687_v0 }
 0xd78   :  { %v4689_v61 = vpop.eup %4688 }
 0xd79   :  { %1782 = vrot.lane.b32.xlu1 %v1761_v2, %s4917_s19  ;;  %v1762_v47 = vsub.f32 %v5684_v29, %v4689_v61 }
 0xd7a   :  { %v4691_v22 = vpop.eup %4690 }
 0xd7b   :  { %1784 = vrot.lane.b32.xlu0 %v1762_v47, %s4917_s19  ;;  %v1763_v17 = vsub.f32 %v5689_v9, %v4691_v22 }
 0xd7d   :  { %1786 = vrot.lane.b32.xlu1 %v1763_v17, %s4917_s19 }
 0xde1   :  { %v1773_v41 = vpop.permute.xlu0 %1772 }
 0xde2   :  { %v1796_v31 = vmul.f32 %v5760_v14, %v1773_v41 }
 0xde3   :  { %v1777_v33 = vpop.permute.xlu1 %1776 }
 0xde4   :  { %v1798_v49 = vmul.f32 %v5763_v35, %v1777_v33  ;;  %1812 = vrot.lane.b32.xlu0 %v1796_v31, %s4918_s1 }
 0xde5   :  { %v1775_v27 = vpop.permute.xlu0 %1774 }
 0xde6   :  { %v1797_v18 = vmul.f32 %v5767_v51, %v1775_v27  ;;  %1816 = vrot.lane.b32.xlu1 %v1798_v49, %s4918_s1 }
 0xde7   :  { %v1779_v37 = vpop.permute.xlu1 %1778 }
 0xde8   :  { %v1799_v1 = vmul.f32 %v5771_v5, %v1779_v37  ;;  %1814 = vrot.lane.b32.xlu0 %v1797_v18, %s4918_s1 }
 0xde9   :  { %v1781_v2 = vpop.permute.xlu0 %1780 }
 0xdea   :  { %v1800_v47 = vmul.f32 %v5775_v42, %v1781_v2  ;;  %1818 = vrot.lane.b32.xlu1 %v1799_v1, %s4918_s1 }
 0xdeb   :  { %v1783_v14 = vpop.permute.xlu1 %1782 }
 0xdec   :  { %v1801_v35 = vmul.f32 %v5779_v16, %v1783_v14  ;;  %1820 = vrot.lane.b32.xlu0 %v1800_v47, %s4918_s1 }
 0xded   :  { %v1785_v17 = vpop.permute.xlu0 %1784 }
 0xdee   :  { %v1802_v51 = vmul.f32 %v5783_v45, %v1785_v17  ;;  %1822 = vrot.lane.b32.xlu1 %v1801_v35, %s4918_s1 }
 0xdef   :  { %v1787_v41 = vpop.permute.xlu1 %1786 }
 0xdf0   :  { %v1803_v5 = vmul.f32 %v5787_v46, %v1787_v41  ;;  %1824 = vrot.lane.b32.xlu0 %v1802_v51, %s4918_s1 }
 0xdf2   :  { %1826 = vrot.lane.b32.xlu1 %v1803_v5, %s4918_s1 }
 0xe56   :  { %v1813_v42 = vpop.permute.xlu0 %1812 }
 0xe57   :  { %v5832_v31 = vadd.f32 %v4677_v19, %v1813_v42 }
 0xe58   :  { %v1817_v33 = vpop.permute.xlu1 %1816 }
 0xe59   :  { %v1844_v16 = vsub.f32 %v5832_v31, %v5663_v11  ;;  %v5836_v49 = vadd.f32 %v4679_v40, %v1817_v33 }
 0xe5a   :  { %v1815_v27 = vpop.permute.xlu0 %1814 }
 0xe5b   :  { %v1860_v45 = vrot.slane %v1844_v16, 5  ;;  %v1846_v18 = vsub.f32 %v5836_v49, %v5657_v32  ;;  %v5840_v37 = vadd.f32 %v4681_v10, %v1815_v27 }
 0xe5c   :  { %v1819_v46 = vpop.permute.xlu1 %1818 }
 0xe5d   :  { %v1862_v1 = vrot.slane %v1846_v18, 5  ;;  %v1845_v2 = vsub.f32 %v5840_v37, %v5660_v52  ;;  %v5844_v19 = vadd.f32 %v4683_v34, %v1819_v46  ;;  %1868 = vrot.lane.b32.xlu0 %v1860_v45, %s4914_s27 }
 0xe5e   :  { %v1821_v47 = vpop.permute.xlu0 %1820 }
 0xe5f   :  { %7180 = vst [vmem:[#allocation14_spill] sm:$0xff] %v5844_v19  ;;  %v1861_v14 = vrot.slane %v1845_v2, 5  ;;  %v1847_v40 = vsub.f32 %v5844_v19, %v5667_v38  ;;  %v5849_v35 = vadd.f32 %v4685_v62, %v1821_v47  ;;  %1872 = vrot.lane.b32.xlu1 %v1862_v1, %s4914_s27 }
 0xe60   :  { %v1823_v10 = vpop.permute.xlu1 %1822 }
 0xe61   :  { %7181 = vst [vmem:[#allocation15_spill] sm:$0xff] %v5849_v35  ;;  %v1863_v17 = vrot.slane %v1847_v40, 5  ;;  %v1848_v51 = vsub.f32 %v5849_v35, %v5674_v28  ;;  %v5854_v41 = vadd.f32 %v4687_v0, %v1823_v10  ;;  %1870 = vrot.lane.b32.xlu0 %v1861_v14, %s4914_s27 }
 0xe62   :  { %v1825_v34 = vpop.permute.xlu0 %1824 }
 0xe63   :  { %7182 = vst [vmem:[#allocation16_spill] sm:$0xff] %v5854_v41  ;;  %v1864_v5 = vrot.slane %v1848_v51, 5  ;;  %v1849_v42 = vsub.f32 %v5854_v41, %v5679_v55  ;;  %v5859_v33 = vadd.f32 %v4689_v61, %v1825_v34  ;;  %1874 = vrot.lane.b32.xlu1 %v1863_v17, %s4914_s27 }
 0xe64   :  { %v1827_v62 = vpop.permute.xlu1 %1826 }
 0xe65   :  { %7183 = vst [vmem:[#allocation17_spill] sm:$0xff] %v5859_v33  ;;  %v1865_v16 = vrot.slane %v1849_v42, 5  ;;  %v1850_v27 = vsub.f32 %v5859_v33, %v5684_v29  ;;  %v5864_v45 = vadd.f32 %v4691_v22, %v1827_v62  ;;  %1876 = vrot.lane.b32.xlu0 %v1864_v5, %s4914_s27 }
 0xe67   :  { %7184 = vst [vmem:[#allocation18_spill] sm:$0xff] %v5864_v45  ;;  %v1866_v0 = vrot.slane %v1850_v27, 5  ;;  %v1851_v18 = vsub.f32 %v5864_v45, %v5689_v9  ;;  %1878 = vrot.lane.b32.xlu1 %v1865_v16, %s4914_s27 }
 0xe69   :  { %v1867_v46 = vrot.slane %v1851_v18, 5  ;;  %1880 = vrot.lane.b32.xlu0 %v1866_v0, %s4914_s27 }
 0xe6b   :  { %1882 = vrot.lane.b32.xlu1 %v1867_v46, %s4914_s27 }
 0xecf   :  { %v1869_v61 = vpop.permute.xlu0 %1868 }
 0xed0   :  { %v1892_v1 = vmul.f32 %v5165_v15, %v1869_v61 }
 0xed1   :  { %v1873_v2 = vpop.permute.xlu1 %1872 }
 0xed2   :  { %v1908_v47 = vrot.slane %v1892_v1, 3  ;;  %v1894_v22 = vmul.f32 %v5157_v13, %v1873_v2 }
 0xed3   :  { %v1871_v14 = vpop.permute.xlu0 %1870 }
 0xed4   :  { %v1910_v40 = vrot.slane %v1894_v22, 3  ;;  %v1893_v10 = vmul.f32 %v5148_v26, %v1871_v14  ;;  %1916 = vrot.lane.b32.xlu0 %v1908_v47, %s4914_s27 }
 0xed5   :  { %v1875_v17 = vpop.permute.xlu1 %1874 }
 0xed6   :  { %v1909_v51 = vrot.slane %v1893_v10, 3  ;;  %v1895_v34 = vmul.f32 %v5173_v24, %v1875_v17  ;;  %1920 = vrot.lane.b32.xlu1 %v1910_v40, %s4914_s27 }
 0xed7   :  { %v1877_v5 = vpop.permute.xlu0 %1876 }
 0xed8   :  { %v1911_v42 = vrot.slane %v1895_v34, 3  ;;  %v1896_v62 = vmul.f32 %v5178_v30, %v1877_v5  ;;  %1918 = vrot.lane.b32.xlu0 %v1909_v51, %s4914_s27 }
 0xed9   :  { %v1879_v16 = vpop.permute.xlu1 %1878 }
 0xeda   :  { %v1912_v27 = vrot.slane %v1896_v62, 3  ;;  %v1897_v0 = vmul.f32 %v5193_v39, %v1879_v16  ;;  %1922 = vrot.lane.b32.xlu1 %v1911_v42, %s4914_s27 }
 0xedb   :  { %v1881_v18 = vpop.permute.xlu0 %1880 }
 0xedc   :  { %v1913_v46 = vrot.slane %v1897_v0, 3  ;;  %v1898_v61 = vmul.f32 %v5199_v43, %v1881_v18  ;;  %1924 = vrot.lane.b32.xlu0 %v1912_v27, %s4914_s27 }
 0xedd   :  { %v1883_v1 = vpop.permute.xlu1 %1882 }
 0xede   :  { %v1914_v2 = vrot.slane %v1898_v61, 3  ;;  %v1899_v47 = vmul.f32 %v5212_v48, %v1883_v1  ;;  %1926 = vrot.lane.b32.xlu1 %v1913_v46, %s4914_s27 }
 0xee0   :  { %v1915_v22 = vrot.slane %v1899_v47, 3  ;;  %1928 = vrot.lane.b32.xlu0 %v1914_v2, %s4914_s27 }
 0xee2   :  { %1930 = vrot.lane.b32.xlu1 %v1915_v22, %s4914_s27 }
 0xf46   :  { %v1917_v14 = vpop.permute.xlu0 %1916 }
 0xf47   :  { %v5895_v5 = vadd.f32 %v1917_v14, %v5663_v11 }
 0xf48   :  { %v1921_v40 = vpop.permute.xlu1 %1920 }
 0xf49   :  { %v5889_v10 = vadd.f32 %v1921_v40, %v5657_v32 }
 0xf4a   :  { %v1919_v17 = vpop.permute.xlu0 %1918 }
 0xf4b   :  { %v5892_v51 = vadd.f32 %v1919_v17, %v5660_v52  ;;  %v2014_v16 = vrot.slane %v5889_v10, 6 }
 0xf4c   :  { %v1923_v34 = vpop.permute.xlu1 %1922 }
 0xf4d   :  { %v2012_v42 = vrot.slane %v5892_v51, 7  ;;  %v5899_v62 = vadd.f32 %v1923_v34, %v5667_v38 }
 0xf4e   :  { %v1925_v27 = vpop.permute.xlu0 %1924 }
 0xf4f   :  { %v2013_v32 = vsel %vm518_vm6, %v2012_v42, %v5895_v5  ;;  %v2016_v0 = vrot.slane %v5899_v62, 5  ;;  %v5906_v52 = vadd.f32 %v1925_v27, %v5674_v28 }
 0xf50   :  { %v1927_v18 = vpop.permute.xlu1 %1926  ;;  %v2015_v11 = vsel %vm521_vm7, %v2014_v16, %v2013_v32  ;;  %v5937_v16 = vld [vmem:[%s7136_s3] ss:$0 sm:$0xff] }
 0xf51   :  { %v2018_v46 = vrot.slane %v5906_v52, 4  ;;  %v5911_v61 = vadd.f32 %v1927_v18, %v5679_v55  ;;  %v2017_v38 = vsel %vm524_vm10, %v2016_v0, %v2015_v11 }
 0xf52   :  { %v1929_v1 = vpop.permute.xlu0 %1928 }
 0xf53   :  { %v2020_v2 = vrot.slane %v5911_v61, 3  ;;  %v5916_v47 = vadd.f32 %v1929_v1, %v5684_v29  ;;  %v2019_v22 = vsel %vm527_vm11, %v2018_v46, %v2017_v38 }
 0xf54   :  { %v1931_v28 = vpop.permute.xlu1 %1930 }
 0xf55   :  { %v2022_v14 = vrot.slane %v5916_v47, 2  ;;  %v5921_v40 = vadd.f32 %v1931_v28, %v5689_v9  ;;  %v2021_v17 = vsel %vm530_vm13, %v2020_v2, %v2019_v22  ;;  %v5951_v22 = vld [vmem:[%s7133_s0 + $0x4] sm:$0x1]  ;;  %v5956_v28 = vld [vmem:[%s7133_s0 + $0x14] sm:$0x1] }
 0xf57   :  { %v2023_v55 = vsel %vm533_vm14, %v2022_v14, %v2021_v17  ;;  %v2024_v34 = vrot.slane %v5921_v40, 1  ;;  %v5962_v17 = vld [vmem:[%s7133_s0 + $0xc] sm:$0x1] }
 0xf59   :  { %v2025_v42 = vsel %vm536_vm15, %v2024_v34, %v2023_v55  ;;  %v5968_v34 = vld [vmem:[%s7133_s0 + $0x1c] sm:$0x1] }
 0xf5a   :  { %2026 = vrot.lane.b32.xlu0 %v2025_v42, %s4914_s27 }
 0xfcc   :  { %v2027_v29 = vpop.permute.xlu0 %2026 }
 0xfcd   :  { %4405 = vmatmul.mubr.msk.f32.vlgmr.msra.gmra.mrb[4].mxu0 %vm171_vm1, %v2027_v29 }
 0xfce   :  { %4478 = vmatpush3.bf16.msra.mxu0 %v4960_v4  ;;  %4426 = vmatprep.mubr.msk.f32.mxu0 %vm4912_vm0, %v7140_v6 }
 0xfcf   :  { %4479 = vmatprep.subr.bf16.mxu0 %v7139_v3 }
 0xfd2   :  { %4481 = vmatpush3.bf16.msra.mxu0 %v4971_v7 }
0x10a0   :  { %v2096_v9 = vpop.f32.mrb[4].mxu0 }
0x10a1   :  { %v2097_v27 = vadd.f32 %v5937_v16, %v2096_v9  ;;  %v4406_v32 = vpop.f32.mrb[5].mxu0  ;;  %v5974_v9 = vld [vmem:[%s7133_s0 + $0x24] sm:$0x1] }
0x10a3   :  { %2172 = vrot.lane.b32.xlu1 %v2097_v27, %s4914_s27  ;;  %v2102_v0 = vrot.slane %v2097_v27, 2  ;;  %v2101_v18 = vrot.slane %v2097_v27, 1  ;;  %v2103_v11 = vrot.slane %v2097_v27, 3  ;;  %v2104_v46 = vrot.slane %v2097_v27, 4 }
0x10a4   :  { %v2105_v38 = vrot.slane %v2097_v27, 5  ;;  %v2106_v1 = vrot.slane %v2097_v27, 6  ;;  %v2107_v2 = vrot.slane %v2097_v27, 7  ;;  %v2116_v14 = vadd.f32 %v2097_v27, %v5951_v22 }
0x10a5   :  { %2176 = vrot.lane.b32.xlu0 %v2102_v0, %s4914_s27  ;;  %v2118_v55 = vadd.f32 %v2102_v0, %v5956_v28  ;;  %v2117_v42 = vadd.f32 %v2101_v18, %v5962_v17  ;;  %v2119_v32 = vadd.f32 %v2103_v11, %v5968_v34  ;;  %v5980_v0 = vld [vmem:[%s7133_s0 + $0x2c] sm:$0x1]  ;;  %v2120_v6 = vadd.f32 %v2104_v46, %v5974_v9 }
0x10a6   :  { %v4277_v29 = vmul.f32 -1.442695, %v2116_v14 }
0x10a7   :  { %2174 = vrot.lane.b32.xlu1 %v2101_v18, %s4914_s27  ;;  %v4279_v27 = vmul.f32 -1.442695, %v2118_v55  ;;  %v4278_v3 = vmul.f32 -1.442695, %v2117_v42  ;;  %v5986_v18 = vld [vmem:[%s7133_s0 + $0x34] sm:$0x1]  ;;  %v2121_v55 = vadd.f32 %v2105_v38, %v5980_v0 }
0x10a8   :  { %4692 = vpow2.f32 %v4277_v29  ;;  %v4280_v14 = vmul.f32 -1.442695, %v2119_v32  ;;  %v4281_v56 = vmul.f32 -1.442695, %v2120_v6  ;;  %v2122_v42 = vadd.f32 %v2106_v1, %v5986_v18 }
0x10a9   :  { %2178 = vrot.lane.b32.xlu0 %v2103_v11, %s4914_s27  ;;  %4694 = vpow2.f32 %v4279_v27  ;;  %v5992_v11 = vld [vmem:[%s7133_s0 + $0x3c] sm:$0x1] }
0x10aa   :  { %4696 = vpow2.f32 %v4278_v3  ;;  %v2123_v29 = vadd.f32 %v2107_v2, %v5992_v11  ;;  %v4283_v45 = vmul.f32 -1.442695, %v2122_v42 }
0x10ab   :  { %2180 = vrot.lane.b32.xlu1 %v2104_v46, %s4914_s27  ;;  %4698 = vpow2.f32 %v4280_v14  ;;  %v4282_v46 = vmul.f32 -1.442695, %v2121_v55 }
0x10ac   :  { %4700 = vpow2.f32 %v4281_v56  ;;  %v4284_v27 = vmul.f32 -1.442695, %v2123_v29 }
0x10ad   :  { %2182 = vrot.lane.b32.xlu0 %v2105_v38, %s4914_s27  ;;  %4702 = vpow2.f32 %v4282_v46 }
0x10ae   :  { %4704 = vpow2.f32 %v4283_v45 }
0x10af   :  { %2184 = vrot.lane.b32.xlu1 %v2106_v1, %s4914_s27  ;;  %4706 = vpow2.f32 %v4284_v27 }
0x10b1   :  { %2186 = vrot.lane.b32.xlu0 %v2107_v2, %s4914_s27 }
0x10b2   :  { %v4693_v33 = vpop.eup %4692 }
0x10b3   :  { %v4695_v32 = vpop.eup %4694  ;;  %v2148_v38 = vadd.f32 1.0, %v4693_v33 }
0x10b4   :  { %v4697_v44 = vpop.eup %4696  ;;  %v2150_v41 = vadd.f32 1.0, %v4695_v32 }
0x10b5   :  { %v4699_v19 = vpop.eup %4698  ;;  %4708 = vrcp.f32 %v2148_v38  ;;  %v2149_v3 = vadd.f32 1.0, %v4697_v44 }
0x10b6   :  { %v4701_v6 = vpop.eup %4700  ;;  %4710 = vrcp.f32 %v2150_v41  ;;  %v2151_v1 = vadd.f32 1.0, %v4699_v19 }
0x10b7   :  { %v4703_v14 = vpop.eup %4702  ;;  %4712 = vrcp.f32 %v2149_v3  ;;  %v2152_v2 = vadd.f32 1.0, %v4701_v6 }
0x10b8   :  { %v4705_v56 = vpop.eup %4704  ;;  %4714 = vrcp.f32 %v2151_v1  ;;  %v2153_v55 = vadd.f32 1.0, %v4703_v14 }
0x10b9   :  { %v4707_v42 = vpop.eup %4706  ;;  %4716 = vrcp.f32 %v2152_v2  ;;  %v2154_v46 = vadd.f32 1.0, %v4705_v56 }
0x10ba   :  { %4718 = vrcp.f32 %v2153_v55  ;;  %v2155_v29 = vadd.f32 1.0, %v4707_v42 }
0x10bb   :  { %4720 = vrcp.f32 %v2154_v46 }
0x10bc   :  { %4722 = vrcp.f32 %v2155_v29 }
0x10bf   :  { %v5996_v45 = vpop.eup %4708 }
0x10c0   :  { %v5999_v44 = vpop.eup %4710 }
0x10c1   :  { %v6003_v32 = vpop.eup %4712 }
0x10c2   :  { %v6007_v6 = vpop.eup %4714 }
0x10c3   :  { %v6011_v2 = vpop.eup %4716 }
0x10c4   :  { %v6015_v42 = vpop.eup %4718 }
0x10c5   :  { %v6019_v29 = vpop.eup %4720 }
0x1115   :  { %v2173_v33 = vpop.permute.xlu1 %2172 }
0x1116   :  { %v2196_v27 = vmul.f32 %v5996_v45, %v2173_v33 }
0x1117   :  { %v2177_v41 = vpop.permute.xlu0 %2176 }
0x1118   :  { %v2198_v19 = vmul.f32 %v5999_v44, %v2177_v41  ;;  %2212 = vrot.lane.b32.xlu1 %v2196_v27, %s4914_s27 }
0x1119   :  { %v2175_v38 = vpop.permute.xlu1 %2174 }
0x111a   :  { %v2197_v3 = vmul.f32 %v6003_v32, %v2175_v38  ;;  %2216 = vrot.lane.b32.xlu0 %v2198_v19, %s4914_s27  ;;  %v6023_v19 = vpop.eup %4722 }
0x111b   :  { %v2179_v1 = vpop.permute.xlu0 %2178 }
0x111c   :  { %v2199_v14 = vmul.f32 %v6007_v6, %v2179_v1  ;;  %2214 = vrot.lane.b32.xlu1 %v2197_v3, %s4914_s27 }
0x111d   :  { %v2181_v56 = vpop.permute.xlu1 %2180 }
0x111e   :  { %v2200_v55 = vmul.f32 %v6011_v2, %v2181_v56  ;;  %2218 = vrot.lane.b32.xlu0 %v2199_v14, %s4914_s27 }
0x111f   :  { %v2183_v46 = vpop.permute.xlu0 %2182 }
0x1120   :  { %v2201_v33 = vmul.f32 %v6015_v42, %v2183_v46  ;;  %2220 = vrot.lane.b32.xlu1 %v2200_v55, %s4914_s27 }
0x1121   :  { %v2185_v27 = vpop.permute.xlu1 %2184 }
0x1122   :  { %v2202_v41 = vmul.f32 %v6019_v29, %v2185_v27  ;;  %2222 = vrot.lane.b32.xlu0 %v2201_v33, %s4914_s27 }
0x1123   :  { %v2187_v38 = vpop.permute.xlu0 %2186 }
0x1124   :  { %v2203_v3 = vmul.f32 %v6023_v19, %v2187_v38  ;;  %2224 = vrot.lane.b32.xlu1 %v2202_v41, %s4914_s27 }
0x1126   :  { %2226 = vrot.lane.b32.xlu0 %v2203_v3, %s4914_s27 }
0x118a   :  { %v2213_v1 = vpop.permute.xlu1 %2212 }
0x118b   :  { %v2236_v14 = vadd.f32 %v2213_v1, %v5951_v22 }
0x118c   :  { %v2217_v56 = vpop.permute.xlu0 %2216 }
0x118d   :  { %4724 = vtanh.f32 %v2236_v14  ;;  %v2238_v55 = vadd.f32 %v2217_v56, %v5956_v28 }
0x118e   :  { %v2215_v46 = vpop.permute.xlu1 %2214 }
0x118f   :  { %4726 = vtanh.f32 %v2238_v55  ;;  %v2237_v33 = vadd.f32 %v2215_v46, %v5962_v17 }
0x1190   :  { %v2219_v27 = vpop.permute.xlu0 %2218 }
0x1191   :  { %4728 = vtanh.f32 %v2237_v33  ;;  %v2239_v25 = vadd.f32 %v2219_v27, %v5968_v34 }
0x1192   :  { %v2221_v38 = vpop.permute.xlu1 %2220 }
0x1193   :  { %4730 = vtanh.f32 %v2239_v25  ;;  %v2240_v41 = vadd.f32 %v2221_v38, %v5974_v9 }
0x1194   :  { %v2223_v3 = vpop.permute.xlu0 %2222 }
0x1195   :  { %4732 = vtanh.f32 %v2240_v41  ;;  %v2241_v22 = vadd.f32 %v2223_v3, %v5980_v0 }
0x1196   :  { %v2225_v1 = vpop.permute.xlu1 %2224 }
0x1197   :  { %v4725_v14 = vpop.eup %4724  ;;  %4734 = vtanh.f32 %v2241_v22  ;;  %v2242_v28 = vadd.f32 %v2225_v1, %v5986_v18 }
0x1198   :  { %v2227_v56 = vpop.permute.xlu0 %2226  ;;  %v2252_v17 = vsub.f32 %v5895_v5, %v4725_v14 }
0x1199   :  { %v4727_v55 = vpop.eup %4726  ;;  %4736 = vtanh.f32 %v2242_v28  ;;  %v2243_v34 = vadd.f32 %v2227_v56, %v5992_v11 }
0x119a   :  { %2268 = vrot.lane.b32.xlu1 %v2252_v17, %s4917_s19  ;;  %v2254_v25 = vsub.f32 %v5889_v10, %v4727_v55 }
0x119b   :  { %v4729_v9 = vpop.eup %4728  ;;  %4738 = vtanh.f32 %v2243_v34 }
0x119c   :  { %2272 = vrot.lane.b32.xlu0 %v2254_v25, %s4917_s19  ;;  %v2253_v0 = vsub.f32 %v5892_v51, %v4729_v9 }
0x119d   :  { %v4731_v46 = vpop.eup %4730 }
0x119e   :  { %2270 = vrot.lane.b32.xlu1 %v2253_v0, %s4917_s19  ;;  %v2255_v18 = vsub.f32 %v5899_v62, %v4731_v46 }
0x119f   :  { %v4733_v33 = vpop.eup %4732 }
0x11a0   :  { %2274 = vrot.lane.b32.xlu0 %v2255_v18, %s4917_s19  ;;  %v2256_v11 = vsub.f32 %v5906_v52, %v4733_v33 }
0x11a1   :  { %v4735_v27 = vpop.eup %4734 }
0x11a2   :  { %2276 = vrot.lane.b32.xlu1 %v2256_v11, %s4917_s19  ;;  %v2257_v38 = vsub.f32 %v5911_v61, %v4735_v27 }
0x11a3   :  { %v4737_v41 = vpop.eup %4736 }
0x11a4   :  { %2278 = vrot.lane.b32.xlu0 %v2257_v38, %s4917_s19  ;;  %v2258_v3 = vsub.f32 %v5916_v47, %v4737_v41 }
0x11a5   :  { %v4739_v22 = vpop.eup %4738 }
0x11a6   :  { %2280 = vrot.lane.b32.xlu1 %v2258_v3, %s4917_s19  ;;  %v2259_v1 = vsub.f32 %v5921_v40, %v4739_v22 }
0x11a8   :  { %2282 = vrot.lane.b32.xlu0 %v2259_v1, %s4917_s19 }
0x120c   :  { %v2269_v28 = vpop.permute.xlu1 %2268 }
0x120d   :  { %v2292_v56 = vmul.f32 %v5996_v45, %v2269_v28 }
0x120e   :  { %v2273_v17 = vpop.permute.xlu0 %2272 }
0x120f   :  { %v2294_v34 = vmul.f32 %v5999_v44, %v2273_v17  ;;  %2308 = vrot.lane.b32.xlu1 %v2292_v56, %s4918_s1 }
0x1210   :  { %v2271_v25 = vpop.permute.xlu1 %2270 }
0x1211   :  { %v2293_v0 = vmul.f32 %v6003_v32, %v2271_v25  ;;  %2312 = vrot.lane.b32.xlu0 %v2294_v34, %s4918_s1 }
0x1212   :  { %v2275_v18 = vpop.permute.xlu0 %2274 }
0x1213   :  { %v2295_v11 = vmul.f32 %v6007_v6, %v2275_v18  ;;  %2310 = vrot.lane.b32.xlu1 %v2293_v0, %s4918_s1 }
0x1214   :  { %v2277_v38 = vpop.permute.xlu1 %2276 }
0x1215   :  { %v2296_v3 = vmul.f32 %v6011_v2, %v2277_v38  ;;  %2314 = vrot.lane.b32.xlu0 %v2295_v11, %s4918_s1 }
0x1216   :  { %v2279_v45 = vpop.permute.xlu0 %2278 }
0x1217   :  { %v2297_v44 = vmul.f32 %v6015_v42, %v2279_v45  ;;  %2316 = vrot.lane.b32.xlu1 %v2296_v3, %s4918_s1 }
0x1218   :  { %v2281_v1 = vpop.permute.xlu1 %2280 }
0x1219   :  { %v2298_v32 = vmul.f32 %v6019_v29, %v2281_v1  ;;  %2318 = vrot.lane.b32.xlu0 %v2297_v44, %s4918_s1 }
0x121a   :  { %v2283_v28 = vpop.permute.xlu0 %2282 }
0x121b   :  { %v2299_v6 = vmul.f32 %v6023_v19, %v2283_v28  ;;  %2320 = vrot.lane.b32.xlu1 %v2298_v32, %s4918_s1 }
0x121d   :  { %2322 = vrot.lane.b32.xlu0 %v2299_v6, %s4918_s1 }
0x1281   :  { %v2309_v2 = vpop.permute.xlu1 %2308 }
0x1282   :  { %v6068_v56 = vadd.f32 %v4725_v14, %v2309_v2 }
0x1283   :  { %v2313_v17 = vpop.permute.xlu0 %2312 }
0x1284   :  { %7185 = vst [vmem:[#allocation19_spill] sm:$0xff] %v6068_v56  ;;  %v2340_v42 = vsub.f32 %v6068_v56, %v5895_v5  ;;  %v6072_v34 = vadd.f32 %v4727_v55, %v2313_v17 }
0x1285   :  { %v2311_v25 = vpop.permute.xlu1 %2310 }
0x1286   :  { %7186 = vst [vmem:[#allocation20_spill] sm:$0xff] %v6072_v34  ;;  %v2356_v29 = vrot.slane %v2340_v42, 4  ;;  %v2342_v0 = vsub.f32 %v6072_v34, %v5889_v10  ;;  %v6076_v18 = vadd.f32 %v4729_v9, %v2311_v25 }
0x1287   :  { %v2315_v19 = vpop.permute.xlu0 %2314 }
0x1288   :  { %7187 = vst [vmem:[#allocation21_spill] sm:$0xff] %v6076_v18  ;;  %v2358_v11 = vrot.slane %v2342_v0, 4  ;;  %v2341_v38 = vsub.f32 %v6076_v18, %v5892_v51  ;;  %v6080_v14 = vadd.f32 %v4731_v46, %v2315_v19  ;;  %2364 = vrot.lane.b32.xlu1 %v2356_v29, %s4914_s27 }
0x1289   :  { %v2317_v3 = vpop.permute.xlu1 %2316 }
0x128a   :  { %7188 = vst [vmem:[#allocation22_spill] sm:$0xff] %v6080_v14  ;;  %v2357_v45 = vrot.slane %v2341_v38, 4  ;;  %v2343_v55 = vsub.f32 %v6080_v14, %v5899_v62  ;;  %v6085_v44 = vadd.f32 %v4733_v33, %v2317_v3  ;;  %2368 = vrot.lane.b32.xlu0 %v2358_v11, %s4914_s27 }
0x128b   :  { %v2319_v9 = vpop.permute.xlu0 %2318 }
0x128c   :  { %7189 = vst [vmem:[#allocation23_spill] sm:$0xff] %v6085_v44  ;;  %v2359_v1 = vrot.slane %v2343_v55, 4  ;;  %v2344_v32 = vsub.f32 %v6085_v44, %v5906_v52  ;;  %v6090_v28 = vadd.f32 %v4735_v27, %v2319_v9  ;;  %2366 = vrot.lane.b32.xlu1 %v2357_v45, %s4914_s27 }
0x128d   :  { %v2321_v46 = vpop.permute.xlu1 %2320 }
0x128e   :  { %7190 = vst [vmem:[#allocation24_spill] sm:$0xff] %v6090_v28  ;;  %v2360_v6 = vrot.slane %v2344_v32, 4  ;;  %v2345_v2 = vsub.f32 %v6090_v28, %v5911_v61  ;;  %v6095_v17 = vadd.f32 %v4737_v41, %v2321_v46  ;;  %2370 = vrot.lane.b32.xlu0 %v2359_v1, %s4914_s27 }
0x128f   :  { %v2323_v33 = vpop.permute.xlu0 %2322 }
0x1290   :  { %7191 = vst [vmem:[#allocation25_spill] sm:$0xff] %v6095_v17  ;;  %v2361_v42 = vrot.slane %v2345_v2, 4  ;;  %v2346_v25 = vsub.f32 %v6095_v17, %v5916_v47  ;;  %v6100_v29 = vadd.f32 %v4739_v22, %v2323_v33  ;;  %2372 = vrot.lane.b32.xlu1 %v2360_v6, %s4914_s27 }
0x1292   :  { %7192 = vst [vmem:[#allocation26_spill] sm:$0xff] %v6100_v29  ;;  %v2362_v27 = vrot.slane %v2346_v25, 4  ;;  %v2347_v0 = vsub.f32 %v6100_v29, %v5921_v40  ;;  %2374 = vrot.lane.b32.xlu0 %v2361_v42, %s4914_s27 }
0x1294   :  { %v2363_v19 = vrot.slane %v2347_v0, 4  ;;  %2376 = vrot.lane.b32.xlu1 %v2362_v27, %s4914_s27 }
0x1296   :  { %2378 = vrot.lane.b32.xlu0 %v2363_v19, %s4914_s27 }
0x12fa   :  { %v2365_v41 = vpop.permute.xlu1 %2364 }
0x12fb   :  { %v2388_v11 = vmul.f32 %v5165_v15, %v2365_v41 }
0x12fc   :  { %v2369_v38 = vpop.permute.xlu0 %2368 }
0x12fd   :  { %v2404_v3 = vrot.slane %v2388_v11, 4  ;;  %v2390_v22 = vmul.f32 %v5157_v13, %v2369_v38 }
0x12fe   :  { %v2367_v45 = vpop.permute.xlu1 %2366 }
0x12ff   :  { %v2406_v55 = vrot.slane %v2390_v22, 4  ;;  %v2389_v9 = vmul.f32 %v5148_v26, %v2367_v45  ;;  %2412 = vrot.lane.b32.xlu1 %v2404_v3, %s4914_s27 }
0x1300   :  { %v2371_v1 = vpop.permute.xlu0 %2370 }
0x1301   :  { %v2405_v32 = vrot.slane %v2389_v9, 4  ;;  %v2391_v46 = vmul.f32 %v5173_v24, %v2371_v1  ;;  %2416 = vrot.lane.b32.xlu0 %v2406_v55, %s4914_s27 }
0x1302   :  { %v2373_v6 = vpop.permute.xlu1 %2372 }
0x1303   :  { %v2407_v2 = vrot.slane %v2391_v46, 4  ;;  %v2392_v33 = vmul.f32 %v5178_v30, %v2373_v6  ;;  %2414 = vrot.lane.b32.xlu1 %v2405_v32, %s4914_s27 }
0x1304   :  { %v2375_v42 = vpop.permute.xlu0 %2374 }
0x1305   :  { %v2408_v25 = vrot.slane %v2392_v33, 4  ;;  %v2393_v27 = vmul.f32 %v5193_v39, %v2375_v42  ;;  %2418 = vrot.lane.b32.xlu0 %v2407_v2, %s4914_s27 }
0x1306   :  { %v2377_v0 = vpop.permute.xlu1 %2376 }
0x1307   :  { %v2409_v19 = vrot.slane %v2393_v27, 4  ;;  %v2394_v41 = vmul.f32 %v5199_v43, %v2377_v0  ;;  %2420 = vrot.lane.b32.xlu1 %v2408_v25, %s4914_s27 }
0x1308   :  { %v2379_v11 = vpop.permute.xlu0 %2378 }
0x1309   :  { %v2410_v38 = vrot.slane %v2394_v41, 4  ;;  %v2395_v3 = vmul.f32 %v5212_v48, %v2379_v11  ;;  %2422 = vrot.lane.b32.xlu0 %v2409_v19, %s4914_s27 }
0x130b   :  { %v2411_v22 = vrot.slane %v2395_v3, 4  ;;  %2424 = vrot.lane.b32.xlu1 %v2410_v38, %s4914_s27 }
0x130d   :  { %2426 = vrot.lane.b32.xlu0 %v2411_v22, %s4914_s27 }
0x1371   :  { %v2413_v45 = vpop.permute.xlu1 %2412 }
0x1372   :  { %v6131_v6 = vadd.f32 %v2413_v45, %v5895_v5 }
0x1373   :  { %v2417_v55 = vpop.permute.xlu0 %2416 }
0x1374   :  { %v6125_v9 = vadd.f32 %v2417_v55, %v5889_v10 }
0x1375   :  { %v2415_v1 = vpop.permute.xlu1 %2414 }
0x1376   :  { %v6128_v32 = vadd.f32 %v2415_v1, %v5892_v51  ;;  %v2510_v42 = vrot.slane %v6125_v9, 6 }
0x1377   :  { %v2419_v46 = vpop.permute.xlu0 %2418 }
0x1378   :  { %v2508_v2 = vrot.slane %v6128_v32, 7  ;;  %v6135_v33 = vadd.f32 %v2419_v46, %v5899_v62 }
0x1379   :  { %v2421_v25 = vpop.permute.xlu1 %2420 }
0x137a   :  { %v2509_v10 = vsel %vm518_vm6, %v2508_v2, %v6131_v6  ;;  %v2512_v27 = vrot.slane %v6135_v33, 5  ;;  %v6142_v51 = vadd.f32 %v2421_v25, %v5906_v52 }
0x137b   :  { %v2423_v0 = vpop.permute.xlu0 %2422  ;;  %v2511_v5 = vsel %vm521_vm7, %v2510_v42, %v2509_v10  ;;  %v7193_v42 = vmov 0.0  }
0x137c   :  { %v2514_v19 = vrot.slane %v6142_v51, 4  ;;  %v6147_v41 = vadd.f32 %v2423_v0, %v5911_v61  ;;  %v2513_v62 = vsel %vm524_vm10, %v2512_v27, %v2511_v5 }
0x137d   :  { %v2425_v11 = vpop.permute.xlu1 %2424 }
0x137e   :  { %v2516_v38 = vrot.slane %v6147_v41, 3  ;;  %v6152_v3 = vadd.f32 %v2425_v11, %v5916_v47  ;;  %v2515_v22 = vsel %vm527_vm11, %v2514_v19, %v2513_v62  ;;  %v6182_v11 = vld [vmem:[%s7133_s0 + $0x5] sm:$0x1] }
0x137f   :  { %v2427_v52 = vpop.permute.xlu0 %2426 }
0x1380   :  { %v2518_v45 = vrot.slane %v6152_v3, 2  ;;  %v6157_v55 = vadd.f32 %v2427_v52, %v5921_v40  ;;  %v2517_v1 = vsel %vm530_vm13, %v2516_v38, %v2515_v22  ;;  %v7194_v40 = vmov 0.0|0.0   ;;  %v6187_v38 = vld [vmem:[%s7133_s0 + $0x15] sm:$0x1]  ;;  %v6193_v52 = vld [vmem:[%s7133_s0 + $0xd] sm:$0x1] }
0x1382   :  { %v2519_v61 = vsel %vm533_vm14, %v2518_v45, %v2517_v1  ;;  %v2520_v46 = vrot.slane %v6157_v55, 1  ;;  %v6199_v1 = vld [vmem:[%s7133_s0 + $0x1d] sm:$0x1] }
0x1384   :  { %v2521_v2 = vsel %vm536_vm15, %v2520_v46, %v2519_v61 }
0x1385   :  { %2522 = vrot.lane.b32.xlu1 %v2521_v2, %s4914_s27  ;;  %v6205_v2 = vld [vmem:[%s7133_s0 + $0x25] sm:$0x1] }
0x13f7   :  { %v2523_v47 = vpop.permute.xlu1 %2522 }
0x13f8   :  { %4416 = vmatmul.mubr.msk.f32.vlgmr.msra.gmra.mrb[4].mxu1 %vm171_vm1, %v2523_v47 }
0x13f9   :  { %4484 = vmatpush3.bf16.msra.mxu1 %v4960_v4  ;;  %4437 = vmatprep.mubr.msk.f32.mxu1 %vm4912_vm0, %v7193_v42  ;;  %vm4179_vm0 = vcmask 523264  }
0x13fa   :  { %4485 = vmatprep.subr.bf16.mxu1 %v7194_v40  ;;  %v6211_v40 = vld [vmem:[%s7133_s0 + $0x2d] sm:$0x1] }
0x13fd   :  { %4487 = vmatpush3.bf16.msra.mxu1 %v4971_v7 }
0x14cb   :  { %v2592_v25 = vpop.f32.mrb[4].mxu1 }
0x14cc   :  { %v2593_v10 = vadd.f32 %v5937_v16, %v2592_v25  ;;  %v4417_v27 = vpop.f32.mrb[5].mxu1 }
0x14cd   :  { %v6217_v27 = vld [vmem:[%s7133_s0 + $0x35] sm:$0x1] }
0x14ce   :  { %2668 = vrot.lane.b32.xlu0 %v2593_v10, %s4914_s27  ;;  %v2598_v0 = vrot.slane %v2593_v10, 2  ;;  %v2597_v5 = vrot.slane %v2593_v10, 1  ;;  %v2599_v4 = vrot.slane %v2593_v10, 3  ;;  %v2600_v19 = vrot.slane %v2593_v10, 4 }
0x14cf   :  { %v2601_v62 = vrot.slane %v2593_v10, 5  ;;  %v2602_v7 = vrot.slane %v2593_v10, 6  ;;  %v2603_v16 = vrot.slane %v2593_v10, 7  ;;  %v2612_v22 = vadd.f32 %v2593_v10, %v6182_v11 }
0x14d0   :  { %2672 = vrot.lane.b32.xlu1 %v2598_v0, %s4914_s27  ;;  %v2614_v45 = vadd.f32 %v2598_v0, %v6187_v38  ;;  %v2613_v61 = vadd.f32 %v2597_v5, %v6193_v52  ;;  %v2615_v42 = vadd.f32 %v2599_v4, %v6199_v1  ;;  %v2616_v10 = vadd.f32 %v2600_v19, %v6205_v2 }
0x14d1   :  { %v4286_v46 = vmul.f32 -1.442695, %v2612_v22 }
0x14d2   :  { %2670 = vrot.lane.b32.xlu0 %v2597_v5, %s4914_s27  ;;  %v4288_v47 = vmul.f32 -1.442695, %v2614_v45  ;;  %v4287_v25 = vmul.f32 -1.442695, %v2613_v61  ;;  %v4289_v0 = vmul.f32 -1.442695, %v2615_v42  ;;  %v2617_v5 = vadd.f32 %v2601_v62, %v6211_v40 }
0x14d3   :  { %4740 = vpow2.f32 %v4286_v46  ;;  %v4290_v22 = vmul.f32 -1.442695, %v2616_v10  ;;  %v2618_v45 = vadd.f32 %v2602_v7, %v6217_v27 }
0x14d4   :  { %2674 = vrot.lane.b32.xlu1 %v2599_v4, %s4914_s27  ;;  %4742 = vpow2.f32 %v4288_v47  ;;  %v6223_v4 = vld [vmem:[%s7133_s0 + $0x3d] sm:$0x1] }
0x14d5   :  { %4744 = vpow2.f32 %v4287_v25  ;;  %v2619_v61 = vadd.f32 %v2603_v16, %v6223_v4  ;;  %v4292_v46 = vmul.f32 -1.442695, %v2618_v45 }
0x14d6   :  { %2676 = vrot.lane.b32.xlu0 %v2600_v19, %s4914_s27  ;;  %4746 = vpow2.f32 %v4289_v0  ;;  %v4291_v19 = vmul.f32 -1.442695, %v2617_v5 }
0x14d7   :  { %4748 = vpow2.f32 %v4290_v22  ;;  %v4293_v47 = vmul.f32 -1.442695, %v2619_v61 }
0x14d8   :  { %2678 = vrot.lane.b32.xlu1 %v2601_v62, %s4914_s27  ;;  %4750 = vpow2.f32 %v4291_v19 }
0x14d9   :  { %4752 = vpow2.f32 %v4292_v46 }
0x14da   :  { %2680 = vrot.lane.b32.xlu0 %v2602_v7, %s4914_s27  ;;  %4754 = vpow2.f32 %v4293_v47 }
0x14dc   :  { %2682 = vrot.lane.b32.xlu1 %v2603_v16, %s4914_s27 }
0x14dd   :  { %v4741_v17 = vpop.eup %4740 }
0x14de   :  { %v4743_v42 = vpop.eup %4742  ;;  %v2644_v62 = vadd.f32 1.0, %v4741_v17 }
0x14df   :  { %v4745_v29 = vpop.eup %4744  ;;  %v2646_v28 = vadd.f32 1.0, %v4743_v42 }
0x14e0   :  { %v4747_v44 = vpop.eup %4746  ;;  %4756 = vrcp.f32 %v2644_v62  ;;  %v2645_v25 = vadd.f32 1.0, %v4745_v29 }
0x14e1   :  { %v4749_v10 = vpop.eup %4748  ;;  %4758 = vrcp.f32 %v2646_v28  ;;  %v2647_v7 = vadd.f32 1.0, %v4747_v44 }
0x14e2   :  { %v4751_v0 = vpop.eup %4750  ;;  %4760 = vrcp.f32 %v2645_v25  ;;  %v2648_v16 = vadd.f32 1.0, %v4749_v10 }
0x14e3   :  { %v4753_v5 = vpop.eup %4752  ;;  %4762 = vrcp.f32 %v2647_v7  ;;  %v2649_v22 = vadd.f32 1.0, %v4751_v0 }
0x14e4   :  { %v4755_v45 = vpop.eup %4754  ;;  %4764 = vrcp.f32 %v2648_v16  ;;  %v2650_v19 = vadd.f32 1.0, %v4753_v5 }
0x14e5   :  { %4766 = vrcp.f32 %v2649_v22  ;;  %v2651_v46 = vadd.f32 1.0, %v4755_v45 }
0x14e6   :  { %4768 = vrcp.f32 %v2650_v19 }
0x14e7   :  { %4770 = vrcp.f32 %v2651_v46 }
0x14ea   :  { %v6227_v61 = vpop.eup %4756 }
0x14eb   :  { %v6230_v29 = vpop.eup %4758 }
0x14ec   :  { %v6234_v42 = vpop.eup %4760 }
0x14ed   :  { %v6238_v10 = vpop.eup %4762 }
0x14ee   :  { %v6242_v16 = vpop.eup %4764 }
0x14ef   :  { %v6246_v45 = vpop.eup %4766 }
0x14f0   :  { %v6250_v46 = vpop.eup %4768 }
0x1540   :  { %v2669_v17 = vpop.permute.xlu0 %2668 }
0x1541   :  { %v2692_v47 = vmul.f32 %v6227_v61, %v2669_v17 }
0x1542   :  { %v2673_v28 = vpop.permute.xlu1 %2672 }
0x1543   :  { %v2694_v44 = vmul.f32 %v6230_v29, %v2673_v28  ;;  %2708 = vrot.lane.b32.xlu0 %v2692_v47, %s4914_s27 }
0x1544   :  { %v2671_v62 = vpop.permute.xlu0 %2670 }
0x1545   :  { %v2693_v25 = vmul.f32 %v6234_v42, %v2671_v62  ;;  %2712 = vrot.lane.b32.xlu1 %v2694_v44, %s4914_s27  ;;  %v6254_v44 = vpop.eup %4770 }
0x1546   :  { %v2675_v7 = vpop.permute.xlu1 %2674 }
0x1547   :  { %v2695_v0 = vmul.f32 %v6238_v10, %v2675_v7  ;;  %2710 = vrot.lane.b32.xlu0 %v2693_v25, %s4914_s27 }
0x1548   :  { %v2677_v5 = vpop.permute.xlu0 %2676 }
0x1549   :  { %v2696_v22 = vmul.f32 %v6242_v16, %v2677_v5  ;;  %2714 = vrot.lane.b32.xlu1 %v2695_v0, %s4914_s27 }
0x154a   :  { %v2679_v19 = vpop.permute.xlu1 %2678 }
0x154b   :  { %v2697_v17 = vmul.f32 %v6246_v45, %v2679_v19  ;;  %2716 = vrot.lane.b32.xlu0 %v2696_v22, %s4914_s27 }
0x154c   :  { %v2681_v47 = vpop.permute.xlu0 %2680 }
0x154d   :  { %v2698_v28 = vmul.f32 %v6250_v46, %v2681_v47  ;;  %2718 = vrot.lane.b32.xlu1 %v2697_v17, %s4914_s27 }
0x154e   :  { %v2683_v62 = vpop.permute.xlu1 %2682 }
0x154f   :  { %v2699_v25 = vmul.f32 %v6254_v44, %v2683_v62  ;;  %2720 = vrot.lane.b32.xlu0 %v2698_v28, %s4914_s27 }
0x1551   :  { %2722 = vrot.lane.b32.xlu1 %v2699_v25, %s4914_s27 }
0x15b5   :  { %v2709_v7 = vpop.permute.xlu0 %2708 }
0x15b6   :  { %v2732_v0 = vadd.f32 %v2709_v7, %v6182_v11 }
0x15b7   :  { %v2713_v5 = vpop.permute.xlu1 %2712 }
0x15b8   :  { %4772 = vtanh.f32 %v2732_v0  ;;  %v2734_v22 = vadd.f32 %v2713_v5, %v6187_v38 }
0x15b9   :  { %v2711_v19 = vpop.permute.xlu0 %2710 }
0x15ba   :  { %4774 = vtanh.f32 %v2734_v22  ;;  %v2733_v17 = vadd.f32 %v2711_v19, %v6193_v52 }
0x15bb   :  { %v2715_v47 = vpop.permute.xlu1 %2714 }
0x15bc   :  { %4776 = vtanh.f32 %v2733_v17  ;;  %v2735_v34 = vadd.f32 %v2715_v47, %v6199_v1 }
0x15bd   :  { %v2717_v62 = vpop.permute.xlu0 %2716 }
0x15be   :  { %4778 = vtanh.f32 %v2735_v34  ;;  %v2736_v28 = vadd.f32 %v2717_v62, %v6205_v2 }
0x15bf   :  { %v2719_v25 = vpop.permute.xlu1 %2718 }
0x15c0   :  { %4780 = vtanh.f32 %v2736_v28  ;;  %v2737_v11 = vadd.f32 %v2719_v25, %v6211_v40 }
0x15c1   :  { %v2721_v7 = vpop.permute.xlu0 %2720 }
0x15c2   :  { %v4773_v0 = vpop.eup %4772  ;;  %4782 = vtanh.f32 %v2737_v11  ;;  %v2738_v38 = vadd.f32 %v2721_v7, %v6217_v27 }
0x15c3   :  { %v2723_v5 = vpop.permute.xlu1 %2722  ;;  %v2748_v52 = vsub.f32 %v6131_v6, %v4773_v0 }
0x15c4   :  { %v4775_v22 = vpop.eup %4774  ;;  %4784 = vtanh.f32 %v2738_v38  ;;  %v2739_v1 = vadd.f32 %v2723_v5, %v6223_v4 }
0x15c5   :  { %2764 = vrot.lane.b32.xlu0 %v2748_v52, %s4917_s19  ;;  %v2750_v34 = vsub.f32 %v6125_v9, %v4775_v22 }
0x15c6   :  { %v4777_v2 = vpop.eup %4776  ;;  %4786 = vtanh.f32 %v2739_v1 }
0x15c7   :  { %2768 = vrot.lane.b32.xlu1 %v2750_v34, %s4917_s19  ;;  %v2749_v40 = vsub.f32 %v6128_v32, %v4777_v2 }
0x15c8   :  { %v4779_v19 = vpop.eup %4778 }
0x15c9   :  { %2766 = vrot.lane.b32.xlu0 %v2749_v40, %s4917_s19  ;;  %v2751_v27 = vsub.f32 %v6135_v33, %v4779_v19 }
0x15ca   :  { %v4781_v17 = vpop.eup %4780 }
0x15cb   :  { %2770 = vrot.lane.b32.xlu1 %v2751_v27, %s4917_s19  ;;  %v2752_v4 = vsub.f32 %v6142_v51, %v4781_v17 }
0x15cc   :  { %v4783_v47 = vpop.eup %4782 }
0x15cd   :  { %2772 = vrot.lane.b32.xlu0 %v2752_v4, %s4917_s19  ;;  %v2753_v62 = vsub.f32 %v6147_v41, %v4783_v47 }
0x15ce   :  { %v4785_v28 = vpop.eup %4784 }
0x15cf   :  { %2774 = vrot.lane.b32.xlu1 %v2753_v62, %s4917_s19  ;;  %v2754_v25 = vsub.f32 %v6152_v3, %v4785_v28 }
0x15d0   :  { %v4787_v11 = vpop.eup %4786 }
0x15d1   :  { %2776 = vrot.lane.b32.xlu0 %v2754_v25, %s4917_s19  ;;  %v2755_v7 = vsub.f32 %v6157_v55, %v4787_v11 }
0x15d3   :  { %2778 = vrot.lane.b32.xlu1 %v2755_v7, %s4917_s19 }
0x1637   :  { %v2765_v38 = vpop.permute.xlu0 %2764 }
0x1638   :  { %v2788_v5 = vmul.f32 %v6227_v61, %v2765_v38 }
0x1639   :  { %v2769_v52 = vpop.permute.xlu1 %2768 }
0x163a   :  { %v2790_v1 = vmul.f32 %v6230_v29, %v2769_v52  ;;  %2804 = vrot.lane.b32.xlu0 %v2788_v5, %s4918_s1 }
0x163b   :  { %v2767_v34 = vpop.permute.xlu0 %2766 }
0x163c   :  { %v2789_v40 = vmul.f32 %v6234_v42, %v2767_v34  ;;  %2808 = vrot.lane.b32.xlu1 %v2790_v1, %s4918_s1 }
0x163d   :  { %v2771_v27 = vpop.permute.xlu1 %2770 }
0x163e   :  { %v2791_v4 = vmul.f32 %v6238_v10, %v2771_v27  ;;  %2806 = vrot.lane.b32.xlu0 %v2789_v40, %s4918_s1 }
0x163f   :  { %v2773_v62 = vpop.permute.xlu0 %2772 }
0x1640   :  { %v2792_v25 = vmul.f32 %v6242_v16, %v2773_v62  ;;  %2810 = vrot.lane.b32.xlu1 %v2791_v4, %s4918_s1 }
0x1641   :  { %v2775_v61 = vpop.permute.xlu1 %2774 }
0x1642   :  { %v2793_v29 = vmul.f32 %v6246_v45, %v2775_v61  ;;  %2812 = vrot.lane.b32.xlu0 %v2792_v25, %s4918_s1 }
0x1643   :  { %v2777_v7 = vpop.permute.xlu0 %2776 }
0x1644   :  { %v2794_v42 = vmul.f32 %v6250_v46, %v2777_v7  ;;  %2814 = vrot.lane.b32.xlu1 %v2793_v29, %s4918_s1 }
0x1645   :  { %v2779_v38 = vpop.permute.xlu1 %2778 }
0x1646   :  { %v2795_v10 = vmul.f32 %v6254_v44, %v2779_v38  ;;  %2816 = vrot.lane.b32.xlu0 %v2794_v42, %s4918_s1 }
0x1648   :  { %2818 = vrot.lane.b32.xlu1 %v2795_v10, %s4918_s1 }
0x16ac   :  { %v2805_v16 = vpop.permute.xlu0 %2804 }
0x16ad   :  { %v6299_v5 = vadd.f32 %v4773_v0, %v2805_v16 }
0x16ae   :  { %v2809_v52 = vpop.permute.xlu1 %2808 }
0x16af   :  { %v2836_v45 = vsub.f32 %v6299_v5, %v6131_v6  ;;  %v6303_v1 = vadd.f32 %v4775_v22, %v2809_v52 }
0x16b0   :  { %v2807_v34 = vpop.permute.xlu0 %2806 }
0x16b1   :  { %v2852_v46 = vrot.slane %v2836_v45, 3  ;;  %v2838_v40 = vsub.f32 %v6303_v1, %v6125_v9  ;;  %v6307_v27 = vadd.f32 %v4777_v2, %v2807_v34 }
0x16b2   :  { %v2811_v44 = vpop.permute.xlu1 %2810 }
0x16b3   :  { %v2854_v4 = vrot.slane %v2838_v40, 3  ;;  %v2837_v62 = vsub.f32 %v6307_v27, %v6128_v32  ;;  %v6311_v0 = vadd.f32 %v4779_v19, %v2811_v44  ;;  %2860 = vrot.lane.b32.xlu0 %v2852_v46, %s4914_s27 }
0x16b4   :  { %v2813_v25 = vpop.permute.xlu0 %2812 }
0x16b5   :  { %v2853_v61 = vrot.slane %v2837_v62, 3  ;;  %v2839_v22 = vsub.f32 %v6311_v0, %v6135_v33  ;;  %v6316_v29 = vadd.f32 %v4781_v17, %v2813_v25  ;;  %2864 = vrot.lane.b32.xlu1 %v2854_v4, %s4914_s27 }
0x16b6   :  { %v2815_v2 = vpop.permute.xlu1 %2814 }
0x16b7   :  { %v2855_v7 = vrot.slane %v2839_v22, 3  ;;  %v2840_v42 = vsub.f32 %v6316_v29, %v6142_v51  ;;  %v6321_v38 = vadd.f32 %v4783_v47, %v2815_v2  ;;  %2862 = vrot.lane.b32.xlu0 %v2853_v61, %s4914_s27 }
0x16b8   :  { %v2817_v19 = vpop.permute.xlu0 %2816 }
0x16b9   :  { %7195 = vst [vmem:[#allocation27_spill] sm:$0xff] %v6321_v38  ;;  %v2856_v10 = vrot.slane %v2840_v42, 3  ;;  %v2841_v16 = vsub.f32 %v6321_v38, %v6147_v41  ;;  %v6326_v52 = vadd.f32 %v4785_v28, %v2817_v19  ;;  %2866 = vrot.lane.b32.xlu1 %v2855_v7, %s4914_s27 }
0x16ba   :  { %v2819_v17 = vpop.permute.xlu1 %2818 }
0x16bb   :  { %7196 = vst [vmem:[#allocation28_spill] sm:$0xff] %v6326_v52  ;;  %v2857_v45 = vrot.slane %v2841_v16, 3  ;;  %v2842_v34 = vsub.f32 %v6326_v52, %v6152_v3  ;;  %v6331_v46 = vadd.f32 %v4787_v11, %v2819_v17  ;;  %2868 = vrot.lane.b32.xlu0 %v2856_v10, %s4914_s27 }
0x16bd   :  { %7197 = vst [vmem:[#allocation29_spill] sm:$0xff] %v6331_v46  ;;  %v2858_v47 = vrot.slane %v2842_v34, 3  ;;  %v2843_v40 = vsub.f32 %v6331_v46, %v6157_v55  ;;  %2870 = vrot.lane.b32.xlu1 %v2857_v45, %s4914_s27 }
0x16bf   :  { %v2859_v44 = vrot.slane %v2843_v40, 3  ;;  %2872 = vrot.lane.b32.xlu0 %v2858_v47, %s4914_s27 }
0x16c1   :  { %2874 = vrot.lane.b32.xlu1 %v2859_v44, %s4914_s27 }
0x1725   :  { %v2861_v28 = vpop.permute.xlu0 %2860 }
0x1726   :  { %v2884_v4 = vmul.f32 %v5165_v15, %v2861_v28 }
0x1727   :  { %v2865_v62 = vpop.permute.xlu1 %2864 }
0x1728   :  { %v2900_v25 = vrot.slane %v2884_v4, 5  ;;  %v2886_v11 = vmul.f32 %v5157_v13, %v2865_v62 }
0x1729   :  { %v2863_v61 = vpop.permute.xlu0 %2862 }
0x172a   :  { %v2902_v22 = vrot.slane %v2886_v11, 5  ;;  %v2885_v2 = vmul.f32 %v5148_v26, %v2863_v61  ;;  %2908 = vrot.lane.b32.xlu0 %v2900_v25, %s4914_s27 }
0x172b   :  { %v2867_v7 = vpop.permute.xlu1 %2866 }
0x172c   :  { %v2901_v42 = vrot.slane %v2885_v2, 5  ;;  %v2887_v19 = vmul.f32 %v5173_v24, %v2867_v7  ;;  %2912 = vrot.lane.b32.xlu1 %v2902_v22, %s4914_s27 }
0x172d   :  { %v2869_v10 = vpop.permute.xlu0 %2868 }
0x172e   :  { %v2903_v16 = vrot.slane %v2887_v19, 5  ;;  %v2888_v17 = vmul.f32 %v5178_v30, %v2869_v10  ;;  %2910 = vrot.lane.b32.xlu0 %v2901_v42, %s4914_s27 }
0x172f   :  { %v2871_v45 = vpop.permute.xlu1 %2870 }
0x1730   :  { %v2904_v34 = vrot.slane %v2888_v17, 5  ;;  %v2889_v47 = vmul.f32 %v5193_v39, %v2871_v45  ;;  %2914 = vrot.lane.b32.xlu1 %v2903_v16, %s4914_s27 }
0x1731   :  { %v2873_v40 = vpop.permute.xlu0 %2872 }
0x1732   :  { %v2905_v44 = vrot.slane %v2889_v47, 5  ;;  %v2890_v28 = vmul.f32 %v5199_v43, %v2873_v40  ;;  %2916 = vrot.lane.b32.xlu0 %v2904_v34, %s4914_s27 }
0x1733   :  { %v2875_v4 = vpop.permute.xlu1 %2874 }
0x1734   :  { %v2906_v62 = vrot.slane %v2890_v28, 5  ;;  %v2891_v25 = vmul.f32 %v5212_v48, %v2875_v4  ;;  %2918 = vrot.lane.b32.xlu1 %v2905_v44, %s4914_s27 }
0x1736   :  { %v2907_v11 = vrot.slane %v2891_v25, 5  ;;  %2920 = vrot.lane.b32.xlu0 %v2906_v62, %s4914_s27 }
0x1738   :  { %2922 = vrot.lane.b32.xlu1 %v2907_v11, %s4914_s27 }
0x179c   :  { %v2909_v61 = vpop.permute.xlu0 %2908 }
0x179d   :  { %v6362_v10 = vadd.f32 %v2909_v61, %v6131_v6 }
0x179e   :  { %v2913_v22 = vpop.permute.xlu1 %2912 }
0x179f   :  { %v6356_v2 = vadd.f32 %v2913_v22, %v6125_v9 }
0x17a0   :  { %v2911_v7 = vpop.permute.xlu0 %2910 }
0x17a1   :  { %v6359_v42 = vadd.f32 %v2911_v7, %v6128_v32  ;;  %v3006_v45 = vrot.slane %v6356_v2, 6 }
0x17a2   :  { %v2915_v19 = vpop.permute.xlu1 %2914 }
0x17a3   :  { %v3004_v16 = vrot.slane %v6359_v42, 7  ;;  %v6366_v17 = vadd.f32 %v2915_v19, %v6135_v33 }
0x17a4   :  { %v2917_v34 = vpop.permute.xlu0 %2916 }
0x17a5   :  { %v3005_v9 = vsel %vm518_vm6, %v3004_v16, %v6362_v10  ;;  %v3008_v47 = vrot.slane %v6366_v17, 5  ;;  %v6373_v32 = vadd.f32 %v2917_v34, %v6142_v51  ;;  %v6399_v34 = vld [vmem:[%s7136_s3] ss:$0 sm:$0xff] }
0x17a6   :  { %v2919_v40 = vpop.permute.xlu1 %2918  ;;  %v3007_v6 = vsel %vm521_vm7, %v3006_v45, %v3005_v9 }
0x17a7   :  { %v3010_v44 = vrot.slane %v6373_v32, 4  ;;  %v6378_v28 = vadd.f32 %v2919_v40, %v6147_v41  ;;  %v3009_v33 = vsel %vm524_vm10, %v3008_v47, %v3007_v6 }
0x17a8   :  { %v2921_v4 = vpop.permute.xlu0 %2920 }
0x17a9   :  { %v3012_v62 = vrot.slane %v6378_v28, 3  ;;  %v6383_v25 = vadd.f32 %v2921_v4, %v6152_v3  ;;  %v3011_v11 = vsel %vm527_vm11, %v3010_v44, %v3009_v33 }
0x17aa   :  { %v2923_v51 = vpop.permute.xlu1 %2922 }
0x17ab   :  { %v3014_v61 = vrot.slane %v6383_v25, 2  ;;  %v6388_v22 = vadd.f32 %v2923_v51, %v6157_v55  ;;  %v3013_v7 = vsel %vm530_vm13, %v3012_v62, %v3011_v11  ;;  %v6413_v11 = vld [vmem:[%s7133_s0 + $0x6] sm:$0x1]  ;;  %v6418_v51 = vld [vmem:[%s7133_s0 + $0x16] sm:$0x1] }
0x17ad   :  { %v3015_v41 = vsel %vm533_vm14, %v3014_v61, %v3013_v7  ;;  %v3016_v19 = vrot.slane %v6388_v22, 1  ;;  %v6424_v7 = vld [vmem:[%s7133_s0 + $0xe] sm:$0x1] }
0x17af   :  { %v3017_v16 = vsel %vm536_vm15, %v3016_v19, %v3015_v41  ;;  %v6430_v19 = vld [vmem:[%s7133_s0 + $0x1e] sm:$0x1] }
0x17b0   :  { %3018 = vrot.lane.b32.xlu0 %v3017_v16, %s4914_s27 }
0x1822   :  { %v3019_v3 = vpop.permute.xlu0 %3018 }
0x1823   :  { %4427 = vmatmul.mubr.msk.f32.vlgmr.msra.gmra.mrb[6].mxu0 %vm171_vm1, %v3019_v3 }
0x18f6   :  { %v3088_v45 = vpop.f32.mrb[6].mxu0 }
0x18f7   :  { %v3089_v55 = vadd.f32 %v6399_v34, %v3088_v45  ;;  %v4428_v9 = vpop.f32.mrb[7].mxu0  ;;  %v6436_v45 = vld [vmem:[%s7133_s0 + $0x26] sm:$0x1] }
0x18f9   :  { %3164 = vrot.lane.b32.xlu1 %v3089_v55, %s4914_s27  ;;  %v3094_v47 = vrot.slane %v3089_v55, 2  ;;  %v3093_v40 = vrot.slane %v3089_v55, 1  ;;  %v3095_v6 = vrot.slane %v3089_v55, 3  ;;  %v3096_v44 = vrot.slane %v3089_v55, 4 }
0x18fa   :  { %v3097_v33 = vrot.slane %v3089_v55, 5  ;;  %v3098_v4 = vrot.slane %v3089_v55, 6  ;;  %v3099_v62 = vrot.slane %v3089_v55, 7  ;;  %v3108_v61 = vadd.f32 %v3089_v55, %v6413_v11 }
0x18fb   :  { %3168 = vrot.lane.b32.xlu0 %v3094_v47, %s4914_s27  ;;  %v3110_v41 = vadd.f32 %v3094_v47, %v6418_v51  ;;  %v3109_v16 = vadd.f32 %v3093_v40, %v6424_v7  ;;  %v3111_v9 = vadd.f32 %v3095_v6, %v6430_v19  ;;  %v6442_v47 = vld [vmem:[%s7133_s0 + $0x2e] sm:$0x1]  ;;  %v3112_v56 = vadd.f32 %v3096_v44, %v6436_v45 }
0x18fc   :  { %v4295_v3 = vmul.f32 -1.442695, %v3108_v61 }
0x18fd   :  { %3166 = vrot.lane.b32.xlu1 %v3093_v40, %s4914_s27  ;;  %v4297_v55 = vmul.f32 -1.442695, %v3110_v41  ;;  %v4296_v14 = vmul.f32 -1.442695, %v3109_v16  ;;  %v6448_v40 = vld [vmem:[%s7133_s0 + $0x36] sm:$0x1]  ;;  %v3113_v41 = vadd.f32 %v3097_v33, %v6442_v47 }
0x18fe   :  { %4788 = vpow2.f32 %v4295_v3  ;;  %v4298_v61 = vmul.f32 -1.442695, %v3111_v9  ;;  %v4299_v18 = vmul.f32 -1.442695, %v3112_v56  ;;  %v3114_v16 = vadd.f32 %v3098_v4, %v6448_v40 }
0x18ff   :  { %3170 = vrot.lane.b32.xlu0 %v3095_v6, %s4914_s27  ;;  %4790 = vpow2.f32 %v4297_v55  ;;  %v6454_v6 = vld [vmem:[%s7133_s0 + $0x3e] sm:$0x1] }
0x1900   :  { %4792 = vpow2.f32 %v4296_v14  ;;  %v3115_v3 = vadd.f32 %v3099_v62, %v6454_v6  ;;  %v4301_v46 = vmul.f32 -1.442695, %v3114_v16 }
0x1901   :  { %3172 = vrot.lane.b32.xlu1 %v3096_v44, %s4914_s27  ;;  %4794 = vpow2.f32 %v4298_v61  ;;  %v4300_v44 = vmul.f32 -1.442695, %v3113_v41 }
0x1902   :  { %4796 = vpow2.f32 %v4299_v18  ;;  %v4302_v55 = vmul.f32 -1.442695, %v3115_v3 }
0x1903   :  { %3174 = vrot.lane.b32.xlu0 %v3097_v33, %s4914_s27  ;;  %4798 = vpow2.f32 %v4300_v44 }
0x1904   :  { %4800 = vpow2.f32 %v4301_v46 }
0x1905   :  { %3176 = vrot.lane.b32.xlu1 %v3098_v4, %s4914_s27  ;;  %4802 = vpow2.f32 %v4302_v55 }
0x1907   :  { %3178 = vrot.lane.b32.xlu0 %v3099_v62, %s4914_s27 }
0x1908   :  { %v4789_v38 = vpop.eup %4788 }
0x1909   :  { %v4791_v9 = vpop.eup %4790  ;;  %v3140_v33 = vadd.f32 1.0, %v4789_v38 }
0x190a   :  { %v4793_v50 = vpop.eup %4792  ;;  %v3142_v52 = vadd.f32 1.0, %v4791_v9 }
0x190b   :  { %v4795_v60 = vpop.eup %4794  ;;  %4804 = vrcp.f32 %v3140_v33  ;;  %v3141_v56 = vadd.f32 1.0, %v4793_v50 }
0x190c   :  { %v4797_v14 = vpop.eup %4796  ;;  %4806 = vrcp.f32 %v3142_v52  ;;  %v3143_v4 = vadd.f32 1.0, %v4795_v60 }
0x190d   :  { %v4799_v61 = vpop.eup %4798  ;;  %4808 = vrcp.f32 %v3141_v56  ;;  %v3144_v62 = vadd.f32 1.0, %v4797_v14 }
0x190e   :  { %v4801_v18 = vpop.eup %4800  ;;  %4810 = vrcp.f32 %v3143_v4  ;;  %v3145_v41 = vadd.f32 1.0, %v4799_v61 }
0x190f   :  { %v4803_v16 = vpop.eup %4802  ;;  %4812 = vrcp.f32 %v3144_v62  ;;  %v3146_v44 = vadd.f32 1.0, %v4801_v18 }
0x1910   :  { %4814 = vrcp.f32 %v3145_v41  ;;  %v3147_v3 = vadd.f32 1.0, %v4803_v16 }
0x1911   :  { %4816 = vrcp.f32 %v3146_v44 }
0x1912   :  { %4818 = vrcp.f32 %v3147_v3 }
0x1915   :  { %v6458_v46 = vpop.eup %4804 }
0x1916   :  { %v6461_v50 = vpop.eup %4806 }
0x1917   :  { %v6465_v9 = vpop.eup %4808 }
0x1918   :  { %v6469_v14 = vpop.eup %4810 }
0x1919   :  { %v6473_v62 = vpop.eup %4812 }
0x191a   :  { %v6477_v16 = vpop.eup %4814 }
0x191b   :  { %v6481_v3 = vpop.eup %4816 }
0x196b   :  { %v3165_v38 = vpop.permute.xlu1 %3164 }
0x196c   :  { %v3188_v55 = vmul.f32 %v6458_v46, %v3165_v38 }
0x196d   :  { %v3169_v52 = vpop.permute.xlu0 %3168 }
0x196e   :  { %v3190_v60 = vmul.f32 %v6461_v50, %v3169_v52  ;;  %3204 = vrot.lane.b32.xlu1 %v3188_v55, %s4914_s27 }
0x196f   :  { %v3167_v33 = vpop.permute.xlu1 %3166 }
0x1970   :  { %v3189_v56 = vmul.f32 %v6465_v9, %v3167_v33  ;;  %3208 = vrot.lane.b32.xlu0 %v3190_v60, %s4914_s27  ;;  %v6485_v60 = vpop.eup %4818 }
0x1971   :  { %v3171_v4 = vpop.permute.xlu0 %3170 }
0x1972   :  { %v3191_v61 = vmul.f32 %v6469_v14, %v3171_v4  ;;  %3206 = vrot.lane.b32.xlu1 %v3189_v56, %s4914_s27 }
0x1973   :  { %v3173_v18 = vpop.permute.xlu1 %3172 }
0x1974   :  { %v3192_v41 = vmul.f32 %v6473_v62, %v3173_v18  ;;  %3210 = vrot.lane.b32.xlu0 %v3191_v61, %s4914_s27 }
0x1975   :  { %v3175_v44 = vpop.permute.xlu0 %3174 }
0x1976   :  { %v3193_v38 = vmul.f32 %v6477_v16, %v3175_v44  ;;  %3212 = vrot.lane.b32.xlu1 %v3192_v41, %s4914_s27 }
0x1977   :  { %v3177_v55 = vpop.permute.xlu1 %3176 }
0x1978   :  { %v3194_v52 = vmul.f32 %v6481_v3, %v3177_v55  ;;  %3214 = vrot.lane.b32.xlu0 %v3193_v38, %s4914_s27 }
0x1979   :  { %v3179_v33 = vpop.permute.xlu0 %3178 }
0x197a   :  { %v3195_v56 = vmul.f32 %v6485_v60, %v3179_v33  ;;  %3216 = vrot.lane.b32.xlu1 %v3194_v52, %s4914_s27 }
0x197c   :  { %3218 = vrot.lane.b32.xlu0 %v3195_v56, %s4914_s27 }
0x19e0   :  { %v3205_v4 = vpop.permute.xlu1 %3204 }
0x19e1   :  { %v3228_v61 = vadd.f32 %v3205_v4, %v6413_v11 }
0x19e2   :  { %v3209_v18 = vpop.permute.xlu0 %3208 }
0x19e3   :  { %4820 = vtanh.f32 %v3228_v61  ;;  %v3230_v41 = vadd.f32 %v3209_v18, %v6418_v51 }
0x19e4   :  { %v3207_v44 = vpop.permute.xlu1 %3206 }
0x19e5   :  { %4822 = vtanh.f32 %v3230_v41  ;;  %v3229_v38 = vadd.f32 %v3207_v44, %v6424_v7 }
0x19e6   :  { %v3211_v55 = vpop.permute.xlu0 %3210 }
0x19e7   :  { %4824 = vtanh.f32 %v3229_v38  ;;  %v3231_v35 = vadd.f32 %v3211_v55, %v6430_v19 }
0x19e8   :  { %v3213_v33 = vpop.permute.xlu1 %3212 }
0x19e9   :  { %4826 = vtanh.f32 %v3231_v35  ;;  %v3232_v52 = vadd.f32 %v3213_v33, %v6436_v45 }
0x19ea   :  { %v3215_v56 = vpop.permute.xlu0 %3214 }
0x19eb   :  { %4828 = vtanh.f32 %v3232_v52  ;;  %v3233_v11 = vadd.f32 %v3215_v56, %v6442_v47 }
0x19ec   :  { %v3217_v4 = vpop.permute.xlu1 %3216 }
0x19ed   :  { %v4821_v61 = vpop.eup %4820  ;;  %4830 = vtanh.f32 %v3233_v11  ;;  %v3234_v51 = vadd.f32 %v3217_v4, %v6448_v40 }
0x19ee   :  { %v3219_v18 = vpop.permute.xlu0 %3218  ;;  %v3244_v7 = vsub.f32 %v6362_v10, %v4821_v61 }
0x19ef   :  { %v4823_v41 = vpop.eup %4822  ;;  %4832 = vtanh.f32 %v3234_v51  ;;  %v3235_v19 = vadd.f32 %v3219_v18, %v6454_v6 }
0x19f0   :  { %3260 = vrot.lane.b32.xlu1 %v3244_v7, %s4917_s19  ;;  %v3246_v35 = vsub.f32 %v6356_v2, %v4823_v41 }
0x19f1   :  { %v4825_v45 = vpop.eup %4824  ;;  %4834 = vtanh.f32 %v3235_v19 }
0x19f2   :  { %3264 = vrot.lane.b32.xlu0 %v3246_v35, %s4917_s19  ;;  %v3245_v47 = vsub.f32 %v6359_v42, %v4825_v45 }
0x19f3   :  { %v4827_v44 = vpop.eup %4826 }
0x19f4   :  { %3262 = vrot.lane.b32.xlu1 %v3245_v47, %s4917_s19  ;;  %v3247_v40 = vsub.f32 %v6366_v17, %v4827_v44 }
0x19f5   :  { %v4829_v38 = vpop.eup %4828 }
0x19f6   :  { %3266 = vrot.lane.b32.xlu0 %v3247_v40, %s4917_s19  ;;  %v3248_v6 = vsub.f32 %v6373_v32, %v4829_v38 }
0x19f7   :  { %v4831_v55 = vpop.eup %4830 }
0x19f8   :  { %3268 = vrot.lane.b32.xlu1 %v3248_v6, %s4917_s19  ;;  %v3249_v33 = vsub.f32 %v6378_v28, %v4831_v55 }
0x19f9   :  { %v4833_v52 = vpop.eup %4832 }
0x19fa   :  { %3270 = vrot.lane.b32.xlu0 %v3249_v33, %s4917_s19  ;;  %v3250_v56 = vsub.f32 %v6383_v25, %v4833_v52 }
0x19fb   :  { %v4835_v11 = vpop.eup %4834 }
0x19fc   :  { %3272 = vrot.lane.b32.xlu1 %v3250_v56, %s4917_s19  ;;  %v3251_v4 = vsub.f32 %v6388_v22, %v4835_v11 }
0x19fe   :  { %3274 = vrot.lane.b32.xlu0 %v3251_v4, %s4917_s19 }
0x1a62   :  { %v3261_v51 = vpop.permute.xlu1 %3260 }
0x1a63   :  { %v3284_v18 = vmul.f32 %v6458_v46, %v3261_v51 }
0x1a64   :  { %v3265_v7 = vpop.permute.xlu0 %3264 }
0x1a65   :  { %v3286_v19 = vmul.f32 %v6461_v50, %v3265_v7  ;;  %3300 = vrot.lane.b32.xlu1 %v3284_v18, %s4918_s1 }
0x1a66   :  { %v3263_v35 = vpop.permute.xlu1 %3262 }
0x1a67   :  { %v3285_v47 = vmul.f32 %v6465_v9, %v3263_v35  ;;  %3304 = vrot.lane.b32.xlu0 %v3286_v19, %s4918_s1 }
0x1a68   :  { %v3267_v40 = vpop.permute.xlu0 %3266 }
0x1a69   :  { %v3287_v6 = vmul.f32 %v6469_v14, %v3267_v40  ;;  %3302 = vrot.lane.b32.xlu1 %v3285_v47, %s4918_s1 }
0x1a6a   :  { %v3269_v33 = vpop.permute.xlu1 %3268 }
0x1a6b   :  { %v3288_v56 = vmul.f32 %v6473_v62, %v3269_v33  ;;  %3306 = vrot.lane.b32.xlu0 %v3287_v6, %s4918_s1 }
0x1a6c   :  { %v3271_v46 = vpop.permute.xlu0 %3270 }
0x1a6d   :  { %v3289_v50 = vmul.f32 %v6477_v16, %v3271_v46  ;;  %3308 = vrot.lane.b32.xlu1 %v3288_v56, %s4918_s1 }
0x1a6e   :  { %v3273_v4 = vpop.permute.xlu1 %3272 }
0x1a6f   :  { %v3290_v9 = vmul.f32 %v6481_v3, %v3273_v4  ;;  %3310 = vrot.lane.b32.xlu0 %v3289_v50, %s4918_s1 }
0x1a70   :  { %v3275_v51 = vpop.permute.xlu0 %3274 }
0x1a71   :  { %v3291_v14 = vmul.f32 %v6485_v60, %v3275_v51  ;;  %3312 = vrot.lane.b32.xlu1 %v3290_v9, %s4918_s1 }
0x1a73   :  { %3314 = vrot.lane.b32.xlu0 %v3291_v14, %s4918_s1 }
0x1ad7   :  { %v3301_v62 = vpop.permute.xlu1 %3300 }
0x1ad8   :  { %v6530_v18 = vadd.f32 %v4821_v61, %v3301_v62 }
0x1ad9   :  { %v3305_v7 = vpop.permute.xlu0 %3304 }
0x1ada   :  { %v3332_v16 = vsub.f32 %v6530_v18, %v6362_v10  ;;  %v6534_v19 = vadd.f32 %v4823_v41, %v3305_v7 }
0x1adb   :  { %v3303_v35 = vpop.permute.xlu1 %3302 }
0x1adc   :  { %v3348_v3 = vrot.slane %v3332_v16, 2  ;;  %v3334_v47 = vsub.f32 %v6534_v19, %v6356_v2  ;;  %v6538_v40 = vadd.f32 %v4825_v45, %v3303_v35 }
0x1add   :  { %v3307_v60 = vpop.permute.xlu0 %3306 }
0x1ade   :  { %v3350_v6 = vrot.slane %v3334_v47, 2  ;;  %v3333_v33 = vsub.f32 %v6538_v40, %v6359_v42  ;;  %v6542_v61 = vadd.f32 %v4827_v44, %v3307_v60  ;;  %3356 = vrot.lane.b32.xlu1 %v3348_v3, %s4914_s27 }
0x1adf   :  { %v3309_v56 = vpop.permute.xlu1 %3308 }
0x1ae0   :  { %v3349_v46 = vrot.slane %v3333_v33, 2  ;;  %v3335_v41 = vsub.f32 %v6542_v61, %v6366_v17  ;;  %v6547_v50 = vadd.f32 %v4829_v38, %v3309_v56  ;;  %3360 = vrot.lane.b32.xlu0 %v3350_v6, %s4914_s27 }
0x1ae1   :  { %v3311_v45 = vpop.permute.xlu0 %3310 }
0x1ae2   :  { %v3351_v4 = vrot.slane %v3335_v41, 2  ;;  %v3336_v9 = vsub.f32 %v6547_v50, %v6373_v32  ;;  %v6552_v51 = vadd.f32 %v4831_v55, %v3311_v45  ;;  %3358 = vrot.lane.b32.xlu1 %v3349_v46, %s4914_s27 }
0x1ae3   :  { %v3313_v44 = vpop.permute.xlu1 %3312 }
0x1ae4   :  { %7198 = vst [vmem:[#allocation30_spill] sm:$0xff] %v6552_v51  ;;  %v3352_v14 = vrot.slane %v3336_v9, 2  ;;  %v3337_v62 = vsub.f32 %v6552_v51, %v6378_v28  ;;  %v6557_v7 = vadd.f32 %v4833_v52, %v3313_v44  ;;  %3362 = vrot.lane.b32.xlu0 %v3351_v4, %s4914_s27 }
0x1ae5   :  { %v3315_v38 = vpop.permute.xlu0 %3314 }
0x1ae6   :  { %7199 = vst [vmem:[#allocation31_spill] sm:$0xff] %v6557_v7  ;;  %v3353_v16 = vrot.slane %v3337_v62, 2  ;;  %v3338_v35 = vsub.f32 %v6557_v7, %v6383_v25  ;;  %v6562_v3 = vadd.f32 %v4835_v11, %v3315_v38  ;;  %3364 = vrot.lane.b32.xlu1 %v3352_v14, %s4914_s27 }
0x1ae8   :  { %7200 = vst [vmem:[#allocation32_spill] sm:$0xff] %v6562_v3  ;;  %v3354_v55 = vrot.slane %v3338_v35, 2  ;;  %v3339_v47 = vsub.f32 %v6562_v3, %v6388_v22  ;;  %3366 = vrot.lane.b32.xlu0 %v3353_v16, %s4914_s27 }
0x1aea   :  { %v3355_v60 = vrot.slane %v3339_v47, 2  ;;  %3368 = vrot.lane.b32.xlu1 %v3354_v55, %s4914_s27 }
0x1aec   :  { %3370 = vrot.lane.b32.xlu0 %v3355_v60, %s4914_s27 }
0x1b50   :  { %v3357_v52 = vpop.permute.xlu1 %3356 }
0x1b51   :  { %v3380_v6 = vmul.f32 %v5165_v15, %v3357_v52 }
0x1b52   :  { %v3361_v33 = vpop.permute.xlu0 %3360 }
0x1b53   :  { %v3396_v56 = vrot.slane %v3380_v6, 6  ;;  %v3382_v11 = vmul.f32 %v5157_v13, %v3361_v33 }
0x1b54   :  { %v3359_v46 = vpop.permute.xlu1 %3358 }
0x1b55   :  { %v3398_v41 = vrot.slane %v3382_v11, 6  ;;  %v3381_v45 = vmul.f32 %v5148_v26, %v3359_v46  ;;  %3404 = vrot.lane.b32.xlu1 %v3396_v56, %s4914_s27 }
0x1b56   :  { %v3363_v4 = vpop.permute.xlu0 %3362 }
0x1b57   :  { %v3397_v9 = vrot.slane %v3381_v45, 6  ;;  %v3383_v44 = vmul.f32 %v5173_v24, %v3363_v4  ;;  %3408 = vrot.lane.b32.xlu0 %v3398_v41, %s4914_s27 }
0x1b58   :  { %v3365_v14 = vpop.permute.xlu1 %3364 }
0x1b59   :  { %v3399_v62 = vrot.slane %v3383_v44, 6  ;;  %v3384_v38 = vmul.f32 %v5178_v30, %v3365_v14  ;;  %3406 = vrot.lane.b32.xlu1 %v3397_v9, %s4914_s27 }
0x1b5a   :  { %v3367_v16 = vpop.permute.xlu0 %3366 }
0x1b5b   :  { %v3400_v35 = vrot.slane %v3384_v38, 6  ;;  %v3385_v55 = vmul.f32 %v5193_v39, %v3367_v16  ;;  %3410 = vrot.lane.b32.xlu0 %v3399_v62, %s4914_s27 }
0x1b5c   :  { %v3369_v47 = vpop.permute.xlu1 %3368 }
0x1b5d   :  { %v3401_v60 = vrot.slane %v3385_v55, 6  ;;  %v3386_v52 = vmul.f32 %v5199_v43, %v3369_v47  ;;  %3412 = vrot.lane.b32.xlu1 %v3400_v35, %s4914_s27 }
0x1b5e   :  { %v3371_v6 = vpop.permute.xlu0 %3370 }
0x1b5f   :  { %v3402_v33 = vrot.slane %v3386_v52, 6  ;;  %v3387_v56 = vmul.f32 %v5212_v48, %v3371_v6  ;;  %3414 = vrot.lane.b32.xlu0 %v3401_v60, %s4914_s27 }
0x1b61   :  { %v3403_v11 = vrot.slane %v3387_v56, 6  ;;  %3416 = vrot.lane.b32.xlu1 %v3402_v33, %s4914_s27 }
0x1b63   :  { %3418 = vrot.lane.b32.xlu0 %v3403_v11, %s4914_s27 }
0x1bc7   :  { %v3405_v46 = vpop.permute.xlu1 %3404 }
0x1bc8   :  { %v6593_v14 = vadd.f32 %v3405_v46, %v6362_v10 }
0x1bc9   :  { %v3409_v41 = vpop.permute.xlu0 %3408 }
0x1bca   :  { %v6587_v45 = vadd.f32 %v3409_v41, %v6356_v2 }
0x1bcb   :  { %v3407_v4 = vpop.permute.xlu1 %3406 }
0x1bcc   :  { %v6590_v9 = vadd.f32 %v3407_v4, %v6359_v42  ;;  %v3502_v16 = vrot.slane %v6587_v45, 6 }
0x1bcd   :  { %v3411_v44 = vpop.permute.xlu0 %3410 }
0x1bce   :  { %v3500_v62 = vrot.slane %v6590_v9, 7  ;;  %v6597_v38 = vadd.f32 %v3411_v44, %v6366_v17 }
0x1bcf   :  { %v3413_v35 = vpop.permute.xlu1 %3412 }
0x1bd0   :  { %v3501_v2 = vsel %vm518_vm6, %v3500_v62, %v6593_v14  ;;  %v3504_v55 = vrot.slane %v6597_v38, 5  ;;  %v6604_v42 = vadd.f32 %v3413_v35, %v6373_v32 }
0x1bd1   :  { %v3415_v47 = vpop.permute.xlu0 %3414  ;;  %v3503_v10 = vsel %vm521_vm7, %v3502_v16, %v3501_v2 }
0x1bd2   :  { %v3506_v60 = vrot.slane %v6604_v42, 4  ;;  %v6609_v52 = vadd.f32 %v3415_v47, %v6378_v28  ;;  %v3505_v17 = vsel %vm524_vm10, %v3504_v55, %v3503_v10 }
0x1bd3   :  { %v3417_v6 = vpop.permute.xlu1 %3416 }
0x1bd4   :  { %v3508_v33 = vrot.slane %v6609_v52, 3  ;;  %v6614_v56 = vadd.f32 %v3417_v6, %v6383_v25  ;;  %v3507_v11 = vsel %vm527_vm11, %v3506_v60, %v3505_v17  ;;  %v6639_v6 = vld [vmem:[%s7133_s0 + $0x7] sm:$0x1] }
0x1bd5   :  { %v3419_v32 = vpop.permute.xlu0 %3418 }
0x1bd6   :  { %v3510_v46 = vrot.slane %v6614_v56, 2  ;;  %v6619_v41 = vadd.f32 %v3419_v32, %v6388_v22  ;;  %v3509_v4 = vsel %vm530_vm13, %v3508_v33, %v3507_v11  ;;  %v6644_v33 = vld [vmem:[%s7133_s0 + $0x17] sm:$0x1]  ;;  %v6650_v32 = vld [vmem:[%s7133_s0 + $0xf] sm:$0x1] }
0x1bd8   :  { %v3511_v28 = vsel %vm533_vm14, %v3510_v46, %v3509_v4  ;;  %v3512_v44 = vrot.slane %v6619_v41, 1  ;;  %v6656_v4 = vld [vmem:[%s7133_s0 + $0x1f] sm:$0x1] }
0x1bda   :  { %v3513_v62 = vsel %vm536_vm15, %v3512_v44, %v3511_v28 }
0x1bdb   :  { %3514 = vrot.lane.b32.xlu1 %v3513_v62, %s4914_s27  ;;  %v6662_v62 = vld [vmem:[%s7133_s0 + $0x27] sm:$0x1] }
0x1c4d   :  { %v3515_v25 = vpop.permute.xlu1 %3514 }
0x1c4e   :  { %4438 = vmatmul.mubr.msk.f32.vlgmr.msra.gmra.mrb[6].mxu1 %vm171_vm1, %v3515_v25 }
0x1d21   :  { %v3584_v16 = vpop.f32.mrb[6].mxu1 }
0x1d22   :  { %v3585_v35 = vadd.f32 %v6399_v34, %v3584_v16  ;;  %v4439_v2 = vpop.f32.mrb[7].mxu1 }
0x1d24   :  { %3660 = vrot.lane.b32.xlu0 %v3585_v35, %s4914_s27  ;;  %v3590_v22 = vrot.slane %v3585_v35, 2  ;;  %v3589_v55 = vrot.slane %v3585_v35, 1  ;;  %v3591_v47 = vrot.slane %v3585_v35, 3  ;;  %v3592_v10 = vrot.slane %v3585_v35, 4 }
0x1d25   :  { %v3593_v60 = vrot.slane %v3585_v35, 5  ;;  %v3594_v17 = vrot.slane %v3585_v35, 6  ;;  %v3595_v34 = vrot.slane %v3585_v35, 7  ;;  %v3604_v11 = vadd.f32 %v3585_v35, %v6639_v6  ;;  %v6668_v35 = vld [vmem:[%s7133_s0 + $0x2f] sm:$0x1] }
0x1d26   :  { %3664 = vrot.lane.b32.xlu1 %v3590_v22, %s4914_s27  ;;  %v3606_v46 = vadd.f32 %v3590_v22, %v6644_v33  ;;  %v3605_v28 = vadd.f32 %v3589_v55, %v6650_v32  ;;  %v3607_v16 = vadd.f32 %v3591_v47, %v6656_v4  ;;  %v3608_v22 = vadd.f32 %v3592_v10, %v6662_v62 }
0x1d27   :  { %v4304_v44 = vmul.f32 -1.442695, %v3604_v11 }
0x1d28   :  { %3662 = vrot.lane.b32.xlu0 %v3589_v55, %s4914_s27  ;;  %v4306_v25 = vmul.f32 -1.442695, %v3606_v46  ;;  %v4305_v2 = vmul.f32 -1.442695, %v3605_v28  ;;  %v6674_v55 = vld [vmem:[%s7133_s0 + $0x37] sm:$0x1]  ;;  %v3609_v46 = vadd.f32 %v3593_v60, %v6668_v35 }
0x1d29   :  { %4836 = vpow2.f32 %v4304_v44  ;;  %v4307_v11 = vmul.f32 -1.442695, %v3607_v16  ;;  %v4308_v48 = vmul.f32 -1.442695, %v3608_v22  ;;  %v3610_v28 = vadd.f32 %v3594_v17, %v6674_v55 }
0x1d2a   :  { %3666 = vrot.lane.b32.xlu1 %v3591_v47, %s4914_s27  ;;  %4838 = vpow2.f32 %v4306_v25  ;;  %v6680_v47 = vld [vmem:[%s7133_s0 + $0x3f] sm:$0x1] }
0x1d2b   :  { %4840 = vpow2.f32 %v4305_v2  ;;  %v3611_v44 = vadd.f32 %v3595_v34, %v6680_v47  ;;  %v4310_v43 = vmul.f32 -1.442695, %v3610_v28 }
0x1d2c   :  { %3668 = vrot.lane.b32.xlu0 %v3592_v10, %s4914_s27  ;;  %4842 = vpow2.f32 %v4307_v11  ;;  %v4309_v10 = vmul.f32 -1.442695, %v3609_v46 }
0x1d2d   :  { %4844 = vpow2.f32 %v4308_v48  ;;  %v4311_v25 = vmul.f32 -1.442695, %v3611_v44 }
0x1d2e   :  { %3670 = vrot.lane.b32.xlu1 %v3593_v60, %s4914_s27  ;;  %4846 = vpow2.f32 %v4309_v10 }
0x1d2f   :  { %4848 = vpow2.f32 %v4310_v43 }
0x1d30   :  { %3672 = vrot.lane.b32.xlu0 %v3594_v17, %s4914_s27  ;;  %4850 = vpow2.f32 %v4311_v25 }
0x1d32   :  { %3674 = vrot.lane.b32.xlu1 %v3595_v34, %s4914_s27 }
0x1d33   :  { %v4837_v7 = vpop.eup %4836 }
0x1d34   :  { %v4839_v16 = vpop.eup %4838  ;;  %v3636_v60 = vadd.f32 1.0, %v4837_v7 }
0x1d35   :  { %v4841_v3 = vpop.eup %4840  ;;  %v3638_v51 = vadd.f32 1.0, %v4839_v16 }
0x1d36   :  { %v4843_v12 = vpop.eup %4842  ;;  %4852 = vrcp.f32 %v3636_v60  ;;  %v3637_v2 = vadd.f32 1.0, %v4841_v3 }
0x1d37   :  { %v4845_v22 = vpop.eup %4844  ;;  %4854 = vrcp.f32 %v3638_v51  ;;  %v3639_v17 = vadd.f32 1.0, %v4843_v12 }
0x1d38   :  { %v4847_v11 = vpop.eup %4846  ;;  %4856 = vrcp.f32 %v3637_v2  ;;  %v3640_v34 = vadd.f32 1.0, %v4845_v22 }
0x1d39   :  { %v4849_v48 = vpop.eup %4848  ;;  %4858 = vrcp.f32 %v3639_v17  ;;  %v3641_v46 = vadd.f32 1.0, %v4847_v11 }
0x1d3a   :  { %v4851_v28 = vpop.eup %4850  ;;  %4860 = vrcp.f32 %v3640_v34  ;;  %v3642_v10 = vadd.f32 1.0, %v4849_v48 }
0x1d3b   :  { %4862 = vrcp.f32 %v3641_v46  ;;  %v3643_v44 = vadd.f32 1.0, %v4851_v28 }
0x1d3c   :  { %4864 = vrcp.f32 %v3642_v10 }
0x1d3d   :  { %4866 = vrcp.f32 %v3643_v44 }
0x1d40   :  { %v6684_v43 = vpop.eup %4852 }
0x1d41   :  { %v6687_v3 = vpop.eup %4854 }
0x1d42   :  { %v6691_v16 = vpop.eup %4856 }
0x1d43   :  { %v6695_v22 = vpop.eup %4858 }
0x1d44   :  { %v6699_v34 = vpop.eup %4860 }
0x1d45   :  { %v6703_v28 = vpop.eup %4862 }
0x1d46   :  { %v6707_v44 = vpop.eup %4864 }
0x1d96   :  { %v3661_v7 = vpop.permute.xlu0 %3660 }
0x1d97   :  { %v3684_v25 = vmul.f32 %v6684_v43, %v3661_v7 }
0x1d98   :  { %v3665_v51 = vpop.permute.xlu1 %3664 }
0x1d99   :  { %v3686_v12 = vmul.f32 %v6687_v3, %v3665_v51  ;;  %3700 = vrot.lane.b32.xlu0 %v3684_v25, %s4914_s27 }
0x1d9a   :  { %v3663_v60 = vpop.permute.xlu0 %3662 }
0x1d9b   :  { %v3685_v2 = vmul.f32 %v6691_v16, %v3663_v60  ;;  %3704 = vrot.lane.b32.xlu1 %v3686_v12, %s4914_s27  ;;  %v6711_v12 = vpop.eup %4866 }
0x1d9c   :  { %v3667_v17 = vpop.permute.xlu1 %3666 }
0x1d9d   :  { %v3687_v11 = vmul.f32 %v6695_v22, %v3667_v17  ;;  %3702 = vrot.lane.b32.xlu0 %v3685_v2, %s4914_s27 }
0x1d9e   :  { %v3669_v48 = vpop.permute.xlu0 %3668 }
0x1d9f   :  { %v3688_v46 = vmul.f32 %v6699_v34, %v3669_v48  ;;  %3706 = vrot.lane.b32.xlu1 %v3687_v11, %s4914_s27 }
0x1da0   :  { %v3671_v10 = vpop.permute.xlu1 %3670 }
0x1da1   :  { %v3689_v7 = vmul.f32 %v6703_v28, %v3671_v10  ;;  %3708 = vrot.lane.b32.xlu0 %v3688_v46, %s4914_s27 }
0x1da2   :  { %v3673_v25 = vpop.permute.xlu0 %3672 }
0x1da3   :  { %v3690_v51 = vmul.f32 %v6707_v44, %v3673_v25  ;;  %3710 = vrot.lane.b32.xlu1 %v3689_v7, %s4914_s27 }
0x1da4   :  { %v3675_v60 = vpop.permute.xlu1 %3674 }
0x1da5   :  { %v3691_v2 = vmul.f32 %v6711_v12, %v3675_v60  ;;  %3712 = vrot.lane.b32.xlu0 %v3690_v51, %s4914_s27 }
0x1da7   :  { %3714 = vrot.lane.b32.xlu1 %v3691_v2, %s4914_s27 }
0x1e0b   :  { %v3701_v17 = vpop.permute.xlu0 %3700 }
0x1e0c   :  { %v3724_v11 = vadd.f32 %v3701_v17, %v6639_v6 }
0x1e0d   :  { %v3705_v48 = vpop.permute.xlu1 %3704 }
0x1e0e   :  { %4868 = vtanh.f32 %v3724_v11  ;;  %v3726_v46 = vadd.f32 %v3705_v48, %v6644_v33 }
0x1e0f   :  { %v3703_v10 = vpop.permute.xlu0 %3702 }
0x1e10   :  { %4870 = vtanh.f32 %v3726_v46  ;;  %v3725_v7 = vadd.f32 %v3703_v10, %v6650_v32 }
0x1e11   :  { %v3707_v25 = vpop.permute.xlu1 %3706 }
0x1e12   :  { %4872 = vtanh.f32 %v3725_v7  ;;  %v3727_v21 = vadd.f32 %v3707_v25, %v6656_v4 }
0x1e13   :  { %v3709_v60 = vpop.permute.xlu0 %3708 }
0x1e14   :  { %4874 = vtanh.f32 %v3727_v21  ;;  %v3728_v51 = vadd.f32 %v3709_v60, %v6662_v62 }
0x1e15   :  { %v3711_v2 = vpop.permute.xlu1 %3710 }
0x1e16   :  { %4876 = vtanh.f32 %v3728_v51  ;;  %v3729_v6 = vadd.f32 %v3711_v2, %v6668_v35 }
0x1e17   :  { %v3713_v17 = vpop.permute.xlu0 %3712 }
0x1e18   :  { %v6722_v11 = vpop.eup %4868  ;;  %4878 = vtanh.f32 %v3729_v6  ;;  %v3730_v33 = vadd.f32 %v3713_v17, %v6674_v55 }
0x1e19   :  { %v3715_v48 = vpop.permute.xlu1 %3714  ;;  %v3740_v32 = vsub.f32 %v6593_v14, %v6722_v11 }
0x1e1a   :  { %v6727_v46 = vpop.eup %4870  ;;  %4880 = vtanh.f32 %v3730_v33  ;;  %v3731_v21 = vadd.f32 %v3715_v48, %v6680_v47 }
0x1e1b   :  { %3756 = vrot.lane.b32.xlu0 %v3740_v32, %s4917_s19  ;;  %v3742_v4 = vsub.f32 %v6587_v45, %v6727_v46 }
0x1e1c   :  { %v6733_v62 = vpop.eup %4872  ;;  %4882 = vtanh.f32 %v3731_v21 }
0x1e1d   :  { %3760 = vrot.lane.b32.xlu1 %v3742_v4, %s4917_s19  ;;  %v3741_v35 = vsub.f32 %v6590_v9, %v6733_v62 }
0x1e1e   :  { %v6738_v55 = vpop.eup %4874 }
0x1e1f   :  { %3758 = vrot.lane.b32.xlu0 %v3741_v35, %s4917_s19  ;;  %v3743_v47 = vsub.f32 %v6597_v38, %v6738_v55 }
0x1e20   :  { %v6743_v10 = vpop.eup %4876 }
0x1e21   :  { %3762 = vrot.lane.b32.xlu1 %v3743_v47, %s4917_s19  ;;  %v3744_v7 = vsub.f32 %v6604_v42, %v6743_v10 }
0x1e22   :  { %v6748_v25 = vpop.eup %4878 }
0x1e23   :  { %3764 = vrot.lane.b32.xlu0 %v3744_v7, %s4917_s19  ;;  %v3745_v60 = vsub.f32 %v6609_v52, %v6748_v25 }
0x1e24   :  { %v6753_v51 = vpop.eup %4880 }
0x1e25   :  { %3766 = vrot.lane.b32.xlu1 %v3745_v60, %s4917_s19  ;;  %v3746_v2 = vsub.f32 %v6614_v56, %v6753_v51 }
0x1e26   :  { %v6758_v6 = vpop.eup %4882 }
0x1e27   :  { %3768 = vrot.lane.b32.xlu0 %v3746_v2, %s4917_s19  ;;  %v3747_v17 = vsub.f32 %v6619_v41, %v6758_v6 }
0x1e29   :  { %3770 = vrot.lane.b32.xlu1 %v3747_v17, %s4917_s19 }
0x1e8d   :  { %v3757_v33 = vpop.permute.xlu0 %3756 }
0x1e8e   :  { %v3780_v48 = vmul.f32 %v6684_v43, %v3757_v33 }
0x1e8f   :  { %v3761_v32 = vpop.permute.xlu1 %3760 }
0x1e90   :  { %v3782_v21 = vmul.f32 %v6687_v3, %v3761_v32  ;;  %3796 = vrot.lane.b32.xlu0 %v3780_v48, %s4918_s1  ;;  %v964_v48 = vrot.slane %v5363_v53, 7  ;;  %v969_v53 = vrot.slane %v5385_v36, 7  ;;  %v2950_v36 = vrot.slane %v6303_v1, 3 }
0x1e91   :  { %v3759_v4 = vpop.permute.xlu0 %3758  ;;  %v2951_v1 = vrot.slane %v6311_v0, 3  ;;  %v2952_v0 = vrot.slane %v6316_v29, 3 }
0x1e92   :  { %v3781_v35 = vmul.f32 %v6691_v16, %v3759_v4  ;;  %3800 = vrot.lane.b32.xlu1 %v3782_v21, %s4918_s1 }
0x1e93   :  { %v3763_v47 = vpop.permute.xlu1 %3762 }
0x1e94   :  { %v3783_v7 = vmul.f32 %v6695_v22, %v3763_v47  ;;  %3798 = vrot.lane.b32.xlu0 %v3781_v35, %s4918_s1 }
0x1e95   :  { %v3765_v60 = vpop.permute.xlu0 %3764 }
0x1e96   :  { %v3784_v2 = vmul.f32 %v6699_v34, %v3765_v60  ;;  %3802 = vrot.lane.b32.xlu1 %v3783_v7, %s4918_s1  ;;  %v965_v34 = vrot.slane %v5371_v59, 7  ;;  %v2948_v59 = vrot.slane %v6299_v5, 3  ;;  %v3444_v5 = vrot.slane %v6530_v18, 2 }
0x1e97   :  { %v3767_v43 = vpop.permute.xlu1 %3766  ;;  %v3446_v18 = vrot.slane %v6534_v19, 2 }
0x1e98   :  { %v3785_v3 = vmul.f32 %v6703_v28, %v3767_v43  ;;  %3804 = vrot.lane.b32.xlu0 %v3784_v2, %s4918_s1  ;;  %v966_v28 = vrot.slane %v5367_v58, 7  ;;  %v2949_v58 = vrot.slane %v6307_v27, 3  ;;  %v3445_v27 = vrot.slane %v6538_v40, 2 }
0x1e99   :  { %v3769_v17 = vpop.permute.xlu0 %3768  ;;  %v1958_v40 = vrot.slane %v5836_v49, 5 }
0x1e9a   :  { %v3786_v16 = vmul.f32 %v6707_v44, %v3769_v17  ;;  %3806 = vrot.lane.b32.xlu1 %v3785_v3, %s4918_s1  ;;  %v967_v44 = vrot.slane %v5375_v63, 7  ;;  %v1460_v63 = vrot.slane %v5600_v20, 6  ;;  %v1956_v20 = vrot.slane %v5832_v31, 5 }
0x1e9b   :  { %v3771_v33 = vpop.permute.xlu1 %3770  ;;  %v1463_v31 = vrot.slane %v5612_v8, 6 }
0x1e9c   :  { %v3787_v22 = vmul.f32 %v6711_v12, %v3771_v33  ;;  %3808 = vrot.lane.b32.xlu0 %v3786_v16, %s4918_s1  ;;  %v968_v12 = vrot.slane %v5380_v54, 7  ;;  %v1461_v54 = vrot.slane %v5608_v23, 6  ;;  %v1957_v23 = vrot.slane %v5840_v37, 5 }
0x1e9d   :  { %v3447_v37 = vrot.slane %v6542_v61, 2 }
0x1e9e   :  { %3810 = vrot.lane.b32.xlu1 %v3787_v22, %s4918_s1 }
0x1ea0   :  { %972 = vrot.lane.b32.xlu0 %v964_v48, %s4914_s27 }
0x1ea2   :  { %974 = vrot.lane.b32.xlu1 %v965_v34, %s4914_s27 }
0x1ea4   :  { %976 = vrot.lane.b32.xlu0 %v966_v28, %s4914_s27 }
0x1ea6   :  { %978 = vrot.lane.b32.xlu1 %v967_v44, %s4914_s27 }
0x1ea8   :  { %980 = vrot.lane.b32.xlu0 %v968_v12, %s4914_s27 }
0x1eaa   :  { %982 = vrot.lane.b32.xlu1 %v969_v53, %s4914_s27 }
0x1eac   :  { %2956 = vrot.lane.b32.xlu0 %v2948_v59, %s4914_s27 }
0x1eae   :  { %2958 = vrot.lane.b32.xlu1 %v2949_v58, %s4914_s27 }
0x1eb0   :  { %1468 = vrot.lane.b32.xlu0 %v1460_v63, %s4914_s27 }
0x1eb2   :  { %1470 = vrot.lane.b32.xlu1 %v1461_v54, %s4914_s27 }
0x1eb4   :  { %2960 = vrot.lane.b32.xlu0 %v2950_v36, %s4914_s27 }
0x1eb6   :  { %3452 = vrot.lane.b32.xlu1 %v3444_v5, %s4914_s27 }
0x1eb8   :  { %3454 = vrot.lane.b32.xlu0 %v3445_v27, %s4914_s27 }
0x1eba   :  { %1964 = vrot.lane.b32.xlu1 %v1956_v20, %s4914_s27 }
0x1ebc   :  { %1966 = vrot.lane.b32.xlu0 %v1957_v23, %s4914_s27  ;;  %v1462_v23 = vrot.slane %v5604_v57, 6  ;;  %v3448_v57 = vrot.slane %v6547_v50, 2 }
0x1ebe   :  { %2962 = vrot.lane.b32.xlu1 %v2951_v1, %s4914_s27 }
0x1ec0   :  { %3456 = vrot.lane.b32.xlu0 %v3446_v18, %s4914_s27 }
0x1ec2   :  { %1968 = vrot.lane.b32.xlu1 %v1958_v40, %s4914_s27 }
0x1ec4   :  { %1474 = vrot.lane.b32.xlu0 %v1463_v31, %s4914_s27 }
0x1ec6   :  { %3458 = vrot.lane.b32.xlu1 %v3447_v37, %s4914_s27 }
0x1ec8   :  { %2964 = vrot.lane.b32.xlu0 %v2952_v0, %s4914_s27 }
0x1f02   :  { %v3797_v19 = vpop.permute.xlu0 %3796 }
0x1f03   :  { %v3820_v32 = vadd.f32 %v6722_v11, %v3797_v19 }
0x1f04   :  { %v3801_v49 = vpop.permute.xlu1 %3800 }
0x1f05   :  { %v3828_v21 = vsub.f32 %v3820_v32, %v6593_v14  ;;  %v3940_v4 = vrot.slane %v3820_v32, 1  ;;  %v3822_v29 = vadd.f32 %v6727_v46, %v3801_v49 }
0x1f06   :  { %v3799_v8 = vpop.permute.xlu0 %3798 }
0x1f07   :  { %v3821_v35 = vadd.f32 %v6733_v62, %v3799_v8  ;;  %3948 = vrot.lane.b32.xlu0 %v3940_v4, %s4914_s27  ;;  %v3844_v47 = vrot.slane %v3828_v21, 1  ;;  %v3830_v3 = vsub.f32 %v3822_v29, %v6587_v45  ;;  %v3942_v17 = vrot.slane %v3822_v29, 1 }
0x1f08   :  { %v3803_v61 = vpop.permute.xlu1 %3802 }
0x1f09   :  { %v3829_v7 = vsub.f32 %v3821_v35, %v6590_v9  ;;  %v3941_v60 = vrot.slane %v3821_v35, 1  ;;  %v6834_v11 = vadd.f32 %v6738_v55, %v3803_v61  ;;  %v3846_v34 = vrot.slane %v3830_v3, 1 }
0x1f0a   :  { %v3805_v2 = vpop.permute.xlu0 %3804 }
0x1f0b   :  { %v6829_v43 = vadd.f32 %v6743_v10, %v3805_v2  ;;  %3852 = vrot.lane.b32.xlu0 %v3844_v47, %s4914_s27  ;;  %3950 = vrot.lane.b32.xlu1 %v3941_v60, %s4914_s27  ;;  %v3845_v16 = vrot.slane %v3829_v7, 1  ;;  %v3831_v55 = vsub.f32 %v6834_v11, %v6597_v38  ;;  %v7201_v2 = vld [vmem:[#allocation8_spill] sm:$0xff] }
0x1f0c   :  { %v3807_v62 = vpop.permute.xlu1 %3806  ;;  %v970_v50 = vrot.slane %v7201_v2, 7 }
0x1f0d   :  { %v3832_v46 = vsub.f32 %v6829_v43, %v6604_v42  ;;  %v6847_v10 = vadd.f32 %v6748_v25, %v3807_v62  ;;  %v3847_v53 = vrot.slane %v3831_v55, 1  ;;  %v7202_v62 = vld [vmem:[#allocation10_spill] sm:$0xff] }
0x1f0e   :  { %v3809_v33 = vpop.permute.xlu0 %3808  ;;  %v1464_v3 = vrot.slane %v7202_v62, 6 }
0x1f0f   :  { %v6840_v22 = vadd.f32 %v6753_v51, %v3809_v33  ;;  %3952 = vrot.lane.b32.xlu1 %v3942_v17, %s4914_s27  ;;  %3854 = vrot.lane.b32.xlu0 %v3845_v16, %s4914_s27  ;;  %v3848_v28 = vrot.slane %v3832_v46, 1  ;;  %v3833_v59 = vsub.f32 %v6847_v10, %v6609_v52 }
0x1f10   :  { %v3811_v48 = vpop.permute.xlu1 %3810 }
0x1f11   :  { %v3834_v44 = vsub.f32 %v6840_v22, %v6614_v56  ;;  %v6857_v63 = vadd.f32 %v6758_v6, %v3811_v48  ;;  %v3849_v18 = vrot.slane %v3833_v59, 1 }
0x1f12   :  { %v973_v12 = vpop.permute.xlu0 %972 }
0x1f13   :  { %v996_v51 = vmul.f32 %v5165_v15, %v973_v12  ;;  %3856 = vrot.lane.b32.xlu1 %v3846_v34, %s4914_s27  ;;  %3860 = vrot.lane.b32.xlu0 %v3848_v28, %s4914_s27  ;;  %v3850_v25 = vrot.slane %v3834_v44, 1  ;;  %v3835_v6 = vsub.f32 %v6857_v63, %v6619_v41  ;;  %v7203_v28 = vld [vmem:[#allocation15_spill] sm:$0xff]  ;;  %v3943_v12 = vrot.slane %v6834_v11, 1 }
0x1f14   :  { %v975_v58 = vpop.permute.xlu1 %974  ;;  %v1960_v44 = vrot.slane %v7203_v28, 5 }
0x1f15   :  { %v4013_v54 = vrot.slane %v996_v51, 1  ;;  %v997_v36 = vmul.f32 %v5148_v26, %v975_v58  ;;  %v3851_v21 = vrot.slane %v3835_v6, 1 }
0x1f16   :  { %v977_v5 = vpop.permute.xlu0 %976 }
0x1f17   :  { %v4014_v27 = vsel %vm518_vm6, %v997_v36, %v4013_v54  ;;  %v998_v20 = vmul.f32 %v5157_v13, %v977_v5  ;;  %3858 = vrot.lane.b32.xlu1 %v3847_v53, %s4914_s27  ;;  %3864 = vrot.lane.b32.xlu0 %v3850_v25, %s4914_s27  ;;  %v7204_v36 = vld [vmem:[#allocation11_spill] sm:$0xff] }
0x1f18   :  { %v979_v1 = vpop.permute.xlu1 %978  ;;  %v1465_v5 = vrot.slane %v7204_v36, 6 }
0x1f19   :  { %v4015_v40 = vrot.slane %v998_v20, 7  ;;  %v999_v31 = vmul.f32 %v5173_v24, %v979_v1  ;;  %v7205_v20 = vld [vmem:[#allocation30_spill] sm:$0xff] }
0x1f1a   :  { %v981_v37 = vpop.permute.xlu0 %980 }
0x1f1b   :  { %v4016_v0 = vsel %vm521_vm7, %v4015_v40, %v4014_v27  ;;  %v4017_v19 = vrot.slane %v999_v31, 6  ;;  %v1000_v32 = vmul.f32 %v5178_v30, %v981_v37  ;;  %3862 = vrot.lane.b32.xlu1 %v3849_v18, %s4914_s27  ;;  %1472 = vrot.lane.b32.xlu0 %v1462_v23, %s4914_s27  ;;  %v3449_v23 = vrot.slane %v7205_v20, 2  ;;  %v7206_v37 = vld [vmem:[#allocation28_spill] sm:$0xff] }
0x1f1c   :  { %v983_v49 = vpop.permute.xlu1 %982  ;;  %v3946_v20 = vrot.slane %v6840_v22, 1 }
0x1f1d   :  { %v4018_v4 = vsel %vm524_vm10, %v4017_v19, %v4016_v0  ;;  %v4019_v8 = vrot.slane %v1000_v32, 5  ;;  %v1001_v35 = vmul.f32 %v5193_v39, %v983_v49  ;;  %v2954_v0 = vrot.slane %v7206_v37, 3 }
0x1f1e   :  { %v2957_v61 = vpop.permute.xlu0 %2956  ;;  %v3944_v32 = vrot.slane %v6829_v43, 1 }
0x1f1f   :  { %v4020_v47 = vsel %vm527_vm11, %v4019_v8, %v4018_v4  ;;  %v4021_v29 = vrot.slane %v1001_v35, 4  ;;  %v2980_v7 = vmul.f32 %v5165_v15, %v2957_v61  ;;  %3866 = vrot.lane.b32.xlu1 %v3851_v21, %s4914_s27  ;;  %3460 = vrot.lane.b32.xlu0 %v3448_v57, %s4914_s27  ;;  %v7207_v61 = vld [vmem:[#allocation9_spill] sm:$0xff] }
0x1f20   :  { %v2959_v60 = vpop.permute.xlu1 %2958 }
0x1f21   :  { %v6882_v17 = vsel %vm530_vm13, %v4021_v29, %v4020_v47  ;;  %v2981_v16 = vmul.f32 %v5148_v26, %v2959_v60  ;;  %v4111_v33 = vrot.slane %v2980_v7, 5  ;;  %v971_v47 = vrot.slane %v7207_v61, 7  ;;  %v7208_v29 = vld [vmem:[#allocation12_spill] sm:$0xff] }
0x1f22   :  { %v1469_v46 = vpop.permute.xlu0 %1468  ;;  %v1466_v7 = vrot.slane %v7208_v29, 6 }
0x1f23   :  { %v4112_v55 = vrot.slane %v2981_v16, 4  ;;  %v1492_v48 = vmul.f32 %v5165_v15, %v1469_v46  ;;  %1476 = vrot.lane.b32.xlu1 %v1464_v3, %s4914_s27  ;;  %984 = vrot.lane.b32.xlu0 %v970_v50, %s4914_s27  ;;  %v7209_v3 = vld [vmem:[#allocation14_spill] sm:$0xff]  ;;  %v7210_v46 = vld [vmem:[#allocation16_spill] sm:$0xff] }
0x1f24   :  { %v1471_v34 = vpop.permute.xlu1 %1470  ;;  %v1959_v16 = vrot.slane %v7209_v3, 5 }
0x1f25   :  { %v4113_v51 = vsel %vm518_vm6, %v4112_v55, %v4111_v33  ;;  %v1493_v53 = vmul.f32 %v5148_v26, %v1471_v34  ;;  %v4038_v58 = vrot.slane %v1492_v48, 2  ;;  %v1961_v33 = vrot.slane %v7210_v46, 5  ;;  %v7211_v34 = vld [vmem:[#allocation27_spill] sm:$0xff] }
0x1f26   :  { %v2961_v59 = vpop.permute.xlu0 %2960  ;;  %v2953_v28 = vrot.slane %v7211_v34, 3 }
0x1f27   :  { %v4039_v25 = vrot.slane %v1493_v53, 1  ;;  %v2982_v54 = vmul.f32 %v5157_v13, %v2961_v59  ;;  %3954 = vrot.lane.b32.xlu1 %v3943_v12, %s4914_s27  ;;  %1972 = vrot.lane.b32.xlu0 %v1960_v44, %s4914_s27  ;;  %v7212_v44 = vld [vmem:[#allocation29_spill] sm:$0xff]  ;;  %v3945_v59 = vrot.slane %v6847_v10, 1  ;;  %v7217_v10 = vld [vmem:[#allocation31_spill] sm:$0xff] }
0x1f28   :  { %v3453_v27 = vpop.permute.xlu1 %3452  ;;  %v2955_v12 = vrot.slane %v7212_v44, 3 }
0x1f29   :  { %v6898_v11 = vsel %vm518_vm6, %v4039_v25, %v4038_v58  ;;  %v4114_v1 = vrot.slane %v2982_v54, 3  ;;  %v3476_v18 = vmul.f32 %v5165_v15, %v3453_v27  ;;  %v7214_v58 = vld [vmem:[#allocation17_spill] sm:$0xff]  ;;  %v7215_v54 = vld [vmem:[#allocation32_spill] sm:$0xff] }
0x1f2a   :  { %v3455_v6 = vpop.permute.xlu0 %3454  ;;  %v1962_v25 = vrot.slane %v7214_v58, 5  ;;  %v3451_v36 = vrot.slane %v7215_v54, 2 }
0x1f2b   :  { %v6902_v40 = vsel %vm521_vm7, %v4114_v1, %v4113_v51  ;;  %v3477_v31 = vmul.f32 %v5148_v26, %v3455_v6  ;;  %1478 = vrot.lane.b32.xlu1 %v1465_v5, %s4914_s27  ;;  %3462 = vrot.lane.b32.xlu0 %v3449_v23, %s4914_s27  ;;  %v4136_v57 = vrot.slane %v3476_v18, 6  ;;  %v7213_v51 = vld [vmem:[#allocation13_spill] sm:$0xff]  ;;  %v7216_v5 = vld [vmem:[#allocation18_spill] sm:$0xff]  ;;  %v3450_v23 = vrot.slane %v7217_v10, 2 }
0x1f2c   :  { %v1965_v19 = vpop.permute.xlu1 %1964  ;;  %v1467_v53 = vrot.slane %v7213_v51, 6  ;;  %v1963_v27 = vrot.slane %v7216_v5, 5  ;;  %v7218_v51 = vld [vmem:[#allocation5_spill] sm:$0xff] }
0x1f2d   :  { %v4137_v49 = vrot.slane %v3477_v31, 5  ;;  %v1988_v21 = vmul.f32 %v5165_v15, %v1965_v19 }
0x1f2e   :  { %v1967_v4 = vpop.permute.xlu0 %1966 }
0x1f2f   :  { %v4138_v8 = vsel %vm518_vm6, %v4137_v49, %v4136_v57  ;;  %v1989_v35 = vmul.f32 %v5148_v26, %v1967_v4  ;;  %2968 = vrot.lane.b32.xlu1 %v2954_v0, %s4914_s27  ;;  %3956 = vrot.lane.b32.xlu0 %v3944_v32, %s4914_s27  ;;  %v4063_v60 = vrot.slane %v1988_v21, 3 }
0x1f30   :  { %v6947_v1 = vpop.permute.xlu1 %2962 }
0x1f31   :  { %v4064_v2 = vrot.slane %v1989_v35, 2 }
0x1f32   :  { %v3457_v43 = vpop.permute.xlu0 %3456 }
0x1f33   :  { %v6917_v50 = vsel %vm518_vm6, %v4064_v2, %v4063_v60  ;;  %v3478_v62 = vmul.f32 %v5157_v13, %v3457_v43  ;;  %986 = vrot.lane.b32.xlu1 %v971_v47, %s4914_s27  ;;  %1480 = vrot.lane.b32.xlu0 %v1466_v7, %s4914_s27 }
0x1f34   :  { %v6951_v6 = vpop.permute.xlu1 %1968 }
0x1f35   :  { %v4139_v55 = vrot.slane %v3478_v62, 4 }
0x1f36   :  { %v6949_v18 = vpop.permute.xlu0 %1474 }
0x1f37   :  { %v6925_v48 = vsel %vm521_vm7, %v4139_v55, %v4138_v8  ;;  %1970 = vrot.lane.b32.xlu1 %v1959_v16, %s4914_s27  ;;  %1974 = vrot.lane.b32.xlu0 %v1961_v33, %s4914_s27 }
0x1f38   :  { %v6955_v37 = vpop.permute.xlu1 %3458 }
0x1f3a   :  { %v6953_v31 = vpop.permute.xlu0 %2964 }
0x1f3b   :  { %2966 = vrot.lane.b32.xlu1 %v2953_v28, %s4914_s27  ;;  %2970 = vrot.lane.b32.xlu0 %v2955_v12, %s4914_s27 }
0x1f3f   :  { %1482 = vrot.lane.b32.xlu1 %v1467_v53, %s4914_s27  ;;  %3958 = vrot.lane.b32.xlu0 %v3945_v59, %s4914_s27 }
0x1f43   :  { %3466 = vrot.lane.b32.xlu1 %v3451_v36, %s4914_s27  ;;  %1976 = vrot.lane.b32.xlu0 %v1962_v25, %s4914_s27 }
0x1f47   :  { %3960 = vrot.lane.b32.xlu1 %v3946_v20, %s4914_s27  ;;  %1978 = vrot.lane.b32.xlu0 %v1963_v27, %s4914_s27  ;;  %v7219_v20 = vld [vmem:[#allocation6_spill] sm:$0xff] }
0x1f4b   :  { %3464 = vrot.lane.b32.xlu1 %v3450_v23, %s4914_s27  ;;  %v3947_v23 = vrot.slane %v6857_v63, 1  ;;  %v7222_v63 = vld [vmem:[#allocation22_spill] sm:$0xff] }
0x1f79   :  { %v3949_v0 = vpop.permute.xlu0 %3948 }
0x1f7a   :  { %v3972_v22 = vmul.f32 %v5165_v15, %v3949_v0 }
0x1f7c   :  { %v4161_v21 = vrot.slane %v3972_v22, 7 }
0x1f7d   :  { %v3951_v19 = vpop.permute.xlu1 %3950  ;;  %v3853_v32 = vpop.permute.xlu0 %3852 }
0x1f7e   :  { %v3973_v57 = vmul.f32 %v5148_v26, %v3951_v19  ;;  %v3876_v49 = vmul.f32 %v5165_v15, %v3853_v32  ;;  %v7220_v32 = vld [vmem:[#allocation21_spill] sm:$0xff] }
0x1f80   :  { %v4162_v4 = vrot.slane %v3973_v57, 6  ;;  %v3892_v8 = vrot.slane %v3876_v49, 7  ;;  %v2453_v57 = vrot.slane %v7220_v32, 4  ;;  %v7221_v49 = vld [vmem:[#allocation19_spill] sm:$0xff] }
0x1f81   :  { %v3953_v35 = vpop.permute.xlu1 %3952  ;;  %v3855_v61 = vpop.permute.xlu0 %3854 }
0x1f82   :  { %v4163_v47 = vsel %vm518_vm6, %v4162_v4, %v4161_v21  ;;  %v3974_v29 = vmul.f32 %v5157_v13, %v3953_v35  ;;  %v3877_v7 = vmul.f32 %v5148_v26, %v3855_v61  ;;  %3900 = vrot.lane.b32.xlu1 %v3892_v8, %s4914_s27  ;;  %v2452_v21 = vrot.slane %v7221_v49, 4 }
0x1f83   :  { %v2455_v61 = vrot.slane %v7222_v63, 4  ;;  %v1495_v63 = vmul.f32 %v5173_v24, %v6949_v18 }
0x1f84   :  { %v4164_v60 = vrot.slane %v3974_v29, 5  ;;  %v3893_v2 = vrot.slane %v3877_v7, 7  ;;  %v7223_v29 = vld [vmem:[#allocation20_spill] sm:$0xff] }
0x1f85   :  { %v3857_v43 = vpop.permute.xlu1 %3856  ;;  %v3861_v62 = vpop.permute.xlu0 %3860  ;;  %v2454_v7 = vrot.slane %v7223_v29, 4  ;;  %v7228_v29 = vld [vmem:[#allocation7_spill] sm:$0xff] }
0x1f86   :  { %v4165_v3 = vsel %vm521_vm7, %v4164_v60, %v4163_v47  ;;  %v3878_v16 = vmul.f32 %v5157_v13, %v3857_v43  ;;  %v3880_v46 = vmul.f32 %v5178_v30, %v3861_v62  ;;  %3902 = vrot.lane.b32.xlu1 %v3893_v2, %s4914_s27  ;;  %v7224_v62 = vld [vmem:[#allocation23_spill] sm:$0xff] }
0x1f88   :  { %v3894_v33 = vrot.slane %v3878_v16, 7  ;;  %v3896_v55 = vrot.slane %v3880_v46, 7  ;;  %v2456_v16 = vrot.slane %v7224_v62, 4  ;;  %v7225_v46 = vld [vmem:[#allocation24_spill] sm:$0xff] }
0x1f89   :  { %v3859_v34 = vpop.permute.xlu1 %3858  ;;  %v3865_v28 = vpop.permute.xlu0 %3864 }
0x1f8a   :  { %v3879_v44 = vmul.f32 %v5173_v24, %v3859_v34  ;;  %3904 = vrot.lane.b32.xlu0 %v3894_v33, %s4914_s27  ;;  %3908 = vrot.lane.b32.xlu1 %v3896_v55, %s4914_s27  ;;  %v3882_v53 = vmul.f32 %v7218_v51, %v3865_v28  ;;  %v2457_v33 = vrot.slane %v7225_v46, 4 }
0x1f8c   :  { %v3895_v12 = vrot.slane %v3879_v44, 7  ;;  %v3898_v54 = vrot.slane %v3882_v53, 7 }
0x1f8d   :  { %v3863_v59 = vpop.permute.xlu1 %3862  ;;  %v1473_v58 = vpop.permute.xlu0 %1472 }
0x1f8e   :  { %v3881_v25 = vmul.f32 %v5193_v39, %v3863_v59  ;;  %3906 = vrot.lane.b32.xlu0 %v3895_v12, %s4914_s27  ;;  %v7226_v12 = vld [vmem:[#allocation26_spill] sm:$0xff]  ;;  %v7227_v59 = vld [vmem:[#allocation25_spill] sm:$0xff] }
0x1f90   :  { %v3897_v36 = vrot.slane %v3881_v25, 7  ;;  %v2458_v25 = vrot.slane %v7227_v59, 4 }
0x1f91   :  { %v3867_v5 = vpop.permute.xlu1 %3866  ;;  %v6974_v27 = vpop.permute.xlu0 %3460 }
0x1f92   :  { %v3883_v10 = vmul.f32 %v7219_v20, %v3867_v5  ;;  %3910 = vrot.lane.b32.xlu1 %v3897_v36, %s4914_s27  ;;  %3912 = vrot.lane.b32.xlu0 %v3898_v54, %s4914_s27 }
0x1f94   :  { %v3899_v0 = vrot.slane %v3883_v10, 7  ;;  %v2983_v10 = vmul.f32 %v5173_v24, %v6947_v1  ;;  %v1494_v1 = vmul.f32 %v5157_v13, %v1473_v58  ;;  %v1990_v58 = vmul.f32 %v5157_v13, %v6951_v6 }
0x1f95   :  { %v1477_v22 = vpop.permute.xlu1 %1476  ;;  %v985_v19 = vpop.permute.xlu0 %984 }
0x1f96   :  { %3962 = vrot.lane.b32.xlu1 %v3947_v23, %s4914_s27  ;;  %3914 = vrot.lane.b32.xlu0 %v3899_v0, %s4914_s27  ;;  %v1002_v55 = vmul.f32 %v7218_v51, %v985_v19  ;;  %v2984_v19 = vmul.f32 %v5178_v30, %v6953_v31 }
0x1f98   :  { %v4023_v54 = vrot.slane %v1002_v55, 3 }
0x1f99   :  { %v3955_v4 = vpop.permute.xlu1 %3954  ;;  %v6984_v8 = vpop.permute.xlu0 %1972 }
0x1f9a   :  { %v3975_v35 = vmul.f32 %v5173_v24, %v3955_v4  ;;  %2462 = vrot.lane.b32.xlu1 %v2453_v57, %s4914_s27  ;;  %2460 = vrot.lane.b32.xlu0 %v2452_v21, %s4914_s27  ;;  %v4024_v57 = vsel %vm533_vm14, %v4023_v54, %v6882_v17  ;;  %v4116_v4 = vrot.slane %v2983_v10, 2 }
0x1f9c   :  { %v4166_v47 = vrot.slane %v3975_v35, 4  ;;  %v4117_v18 = vsel %vm524_vm10, %v4116_v4, %v6902_v40 }
0x1f9d   :  { %v1479_v60 = vpop.permute.xlu1 %1478  ;;  %v6991_v2 = vpop.permute.xlu0 %3462 }
0x1f9e   :  { %v4167_v43 = vsel %vm524_vm10, %v4166_v47, %v4165_v3  ;;  %2466 = vrot.lane.b32.xlu1 %v2455_v61, %s4914_s27  ;;  %2464 = vrot.lane.b32.xlu0 %v2454_v7, %s4914_s27  ;;  %v2459_v3 = vrot.slane %v7226_v12, 4  ;;  %v4118_v61 = vrot.slane %v2984_v19, 1  ;;  %v1496_v47 = vmul.f32 %v5178_v30, %v1477_v22 }
0x1f9f   :  { %v1497_v17 = vmul.f32 %v5193_v39, %v1479_v60  ;;  %v4041_v22 = vsel %vm521_vm7, %v1494_v1, %v6898_v11  ;;  %v4066_v12 = vrot.slane %v1990_v58, 1  ;;  %v3479_v1 = vmul.f32 %v5173_v24, %v6955_v37 }
0x1fa0   :  { %v4119_v60 = vsel %vm527_vm11, %v4118_v61, %v4117_v18  ;;  %v4044_v55 = vrot.slane %v1496_v47, 6 }
0x1fa1   :  { %v2969_v34 = vpop.permute.xlu1 %2968  ;;  %v3957_v28 = vpop.permute.xlu0 %3956  ;;  %v4046_v6 = vrot.slane %v1497_v17, 5 }
0x1fa2   :  { %v3976_v44 = vmul.f32 %v5178_v30, %v3957_v28  ;;  %2468 = vrot.lane.b32.xlu1 %v2456_v16, %s4914_s27  ;;  %2470 = vrot.lane.b32.xlu0 %v2457_v33, %s4914_s27  ;;  %v2986_v31 = vmul.f32 %v7218_v51, %v2969_v34  ;;  %v4042_v33 = vrot.slane %v1495_v63, 7 }
0x1fa4   :  { %v4168_v53 = vrot.slane %v3976_v44, 3  ;;  %v4121_v34 = vrot.slane %v2986_v31, 7 }
0x1fa5   :  { %v987_v36 = vpop.permute.xlu1 %986  ;;  %v1481_v5 = vpop.permute.xlu0 %1480 }
0x1fa6   :  { %v4169_v23 = vsel %vm527_vm11, %v4168_v53, %v4167_v43  ;;  %v1003_v0 = vmul.f32 %v7219_v20, %v987_v36  ;;  %2474 = vrot.lane.b32.xlu1 %v2459_v3, %s4914_s27  ;;  %2472 = vrot.lane.b32.xlu0 %v2458_v25, %s4914_s27  ;;  %v1498_v7 = vmul.f32 %v7218_v51, %v1481_v5 }
0x1fa7   :  { %v4043_v3 = vsel %vm524_vm10, %v4042_v33, %v4041_v22 }
0x1fa8   :  { %v4025_v32 = vrot.slane %v1003_v0, 2  ;;  %v4048_v40 = vrot.slane %v1498_v7, 4  ;;  %v4045_v10 = vsel %vm527_vm11, %v4044_v55, %v4043_v3  ;;  %v1992_v0 = vmul.f32 %v5178_v30, %v6984_v8 }
0x1fa9   :  { %v1971_v49 = vpop.permute.xlu1 %1970  ;;  %v1975_v21 = vpop.permute.xlu0 %1974  ;;  %v4047_v19 = vsel %vm530_vm13, %v4046_v6, %v4045_v10 }
0x1faa   :  { %v4026_v35 = vsel %vm536_vm15, %v4025_v32, %v4024_v57  ;;  %4002 = vrot.lane.b32.xlu0 %v7228_v29, %s4914_s27  ;;  %v1991_v25 = vmul.f32 %v5173_v24, %v1971_v49  ;;  %v1993_v32 = vmul.f32 %v5193_v39, %v1975_v21  ;;  %v4067_v49 = vsel %vm521_vm7, %v4066_v12, %v6917_v50 }
0x1fab   :  { %4027 = vrot.lane.b32.xlu1 %v4026_v35, %s4918_s1  ;;  %v3480_v35 = vmul.f32 %v5178_v30, %v6974_v27  ;;  %v4049_v63 = vsel %vm533_vm14, %v4048_v40, %v4047_v19  ;;  %v4069_v17 = vrot.slane %v1992_v0, 7  ;;  %v3481_v50 = vmul.f32 %v5193_v39, %v6991_v2 }
0x1fac   :  { %v4068_v47 = vsel %vm524_vm10, %v1991_v25, %v4067_v49  ;;  %v4071_v37 = vrot.slane %v1993_v32, 6  ;;  %v4141_v27 = vrot.slane %v3479_v1, 3 }
0x1fad   :  { %v2967_v43 = vpop.permute.xlu1 %2966  ;;  %v2971_v62 = vpop.permute.xlu0 %2970  ;;  %v4070_v58 = vsel %vm527_vm11, %v4069_v17, %v4068_v47  ;;  %v4143_v18 = vrot.slane %v3480_v35, 2 }
0x1fae   :  { %v2985_v16 = vmul.f32 %v5193_v39, %v2967_v43  ;;  %v2987_v46 = vmul.f32 %v7219_v20, %v2971_v62  ;;  %v4072_v33 = vsel %vm530_vm13, %v4071_v37, %v4070_v58  ;;  %v4142_v55 = vsel %vm524_vm10, %v4141_v27, %v6925_v48 }
0x1fb0   :  { %v4120_v28 = vsel %vm530_vm13, %v2985_v16, %v4119_v60  ;;  %v4123_v44 = vrot.slane %v2987_v46, 6  ;;  %v4145_v16 = vrot.slane %v3481_v50, 1 }
0x1fb1   :  { %v1483_v53 = vpop.permute.xlu1 %1482  ;;  %v3959_v59 = vpop.permute.xlu0 %3958  ;;  %v4122_v11 = vsel %vm533_vm14, %v4121_v34, %v4120_v28  ;;  %v4144_v28 = vsel %vm527_vm11, %v4143_v18, %v4142_v55 }
0x1fb2   :  { %v1499_v54 = vmul.f32 %v7219_v20, %v1483_v53  ;;  %v3977_v36 = vmul.f32 %v5193_v39, %v3959_v59  ;;  %v4124_v5 = vsel %vm536_vm15, %v4123_v44, %v4122_v11  ;;  %v4146_v40 = vsel %vm530_vm13, %v4145_v16, %v4144_v28 }
0x1fb3   :  { %4125 = vrot.lane.b32.xlu0 %v4124_v5, %s4918_s1 }
0x1fb4   :  { %v4050_v57 = vrot.slane %v1499_v54, 3  ;;  %v4170_v4 = vrot.slane %v3977_v36, 2 }
0x1fb5   :  { %v3467_v8 = vpop.permute.xlu1 %3466  ;;  %v1977_v61 = vpop.permute.xlu0 %1976 }
0x1fb6   :  { %v4171_v31 = vsel %vm530_vm13, %v4170_v4, %v4169_v23  ;;  %v1994_v21 = vmul.f32 %v7218_v51, %v1977_v61  ;;  %v4051_v29 = vsel %vm536_vm15, %v4050_v57, %v4049_v63  ;;  %v3483_v46 = vmul.f32 %v7219_v20, %v3467_v8 }
0x1fb7   :  { %4052 = vrot.lane.b32.xlu1 %v4051_v29, %s4914_s27 }
0x1fb8   :  { %v4073_v7 = vrot.slane %v1994_v21, 5  ;;  %v4148_v53 = vrot.slane %v3483_v46, 7 }
0x1fb9   :  { %v3961_v43 = vpop.permute.xlu1 %3960  ;;  %v1979_v62 = vpop.permute.xlu0 %1978 }
0x1fba   :  { %v3978_v23 = vmul.f32 %v7218_v51, %v3961_v43  ;;  %v1995_v22 = vmul.f32 %v7219_v20, %v1979_v62  ;;  %v4074_v34 = vsel %vm533_vm14, %v4073_v7, %v4072_v33 }
0x1fbc   :  { %v4172_v2 = vrot.slane %v3978_v23, 1  ;;  %v4075_v60 = vrot.slane %v1995_v22, 4 }
0x1fbd   :  { %v3465_v6 = vpop.permute.xlu1 %3464 }
0x1fbe   :  { %v4173_v44 = vsel %vm533_vm14, %v4172_v2, %v4171_v31  ;;  %v3482_v12 = vmul.f32 %v7218_v51, %v3465_v6  ;;  %v4076_v3 = vsel %vm536_vm15, %v4075_v60, %v4074_v34 }
0x1fbf   :  { %4077 = vrot.lane.b32.xlu1 %v4076_v3, %s4917_s19 }
0x1fc0   :  { %v4147_v59 = vsel %vm533_vm14, %v3482_v12, %v4146_v40 }
0x1fc1   :  { %v4149_v48 = vsel %vm536_vm15, %v4148_v53, %v4147_v59 }
0x1fc2   :  { %4150 = vrot.lane.b32.xlu0 %v4149_v48, %s4914_s27 }
0x1ff4   :  { %v3901_v11 = vpop.permute.xlu1 %3900 }
0x1ff5   :  { %v3924_v57 = vadd.f32 %v3901_v11, %v6593_v14 }
0x1ff8   :  { %v3903_v25 = vpop.permute.xlu1 %3902 }
0x1ff9   :  { %v3925_v54 = vadd.f32 %v3903_v25, %v6590_v9 }
0x1ffb   :  { %v4196_v10 = vrot.slane %v3925_v54, 7 }
0x1ffc   :  { %v3905_v36 = vpop.permute.xlu0 %3904  ;;  %v3909_v0 = vpop.permute.xlu1 %3908 }
0x1ffd   :  { %v3926_v5 = vadd.f32 %v3905_v36, %v6587_v45  ;;  %v3928_v49 = vadd.f32 %v3909_v0, %v6604_v42  ;;  %v4197_v1 = vsel %vm518_vm6, %v4196_v10, %v3924_v57 }
0x1fff   :  { %v4198_v19 = vrot.slane %v3926_v5, 6  ;;  %v4202_v31 = vrot.slane %v3928_v49, 4 }
0x2000   :  { %v3907_v32 = vpop.permute.xlu0 %3906 }
0x2001   :  { %v3927_v4 = vadd.f32 %v3907_v32, %v6597_v38  ;;  %v4199_v63 = vsel %vm521_vm7, %v4198_v19, %v4197_v1 }
0x2003   :  { %v4200_v35 = vrot.slane %v3927_v4, 5 }
0x2004   :  { %v3911_v8 = vpop.permute.xlu1 %3910  ;;  %v3913_v9 = vpop.permute.xlu0 %3912 }
0x2005   :  { %v4201_v61 = vsel %vm524_vm10, %v4200_v35, %v4199_v63  ;;  %v3929_v45 = vadd.f32 %v3911_v8, %v6609_v52  ;;  %v3930_v47 = vadd.f32 %v3913_v9, %v6614_v56 }
0x2006   :  { %v4203_v14 = vsel %vm527_vm11, %v4202_v31, %v4201_v61 }
0x2007   :  { %v4204_v21 = vrot.slane %v3929_v45, 3  ;;  %v4206_v38 = vrot.slane %v3930_v47, 2 }
0x2008   :  { %v3963_v29 = vpop.permute.xlu1 %3962  ;;  %v3915_v42 = vpop.permute.xlu0 %3914 }
0x2009   :  { %v4205_v17 = vsel %vm530_vm13, %v4204_v21, %v4203_v14  ;;  %v3979_v50 = vmul.f32 %v7219_v20, %v3963_v29  ;;  %v3931_v37 = vadd.f32 %v3915_v42, %v6619_v41 }
0x200a   :  { %v4207_v52 = vsel %vm533_vm14, %v4206_v38, %v4205_v17 }
0x200b   :  { %v4208_v27 = vrot.slane %v3931_v37, 1  ;;  %v4174_v58 = vsel %vm536_vm15, %v3979_v50, %v4173_v44 }
0x200c   :  { %v2463_v7 = vpop.permute.xlu1 %2462  ;;  %4175 = vrot.lane.b32.xlu0 %v4174_v58, %s4917_s19  ;;  %v2461_v43 = vpop.permute.xlu0 %2460  ;;  %s4919_s19 = smov [#allocation2]  }
0x200d   :  { %v2485_v56 = vmul.f32 %v5148_v26, %v2463_v7  ;;  %v4209_v62 = vsel %vm536_vm15, %v4208_v27, %v4207_v52  ;;  %v2484_v18 = vmul.f32 %v5165_v15, %v2461_v43  ;;  %s4222_s1 = sshll.u32 %s4919_s19, 4  ;;  %s4223_s1 = int_to_ptr.vmem [resolvable:$true] %s4222_s1 }
0x200e   :  { %4210 = vrot.lane.b32.xlu1 %v4209_v62, %s4914_s27  ;;  %s4887_s20 = scalar_lea.vmem %s4223_s1, 128  ;;  %p4892_p1 = scmp.lt.s32.totalorder %s4223_s1, %s4223_s1 }
0x200f   :  { %v4089_v23 = vrot.slane %v2485_v56, 3  ;;  %v4088_v22 = vrot.slane %v2484_v18, 4  ;;  %p4888_p0 = scmp.ne.s32.totalorder %s4223_s1, %s4887_s20  ;;  %p4893_p2 = scmp.lt.s32.totalorder %s4887_s20, %s4887_s20 }
0x2010   :  { %v2467_v41 = vpop.permute.xlu1 %2466  ;;  %v2465_v46 = vpop.permute.xlu0 %2464 }
0x2011   :  { %v2487_v16 = vmul.f32 %v5173_v24, %v2467_v41  ;;  %v4090_v33 = vsel %vm518_vm6, %v4089_v23, %v4088_v22  ;;  %v2486_v2 = vmul.f32 %v5157_v13, %v2465_v46  ;;  %p4894_p3 = por %p4893_p2, %p4892_p1 }
0x2013   :  { %v4093_v60 = vrot.slane %v2487_v16, 1  ;;  %v4091_v55 = vrot.slane %v2486_v2, 2  ;;  %p4895_p4 = pnand %p4894_p3, %p4888_p0 }
0x2014   :  { %v2469_v26 = vpop.permute.xlu1 %2468  ;;  %v2471_v6 = vpop.permute.xlu0 %2470 }
0x2015   :  { %v2488_v34 = vmul.f32 %v5178_v30, %v2469_v26  ;;  %v4092_v15 = vsel %vm521_vm7, %v4091_v55, %v4090_v33  ;;  %v2489_v28 = vmul.f32 %v5193_v39, %v2471_v6 }
0x2016   :  { %v4094_v44 = vsel %vm524_vm10, %v4093_v60, %v4092_v15 }
0x2017   :  { %v4095_v12 = vsel %vm527_vm11, %v2488_v34, %v4094_v44  ;;  %v4096_v24 = vrot.slane %v2489_v28, 7 }
0x2018   :  { %v2475_v3 = vpop.permute.xlu1 %2474  ;;  %v2473_v53 = vpop.permute.xlu0 %2472 }
0x2019   :  { %v2491_v40 = vmul.f32 %v7219_v20, %v2475_v3  ;;  %v4097_v13 = vsel %vm530_vm13, %v4096_v24, %v4095_v12  ;;  %v2490_v59 = vmul.f32 %v7218_v51, %v2473_v53 }
0x201b   :  { %v4100_v48 = vrot.slane %v2491_v40, 5  ;;  %v4098_v30 = vrot.slane %v2490_v59, 6 }
0x201c   :  { %v4003_v54 = vpop.permute.xlu0 %4002 }
0x201d   :  { %v4099_v11 = vsel %vm533_vm14, %v4098_v30, %v4097_v13  ;;  %v4028_v39 = vpop.permute.xlu1 %4027 }
0x201e   :  { %v4101_v25 = vsel %vm536_vm15, %v4100_v48, %v4099_v11  ;;  %v4178_v5 = vsel %vm171_vm1, %v4003_v54, %v4028_v39 }
0x2025   :  { %v4126_v10 = vpop.permute.xlu0 %4125 }
0x2026   :  { %v4183_v51 = vsel %vm171_vm1, %v4101_v25, %v4126_v10 }
0x2029   :  { %v4053_v36 = vpop.permute.xlu1 %4052 }
0x202a   :  { %v4180_v20 = vsel %vm4179_vm0, %v4178_v5, %v4053_v36 }
0x2031   :  { %v4078_v0 = vpop.permute.xlu1 %4077 }
0x2032   :  { %v4182_v19 = vsel %vm4181_vm2, %v4180_v20, %v4078_v0 }
0x2033   :  { %4186 = vst [vmem:[%s7137_s4] sm:$0xff] %v4182_v19 }
0x2034   :  { %v4151_v32 = vpop.permute.xlu0 %4150 }
0x2035   :  { %v4184_v57 = vsel %vm4179_vm0, %v4183_v51, %v4151_v32 }
0x207e   :  { %v4176_v4 = vpop.permute.xlu0 %4175 }
0x207f   :  { %v4185_v49 = vsel %vm4181_vm2, %v4184_v57, %v4176_v4 }
0x2080   :  { %4187 = vst [vmem:[%s7137_s4 + $0x8] sm:$0xff] %v4185_v49  ;;  %v4211_v1 = vpop.permute.xlu1 %4210 }
0x2081   :  { %4213 = vst.msk [vmem:[#allocation2] sm:$0xff] %vm171_vm1, %v4211_v1 }
0x2082   :  { %4898 = shalt.err (!%p4895_p4)
}
0x2083   :  { %s4899_s23 = scalar_lea.hbm %s7138_s5, 128 }
0x2084   :  { %p4900_p5 = scmp.ne.s32.totalorder %s7138_s5, %s4899_s23  ;;  %p4903_p6 = scmp.lt.u32.totalorder %s4899_s23, %s7138_s5 }
0x2086   :  { %p4905_p7 = pnand %p4903_p6, %p4900_p5 }
0x2088   :  { %4908 = shalt.err (!%p4905_p7)
}
0x2089   :  { %4225 = dma.vmem_to_hbm [thread:$0]  %s4223_s1, 128, %s7138_s5, [#allocation3]  }
0x208a   :  { %4909 = dma.done.wait [#allocation3], 128  }
0x208b   :  { %4910 = vsyncadd [#allocation3], 4294967168 }
0x208c   :  { %4231 = vsyncpa [#allocation3], 1 }

</bundles_post_ra>
